<compile_context>
chip_gen: v7x
topology: tpu7x:2x2x1
jax: 0.10.0
libtpu: 0.0.40
codegen_flags: <defaults>
</compile_context>

<pallas_src>
import functools

import jax
import jax.numpy as jnp
import numpy as np
from jax import lax
from jax.experimental import pallas as pl
from jax.experimental.pallas import tpu as pltpu


def _nonlocal_cost_all_kernel(src_ref, tgt_ref, w0_ref, wslab_ref, bslab_ref,
                              out_ref, att_ref, *, num_channels, num_layers):
    Bt = tgt_ref.shape[0]          # batch elements per grid step
    n = tgt_ref.shape[1]           # number of target keypoint sets
    N = tgt_ref.shape[3]           # num_corr
    S = num_channels
    L = num_layers

    f32 = jnp.float32
    bf16 = jnp.bfloat16

    def conv(row0, rows, x_bf16):
        # 1x1 conv over the full lane-batched slab: bf16 operands, f32
        # accumulation, f32 bias add.  row0/rows are static Python ints.
        w = wslab_ref[row0:row0 + rows, :]               # [rows, S] bf16
        b = bslab_ref[row0:row0 + rows, :]               # [rows, 1] f32
        return jnp.dot(w, x_bf16, preferred_element_type=f32) + b

    def mat3(w, p):
        # [C,3] x [3,N] as three VPU outer-product FMAs (K=3 is far too small
        # to be worth an MXU push).
        return (w[:, 0:1] * p[0:1, :] + w[:, 1:2] * p[1:2, :]
                + w[:, 2:3] * p[2:3, :])

    def pdist(p):
        # Pairwise Euclidean distances via Gram expansion, all in f32.
        g = lax.dot_general(p, p, (((0,), (0,)), ((), ())),
                            preferred_element_type=f32)              # [N, N]
        sq = jnp.sum(p * p, axis=0, keepdims=True)                   # [1, N]
        return jnp.sqrt(jnp.maximum(sq + sq.T - 2.0 * g, 0.0))

    w0_src = w0_ref[:, 0:3]
    w0_tgt = w0_ref[:, 3:6]
    b0 = w0_ref[:, 6:7]

    # ---- layer0 features + attention masks for all (batch, target) pairs ----
    feat_cols = []
    for b in range(Bt):
        sp = src_ref[b]                                              # [3, N]
        sp_c = sp - jnp.mean(sp, axis=-1, keepdims=True)
        d_src = pdist(sp)                                            # once per batch elem
        f_src = mat3(w0_src, sp_c) + b0                              # once per batch elem
        for i in range(n):
            tp = tgt_ref[b, i]                                       # [3, N]
            tp_c = tp - jnp.mean(tp, axis=-1, keepdims=True)
            comp = d_src - pdist(tp)
            att_ref[b * n + i] = jnp.maximum(1.0 - comp * comp / (1.2 ** 2), 0.0)
            feat_cols.append(f_src + mat3(w0_tgt, tp_c))             # [C, N]
    feat = jnp.concatenate(feat_cols, axis=1)                        # [C, Bt*n*N] f32

    # ---------------------------- layer loop ---------------------------------
    for l in range(L):
        base = l * 7 * S

        # PointCN layer: Conv1d + folded (eval-mode) BatchNorm + ReLU
        feat = jnp.maximum(conv(base, S, feat.astype(bf16)), 0.0)

        # NonLocalBlock projections: one fused Q/K/V matmul (1/sqrt(C) scale
        # already folded into the Q rows at pack time).
        qkv = conv(base + S, 3 * S, feat.astype(bf16)).astype(bf16)  # [3S, lanes]
        q = qkv[0:S]
        k = qkv[S:2 * S]
        v = qkv[2 * S:3 * S]

        msgs = []
        for t in range(Bt * n):
            lo = t * N
            qi = q[:, lo:lo + N]
            ki = k[:, lo:lo + N]
            vi = v[:, lo:lo + N]
            # Transposed logits: faT[j, o] = K[:, j] . Q[:, o].  Since att is
            # symmetric, att * faT == (att * fa)^T, so softmax goes over axis 0
            # and the message matmul below is MXU-native (no [N,N] transpose).
            faT = lax.dot_general(ki, qi, (((0,), (0,)), ((), ())),
                                  preferred_element_type=f32)        # [N, N]
            logits = att_ref[t] * faT                                # f32 path
            logits = logits - jnp.max(logits, axis=0, keepdims=True)
            wts = jnp.exp(logits)
            wts = wts * pl.reciprocal(jnp.sum(wts, axis=0, keepdims=True),
                                      approx=True)
            # message[c, o] = sum_j V[c, j] * wts[j, o]
            msgs.append(jnp.dot(vi, wts.astype(bf16),
                                preferred_element_type=f32))
        msg = jnp.concatenate(msgs, axis=1)                          # [C, lanes]

        # fc_message: conv->BN->ReLU->conv->BN->ReLU->conv (BN folded; the
        # C/2-sized layers are zero-padded to S rows/cols in the slab).
        m = jnp.maximum(conv(base + 4 * S, S, msg.astype(bf16)), 0.0)
        m = jnp.maximum(conv(base + 5 * S, S, m.astype(bf16)), 0.0)
        m = conv(base + 6 * S, S, m.astype(bf16))
        feat = feat + m

    # Lane-dense writeback: per batch element a [C, n*N] slab (n*N mult of 128).
    for b in range(Bt):
        out_ref[b] = feat[:, b * (n * N):(b + 1) * (n * N)]


def nonlocal_net_cost_all(src_keypts, tgt_keypts_all, params, *, batch_tile=None):
    """src_keypts: [B, N, 3]; tgt_keypts_all: [B, N, n, 3] -> [B, C, n, N]."""
    B, N, n, _ = tgt_keypts_all.shape
    C = params["W0"].shape[0]
    in_dim = params["W0"].shape[1]
    L = params["Wp"].shape[0]
    assert in_dim == 6, "forward pass hard-codes cat(src_xyz, tgt_xyz)"
    S = C

    # Batch tile: widen the lane batch when B is large, but keep >= 2 parallel
    # grid steps so both v7x TensorCores stay busy.
    if batch_tile is None:
        batch_tile = 1
        for cand in (4, 2):
            if B % cand == 0 and (B // cand) >= 2:
                batch_tile = cand
                break
    Bt = batch_tile
    assert B % Bt == 0

    src_p = jnp.transpose(src_keypts, (0, 2, 1)).astype(jnp.float32)          # [B, 3, N]
    tgt_p = jnp.transpose(tgt_keypts_all, (0, 2, 3, 1)).astype(jnp.float32)   # [B, n, 3, N]

    # ---- pack weights / biases into slabs (few DMAs, static row offsets) ----
    inv_sqrt_c = 1.0 / np.sqrt(float(C))

    def pad_w(W):
        o, i = W.shape
        return jnp.zeros((S, S), jnp.float32).at[:o, :i].set(W)

    def pad_b(b):
        b = jnp.reshape(b, (-1,))
        return jnp.zeros((S, 1), jnp.float32).at[:b.shape[0], 0].set(b)

    w_rows, b_rows = [], []
    for l in range(L):
        # row layout per layer: [Wp | Wq Wk Wv (fused) | W1 | W2 | W3]
        w_rows.append(pad_w(params["Wp"][l]));               b_rows.append(pad_b(params["bp"][l]))
        w_rows.append(pad_w(params["Wq"][l] * inv_sqrt_c));  b_rows.append(pad_b(params["bq"][l] * inv_sqrt_c))
        w_rows.append(pad_w(params["Wk"][l]));                b_rows.append(pad_b(params["bk"][l]))
        w_rows.append(pad_w(params["Wv"][l]));                b_rows.append(pad_b(params["bv"][l]))
        w_rows.append(pad_w(params["W1"][l]));                b_rows.append(pad_b(params["b1"][l]))
        w_rows.append(pad_w(params["W2"][l]));                b_rows.append(pad_b(params["b2"][l]))
        w_rows.append(pad_w(params["W3"][l]));                b_rows.append(pad_b(params["b3"][l]))
    wslab = jnp.concatenate(w_rows, axis=0).astype(jnp.bfloat16)   # [7*S*L, S] bf16
    bslab = jnp.concatenate(b_rows, axis=0)                        # [7*S*L, 1] f32
    TOT = 7 * S * L

    # layer0: W0 split into src/tgt halves + bias, one tiny f32 pack [S, 8].
    w0pack = jnp.zeros((S, 8), jnp.float32)
    w0pack = w0pack.at[:, 0:3].set(params["W0"][:, 0:3])
    w0pack = w0pack.at[:, 3:6].set(params["W0"][:, 3:6])
    w0pack = w0pack.at[:, 6].set(jnp.reshape(params["b0"], (-1,)))

    kernel = functools.partial(_nonlocal_cost_all_kernel,
                               num_channels=C, num_layers=L)

    out = pl.pallas_call(
        kernel,
        out_shape=jax.ShapeDtypeStruct((B, C, n * N), jnp.float32),
        grid_spec=pltpu.PrefetchScalarGridSpec(
            num_scalar_prefetch=0,
            grid=(B // Bt,),
            in_specs=[
                pl.BlockSpec((Bt, 3, N), lambda b: (b, 0, 0)),
                pl.BlockSpec((Bt, n, 3, N), lambda b: (b, 0, 0, 0)),
                pl.BlockSpec((S, 8), lambda b: (0, 0)),
                pl.BlockSpec((TOT, S), lambda b: (0, 0)),
                pl.BlockSpec((TOT, 1), lambda b: (0, 0)),
            ],
            out_specs=pl.BlockSpec((Bt, C, n * N), lambda b: (b, 0, 0)),
            scratch_shapes=[pltpu.VMEM((Bt * n, N, N), jnp.float32)],
        ),
        # VMEM footprint at these shapes is well under every chip's scoped
        # default; set vmem_limit_bytes explicitly only when scaling N.
        compiler_params=pltpu.CompilerParams(
            dimension_semantics=("parallel",)),
    )(src_p, tgt_p, w0pack, wslab, bslab)

    # Lane-dense kernel output [B, C, n*N]; free reshape to PyTorch's
    # torch.stack(feat_all, dim=2) layout [B, C, n, N] (no XLA transpose).
    return out.reshape(B, C, n, N)


# ---------------- deterministic parameter setup (plain JAX glue) -------------

def _conv_init(key, out_c, in_c):
    kw, kb = jax.random.split(key)
    bound = 1.0 / np.sqrt(in_c)
    W = jax.random.uniform(kw, (out_c, in_c), jnp.float32, -bound, bound)
    b = jax.random.uniform(kb, (out_c,), jnp.float32, -bound, bound)
    return W, b


def _bn_init(key, c):
    k1, k2, k3, k4 = jax.random.split(key, 4)
    gamma = 1.0 + 0.2 * jax.random.uniform(k1, (c,), jnp.float32, -1.0, 1.0)
    beta = 0.1 * jax.random.uniform(k2, (c,), jnp.float32, -1.0, 1.0)
    mean = 0.1 * jax.random.uniform(k3, (c,), jnp.float32, -1.0, 1.0)
    var = 1.0 + 0.5 * jax.random.uniform(k4, (c,), jnp.float32, 0.0, 1.0)
    return gamma, beta, mean, var


def _fold_bn(W, b, gamma, beta, mean, var, eps=1e-5):
    s = gamma / jnp.sqrt(var + eps)
    return W * s[:, None], s * (b - mean) + beta


def init_params(key, in_dim=6, num_layers=2, num_channels=32):
    C, L, Ch = num_channels, num_layers, num_channels // 2
    keys = jax.random.split(key, 1 + L)
    W0, b0 = _conv_init(keys[0], C, in_dim)

    Wp, bp = [], []
    Wq, bq, Wk, bk, Wv, bv = [], [], [], [], [], []
    W1, b1, W2, b2, W3, b3 = [], [], [], [], [], []
    for l in range(L):
        ks = jax.random.split(keys[1 + l], 11)
        w, b = _conv_init(ks[0], C, C)
        w, b = _fold_bn(w, b, *_bn_init(ks[1], C))
        Wp.append(w); bp.append(b)
        for (kk, Wl, bl) in ((ks[2], Wq, bq), (ks[3], Wk, bk), (ks[4], Wv, bv)):
            w, b = _conv_init(kk, C, C)
            Wl.append(w); bl.append(b)
        w, b = _conv_init(ks[5], Ch, C)
        w, b = _fold_bn(w, b, *_bn_init(ks[6], Ch))
        W1.append(w); b1.append(b)
        w, b = _conv_init(ks[7], Ch, Ch)
        w, b = _fold_bn(w, b, *_bn_init(ks[8], Ch))
        W2.append(w); b2.append(b)
        w, b = _conv_init(ks[9], C, Ch)
        W3.append(w); b3.append(b)

    def stk(xs):
        return jnp.stack(xs, axis=0)

    return dict(
        W0=W0, b0=b0[:, None],
        Wp=stk(Wp), bp=stk(bp)[:, :, None],
        Wq=stk(Wq), bq=stk(bq)[:, :, None],
        Wk=stk(Wk), bk=stk(bk)[:, :, None],
        Wv=stk(Wv), bv=stk(bv)[:, :, None],
        W1=stk(W1), b1=stk(b1)[:, :, None],
        W2=stk(W2), b2=stk(b2)[:, :, None],
        W3=stk(W3), b3=stk(b3)[:, :, None],
    )


# ---------------- pure-JAX reference (mirrors the PyTorch forward) -----------

def reference(src_keypts, tgt_keypts_all, params):
    hp = jax.lax.Precision.HIGHEST

    def pdist(p):
        d = p[:, :, None, :] - p[:, None, :, :]
        return jnp.sqrt(jnp.sum(d * d, axis=-1))

    def conv(w, b, x):
        return jnp.einsum('oc,bcn->bon', w, x, precision=hp) + b[None]

    C = params['W0'].shape[0]
    L = params['Wp'].shape[0]
    src_dist = pdist(src_keypts)
    B, N, n, _ = tgt_keypts_all.shape
    outs = []
    for i in range(n):
        tgt = tgt_keypts_all[:, :, i]
        comp = src_dist - pdist(tgt)
        att = jnp.maximum(1.0 - comp ** 2 / 1.2 ** 2, 0.0)
        corr = jnp.transpose(jnp.concatenate([src_keypts, tgt], axis=-1), (0, 2, 1))
        corr = corr - jnp.mean(corr, axis=-1, keepdims=True)
        feat = conv(params['W0'], params['b0'], corr)
        for l in range(L):
            feat = jax.nn.relu(conv(params['Wp'][l], params['bp'][l], feat))
            q = conv(params['Wq'][l], params['bq'][l], feat)
            k = conv(params['Wk'][l], params['bk'][l], feat)
            v = conv(params['Wv'][l], params['bv'][l], feat)
            fa = jnp.einsum('bco,bci->boi', q, k, precision=hp) / jnp.sqrt(float(C))
            w = jax.nn.softmax(att * fa, axis=-1)
            msg = jnp.einsum('boi,bci->bco', w, v, precision=hp)
            m = jax.nn.relu(conv(params['W1'][l], params['b1'][l], msg))
            m = jax.nn.relu(conv(params['W2'][l], params['b2'][l], m))
            m = conv(params['W3'][l], params['b3'][l], m)
            feat = feat + m
        outs.append(feat)
    return jnp.stack(outs, axis=2)


if __name__ == "__main__":
    key = jax.random.PRNGKey(0)
    kp, ksrc, ktgt = jax.random.split(key, 3)

    B, N, n = 2, 128, 2          # batch, num_corr, number of target keypoint sets
    C, L = 32, 2                 # num_channels, num_layers (small synthetic sizes)

    params = init_params(kp, in_dim=6, num_layers=L, num_channels=C)
    src_keypts = jax.random.normal(ksrc, (B, N, 3), jnp.float32)
    tgt_keypts_all = jax.random.normal(ktgt, (B, N, n, 3), jnp.float32)

    out = nonlocal_net_cost_all(src_keypts, tgt_keypts_all, params)
    out = jax.block_until_ready(out)

    ref = reference(src_keypts, tgt_keypts_all, params)
    # Kernel uses bf16 MXU operands with f32 accumulation vs. an f32 HIGHEST
    # precision reference -> bf16-appropriate tolerances.
    np.testing.assert_allclose(np.asarray(out), np.asarray(ref),
                               rtol=5e-2, atol=5e-2)

    print("KERNEL_OK")
</pallas_src>

<mosaic_0001>
module attributes {stable_mosaic.version = 11 : i64} {
  func.func @_nonlocal_cost_all_kernel(%arg0: i32, %arg1: memref<1x3x128xf32, #tpu.memory_space<vmem>>, %arg2: memref<1x2x3x128xf32, #tpu.memory_space<vmem>>, %arg3: memref<32x8xf32, #tpu.memory_space<vmem>>, %arg4: memref<448x32xbf16, #tpu.memory_space<vmem>>, %arg5: memref<448x1xf32, #tpu.memory_space<vmem>>, %arg6: memref<1x32x256xf32, #tpu.memory_space<vmem>>, %arg7: memref<2x128x128xf32, #tpu.memory_space<vmem>>) attributes {dimension_semantics = [#tpu.dimension_semantics<parallel>], iteration_bounds = array<i64: 2>, scalar_prefetch = 0 : i64, scratch_operands = 1 : i64, tpu.core_type = #tpu.core_type<tc>, window_params = [{transform_indices = @transform_0, window_bounds = array<i64: 1, 3, 128>}, {transform_indices = @transform_1, window_bounds = array<i64: 1, 2, 3, 128>}, {pipeline_mode = #tpu.pipeline_mode<synchronous>, transform_indices = @transform_2, window_bounds = array<i64: 32, 8>}, {pipeline_mode = #tpu.pipeline_mode<synchronous>, transform_indices = @transform_3, window_bounds = array<i64: 448, 32>}, {pipeline_mode = #tpu.pipeline_mode<synchronous>, transform_indices = @transform_4, window_bounds = array<i64: 448, 1>}, {transform_indices = @transform_5, window_bounds = array<i64: 1, 32, 256>}]} {
    %c0 = arith.constant 0 : index
    %c0_0 = arith.constant 0 : index
    %0 = vector.load %arg3[%c0, %c0_0] : memref<32x8xf32, #tpu.memory_space<vmem>>, vector<32x3xf32>
    %c0_1 = arith.constant 0 : index
    %c3 = arith.constant 3 : index
    %1 = vector.load %arg3[%c0_1, %c3] : memref<32x8xf32, #tpu.memory_space<vmem>>, vector<32x3xf32>
    %c0_2 = arith.constant 0 : index
    %c6 = arith.constant 6 : index
    %2 = vector.load %arg3[%c0_2, %c6] : memref<32x8xf32, #tpu.memory_space<vmem>>, vector<32x1xf32>
    %c0_3 = arith.constant 0 : index
    %c0_4 = arith.constant 0 : index
    %c0_5 = arith.constant 0 : index
    %3 = vector.load %arg1[%c0_3, %c0_4, %c0_5] : memref<1x3x128xf32, #tpu.memory_space<vmem>>, vector<1x3x128xf32>
    %4 = vector.shape_cast %3 : vector<1x3x128xf32> to vector<3x128xf32>
    %cst = arith.constant dense<0.000000e+00> : vector<3xf32>
    %5 = vector.multi_reduction <add>, %4, %cst [1] : vector<3x128xf32> to vector<3xf32>
    %6 = vector.shape_cast %5 : vector<3xf32> to vector<3x1xf32>
    %cst_6 = arith.constant 1.280000e+02 : f32
    %7 = vector.broadcast %cst_6 : f32 to vector<3x1xf32>
    %8 = arith.divf %6, %7 : vector<3x1xf32>
    %9 = vector.broadcast %8 : vector<3x1xf32> to vector<3x128xf32>
    %10 = arith.subf %4, %9 : vector<3x128xf32>
    %cst_7 = arith.constant dense<0.000000e+00> : vector<128x128xf32>
    %11 = tpu.matmul %4, %4, %cst_7 {dimension_numbers = #tpu.dot_dimension_numbers<[0], [0], [1], [1], [0, 1, 1, 1], [], []>} : vector<3x128xf32>, vector<3x128xf32>, vector<128x128xf32> -> vector<128x128xf32>
    %12 = arith.mulf %4, %4 : vector<3x128xf32>
    %cst_8 = arith.constant dense<0.000000e+00> : vector<128xf32>
    %13 = vector.multi_reduction <add>, %12, %cst_8 [0] : vector<3x128xf32> to vector<128xf32>
    %14 = vector.shape_cast %13 : vector<128xf32> to vector<1x128xf32>
    %15 = tpu.transpose %14, [1, 0] : vector<1x128xf32> -> vector<128x1xf32>
    %16 = vector.broadcast %14 : vector<1x128xf32> to vector<128x128xf32>
    %17 = vector.broadcast %15 : vector<128x1xf32> to vector<128x128xf32>
    %18 = arith.addf %16, %17 : vector<128x128xf32>
    %cst_9 = arith.constant 2.000000e+00 : f32
    %19 = vector.broadcast %cst_9 : f32 to vector<128x128xf32>
    %20 = arith.mulf %19, %11 : vector<128x128xf32>
    %21 = arith.subf %18, %20 : vector<128x128xf32>
    %cst_10 = arith.constant 0.000000e+00 : f32
    %22 = vector.broadcast %cst_10 : f32 to vector<128x128xf32>
    %23 = arith.maximumf %21, %22 : vector<128x128xf32>
    %24 = math.sqrt %23 : vector<128x128xf32>
    %25 = vector.extract_strided_slice %0 {offsets = [0, 0], sizes = [32, 1], strides = [1, 1]} : vector<32x3xf32> to vector<32x1xf32>
    %26 = vector.extract_strided_slice %10 {offsets = [0, 0], sizes = [1, 128], strides = [1, 1]} : vector<3x128xf32> to vector<1x128xf32>
    %27 = vector.broadcast %25 : vector<32x1xf32> to vector<32x128xf32>
    %28 = vector.broadcast %26 : vector<1x128xf32> to vector<32x128xf32>
    %29 = arith.mulf %27, %28 : vector<32x128xf32>
    %30 = vector.extract_strided_slice %0 {offsets = [0, 1], sizes = [32, 1], strides = [1, 1]} : vector<32x3xf32> to vector<32x1xf32>
    %31 = vector.extract_strided_slice %10 {offsets = [1, 0], sizes = [1, 128], strides = [1, 1]} : vector<3x128xf32> to vector<1x128xf32>
    %32 = vector.broadcast %30 : vector<32x1xf32> to vector<32x128xf32>
    %33 = vector.broadcast %31 : vector<1x128xf32> to vector<32x128xf32>
    %34 = arith.mulf %32, %33 : vector<32x128xf32>
    %35 = arith.addf %29, %34 : vector<32x128xf32>
    %36 = vector.extract_strided_slice %0 {offsets = [0, 2], sizes = [32, 1], strides = [1, 1]} : vector<32x3xf32> to vector<32x1xf32>
    %37 = vector.extract_strided_slice %10 {offsets = [2, 0], sizes = [1, 128], strides = [1, 1]} : vector<3x128xf32> to vector<1x128xf32>
    %38 = vector.broadcast %36 : vector<32x1xf32> to vector<32x128xf32>
    %39 = vector.broadcast %37 : vector<1x128xf32> to vector<32x128xf32>
    %40 = arith.mulf %38, %39 : vector<32x128xf32>
    %41 = arith.addf %35, %40 : vector<32x128xf32>
    %42 = vector.broadcast %2 : vector<32x1xf32> to vector<32x128xf32>
    %43 = arith.addf %41, %42 : vector<32x128xf32>
    %c0_11 = arith.constant 0 : index
    %c0_12 = arith.constant 0 : index
    %c0_13 = arith.constant 0 : index
    %c0_14 = arith.constant 0 : index
    %44 = vector.load %arg2[%c0_11, %c0_12, %c0_13, %c0_14] : memref<1x2x3x128xf32, #tpu.memory_space<vmem>>, vector<1x1x3x128xf32>
    %45 = vector.shape_cast %44 : vector<1x1x3x128xf32> to vector<3x128xf32>
    %cst_15 = arith.constant dense<0.000000e+00> : vector<3xf32>
    %46 = vector.multi_reduction <add>, %45, %cst_15 [1] : vector<3x128xf32> to vector<3xf32>
    %47 = vector.shape_cast %46 : vector<3xf32> to vector<3x1xf32>
    %cst_16 = arith.constant 1.280000e+02 : f32
    %48 = vector.broadcast %cst_16 : f32 to vector<3x1xf32>
    %49 = arith.divf %47, %48 : vector<3x1xf32>
    %50 = vector.broadcast %49 : vector<3x1xf32> to vector<3x128xf32>
    %51 = arith.subf %45, %50 : vector<3x128xf32>
    %cst_17 = arith.constant dense<0.000000e+00> : vector<128x128xf32>
    %52 = tpu.matmul %45, %45, %cst_17 {dimension_numbers = #tpu.dot_dimension_numbers<[0], [0], [1], [1], [0, 1, 1, 1], [], []>} : vector<3x128xf32>, vector<3x128xf32>, vector<128x128xf32> -> vector<128x128xf32>
    %53 = arith.mulf %45, %45 : vector<3x128xf32>
    %cst_18 = arith.constant dense<0.000000e+00> : vector<128xf32>
    %54 = vector.multi_reduction <add>, %53, %cst_18 [0] : vector<3x128xf32> to vector<128xf32>
    %55 = vector.shape_cast %54 : vector<128xf32> to vector<1x128xf32>
    %56 = tpu.transpose %55, [1, 0] : vector<1x128xf32> -> vector<128x1xf32>
    %57 = vector.broadcast %55 : vector<1x128xf32> to vector<128x128xf32>
    %58 = vector.broadcast %56 : vector<128x1xf32> to vector<128x128xf32>
    %59 = arith.addf %57, %58 : vector<128x128xf32>
    %cst_19 = arith.constant 2.000000e+00 : f32
    %60 = vector.broadcast %cst_19 : f32 to vector<128x128xf32>
    %61 = arith.mulf %60, %52 : vector<128x128xf32>
    %62 = arith.subf %59, %61 : vector<128x128xf32>
    %cst_20 = arith.constant 0.000000e+00 : f32
    %63 = vector.broadcast %cst_20 : f32 to vector<128x128xf32>
    %64 = arith.maximumf %62, %63 : vector<128x128xf32>
    %65 = math.sqrt %64 : vector<128x128xf32>
    %66 = arith.subf %24, %65 : vector<128x128xf32>
    %67 = arith.mulf %66, %66 : vector<128x128xf32>
    %cst_21 = arith.constant 1.440000e+00 : f32
    %68 = vector.broadcast %cst_21 : f32 to vector<128x128xf32>
    %69 = arith.divf %67, %68 : vector<128x128xf32>
    %cst_22 = arith.constant 1.000000e+00 : f32
    %70 = vector.broadcast %cst_22 : f32 to vector<128x128xf32>
    %71 = arith.subf %70, %69 : vector<128x128xf32>
    %cst_23 = arith.constant 0.000000e+00 : f32
    %72 = vector.broadcast %cst_23 : f32 to vector<128x128xf32>
    %73 = arith.maximumf %71, %72 : vector<128x128xf32>
    %c0_24 = arith.constant 0 : index
    %c0_25 = arith.constant 0 : index
    %c0_26 = arith.constant 0 : index
    %74 = vector.load %arg7[%c0_24, %c0_25, %c0_26] : memref<2x128x128xf32, #tpu.memory_space<vmem>>, vector<1x128x128xf32>
    %75 = vector.shape_cast %74 : vector<1x128x128xf32> to vector<128x128xf32>
    %76 = vector.shape_cast %73 : vector<128x128xf32> to vector<1x128x128xf32>
    tpu.vector_store %arg7[%c0_24, %c0_25, %c0_26], %76 {strides = array<i32>} : memref<2x128x128xf32, #tpu.memory_space<vmem>>, vector<1x128x128xf32>,
    %77 = vector.extract_strided_slice %1 {offsets = [0, 0], sizes = [32, 1], strides = [1, 1]} : vector<32x3xf32> to vector<32x1xf32>
    %78 = vector.extract_strided_slice %51 {offsets = [0, 0], sizes = [1, 128], strides = [1, 1]} : vector<3x128xf32> to vector<1x128xf32>
    %79 = vector.broadcast %77 : vector<32x1xf32> to vector<32x128xf32>
    %80 = vector.broadcast %78 : vector<1x128xf32> to vector<32x128xf32>
    %81 = arith.mulf %79, %80 : vector<32x128xf32>
    %82 = vector.extract_strided_slice %1 {offsets = [0, 1], sizes = [32, 1], strides = [1, 1]} : vector<32x3xf32> to vector<32x1xf32>
    %83 = vector.extract_strided_slice %51 {offsets = [1, 0], sizes = [1, 128], strides = [1, 1]} : vector<3x128xf32> to vector<1x128xf32>
    %84 = vector.broadcast %82 : vector<32x1xf32> to vector<32x128xf32>
    %85 = vector.broadcast %83 : vector<1x128xf32> to vector<32x128xf32>
    %86 = arith.mulf %84, %85 : vector<32x128xf32>
    %87 = arith.addf %81, %86 : vector<32x128xf32>
    %88 = vector.extract_strided_slice %1 {offsets = [0, 2], sizes = [32, 1], strides = [1, 1]} : vector<32x3xf32> to vector<32x1xf32>
    %89 = vector.extract_strided_slice %51 {offsets = [2, 0], sizes = [1, 128], strides = [1, 1]} : vector<3x128xf32> to vector<1x128xf32>
    %90 = vector.broadcast %88 : vector<32x1xf32> to vector<32x128xf32>
    %91 = vector.broadcast %89 : vector<1x128xf32> to vector<32x128xf32>
    %92 = arith.mulf %90, %91 : vector<32x128xf32>
    %93 = arith.addf %87, %92 : vector<32x128xf32>
    %94 = arith.addf %43, %93 : vector<32x128xf32>
    %c0_27 = arith.constant 0 : index
    %c1 = arith.constant 1 : index
    %c0_28 = arith.constant 0 : index
    %c0_29 = arith.constant 0 : index
    %95 = vector.load %arg2[%c0_27, %c1, %c0_28, %c0_29] : memref<1x2x3x128xf32, #tpu.memory_space<vmem>>, vector<1x1x3x128xf32>
    %96 = vector.shape_cast %95 : vector<1x1x3x128xf32> to vector<3x128xf32>
    %cst_30 = arith.constant dense<0.000000e+00> : vector<3xf32>
    %97 = vector.multi_reduction <add>, %96, %cst_30 [1] : vector<3x128xf32> to vector<3xf32>
    %98 = vector.shape_cast %97 : vector<3xf32> to vector<3x1xf32>
    %cst_31 = arith.constant 1.280000e+02 : f32
    %99 = vector.broadcast %cst_31 : f32 to vector<3x1xf32>
    %100 = arith.divf %98, %99 : vector<3x1xf32>
    %101 = vector.broadcast %100 : vector<3x1xf32> to vector<3x128xf32>
    %102 = arith.subf %96, %101 : vector<3x128xf32>
    %cst_32 = arith.constant dense<0.000000e+00> : vector<128x128xf32>
    %103 = tpu.matmul %96, %96, %cst_32 {dimension_numbers = #tpu.dot_dimension_numbers<[0], [0], [1], [1], [0, 1, 1, 1], [], []>} : vector<3x128xf32>, vector<3x128xf32>, vector<128x128xf32> -> vector<128x128xf32>
    %104 = arith.mulf %96, %96 : vector<3x128xf32>
    %cst_33 = arith.constant dense<0.000000e+00> : vector<128xf32>
    %105 = vector.multi_reduction <add>, %104, %cst_33 [0] : vector<3x128xf32> to vector<128xf32>
    %106 = vector.shape_cast %105 : vector<128xf32> to vector<1x128xf32>
    %107 = tpu.transpose %106, [1, 0] : vector<1x128xf32> -> vector<128x1xf32>
    %108 = vector.broadcast %106 : vector<1x128xf32> to vector<128x128xf32>
    %109 = vector.broadcast %107 : vector<128x1xf32> to vector<128x128xf32>
    %110 = arith.addf %108, %109 : vector<128x128xf32>
    %cst_34 = arith.constant 2.000000e+00 : f32
    %111 = vector.broadcast %cst_34 : f32 to vector<128x128xf32>
    %112 = arith.mulf %111, %103 : vector<128x128xf32>
    %113 = arith.subf %110, %112 : vector<128x128xf32>
    %cst_35 = arith.constant 0.000000e+00 : f32
    %114 = vector.broadcast %cst_35 : f32 to vector<128x128xf32>
    %115 = arith.maximumf %113, %114 : vector<128x128xf32>
    %116 = math.sqrt %115 : vector<128x128xf32>
    %117 = arith.subf %24, %116 : vector<128x128xf32>
    %118 = arith.mulf %117, %117 : vector<128x128xf32>
    %cst_36 = arith.constant 1.440000e+00 : f32
    %119 = vector.broadcast %cst_36 : f32 to vector<128x128xf32>
    %120 = arith.divf %118, %119 : vector<128x128xf32>
    %cst_37 = arith.constant 1.000000e+00 : f32
    %121 = vector.broadcast %cst_37 : f32 to vector<128x128xf32>
    %122 = arith.subf %121, %120 : vector<128x128xf32>
    %cst_38 = arith.constant 0.000000e+00 : f32
    %123 = vector.broadcast %cst_38 : f32 to vector<128x128xf32>
    %124 = arith.maximumf %122, %123 : vector<128x128xf32>
    %c1_39 = arith.constant 1 : index
    %c0_40 = arith.constant 0 : index
    %c0_41 = arith.constant 0 : index
    %125 = vector.load %arg7[%c1_39, %c0_40, %c0_41] : memref<2x128x128xf32, #tpu.memory_space<vmem>>, vector<1x128x128xf32>
    %126 = vector.shape_cast %125 : vector<1x128x128xf32> to vector<128x128xf32>
    %127 = vector.shape_cast %124 : vector<128x128xf32> to vector<1x128x128xf32>
    tpu.vector_store %arg7[%c1_39, %c0_40, %c0_41], %127 {strides = array<i32>} : memref<2x128x128xf32, #tpu.memory_space<vmem>>, vector<1x128x128xf32>,
    %128 = vector.extract_strided_slice %1 {offsets = [0, 0], sizes = [32, 1], strides = [1, 1]} : vector<32x3xf32> to vector<32x1xf32>
    %129 = vector.extract_strided_slice %102 {offsets = [0, 0], sizes = [1, 128], strides = [1, 1]} : vector<3x128xf32> to vector<1x128xf32>
    %130 = vector.broadcast %128 : vector<32x1xf32> to vector<32x128xf32>
    %131 = vector.broadcast %129 : vector<1x128xf32> to vector<32x128xf32>
    %132 = arith.mulf %130, %131 : vector<32x128xf32>
    %133 = vector.extract_strided_slice %1 {offsets = [0, 1], sizes = [32, 1], strides = [1, 1]} : vector<32x3xf32> to vector<32x1xf32>
    %134 = vector.extract_strided_slice %102 {offsets = [1, 0], sizes = [1, 128], strides = [1, 1]} : vector<3x128xf32> to vector<1x128xf32>
    %135 = vector.broadcast %133 : vector<32x1xf32> to vector<32x128xf32>
    %136 = vector.broadcast %134 : vector<1x128xf32> to vector<32x128xf32>
    %137 = arith.mulf %135, %136 : vector<32x128xf32>
    %138 = arith.addf %132, %137 : vector<32x128xf32>
    %139 = vector.extract_strided_slice %1 {offsets = [0, 2], sizes = [32, 1], strides = [1, 1]} : vector<32x3xf32> to vector<32x1xf32>
    %140 = vector.extract_strided_slice %102 {offsets = [2, 0], sizes = [1, 128], strides = [1, 1]} : vector<3x128xf32> to vector<1x128xf32>
    %141 = vector.broadcast %139 : vector<32x1xf32> to vector<32x128xf32>
    %142 = vector.broadcast %140 : vector<1x128xf32> to vector<32x128xf32>
    %143 = arith.mulf %141, %142 : vector<32x128xf32>
    %144 = arith.addf %138, %143 : vector<32x128xf32>
    %145 = arith.addf %43, %144 : vector<32x128xf32>
    %146 = tpu.concatenate %94, %145 in 1 : vector<32x128xf32>, vector<32x128xf32> -> vector<32x256xf32>
    %147 = arith.truncf %146 : vector<32x256xf32> to vector<32x256xbf16>
    %c0_42 = arith.constant 0 : index
    %c0_43 = arith.constant 0 : index
    %148 = vector.load %arg4[%c0_42, %c0_43] : memref<448x32xbf16, #tpu.memory_space<vmem>>, vector<32x32xbf16>
    %c0_44 = arith.constant 0 : index
    %c0_45 = arith.constant 0 : index
    %149 = vector.load %arg5[%c0_44, %c0_45] : memref<448x1xf32, #tpu.memory_space<vmem>>, vector<32x1xf32>
    %cst_46 = arith.constant dense<0.000000e+00> : vector<32x256xf32>
    %150 = tpu.matmul %148, %147, %cst_46 {dimension_numbers = #tpu.dot_dimension_numbers<[1], [0], [0], [1], [0, 0, 1, 1], [], []>} : vector<32x32xbf16>, vector<32x256xbf16>, vector<32x256xf32> -> vector<32x256xf32>
    %151 = vector.broadcast %149 : vector<32x1xf32> to vector<32x256xf32>
    %152 = arith.addf %150, %151 : vector<32x256xf32>
    %cst_47 = arith.constant 0.000000e+00 : f32
    %153 = vector.broadcast %cst_47 : f32 to vector<32x256xf32>
    %154 = arith.maximumf %152, %153 : vector<32x256xf32>
    %155 = arith.truncf %154 : vector<32x256xf32> to vector<32x256xbf16>
    %c32 = arith.constant 32 : index
    %c0_48 = arith.constant 0 : index
    %156 = vector.load %arg4[%c32, %c0_48] : memref<448x32xbf16, #tpu.memory_space<vmem>>, vector<96x32xbf16>
    %c32_49 = arith.constant 32 : index
    %c0_50 = arith.constant 0 : index
    %157 = vector.load %arg5[%c32_49, %c0_50] : memref<448x1xf32, #tpu.memory_space<vmem>>, vector<96x1xf32>
    %cst_51 = arith.constant dense<0.000000e+00> : vector<96x256xf32>
    %158 = tpu.matmul %156, %155, %cst_51 {dimension_numbers = #tpu.dot_dimension_numbers<[1], [0], [0], [1], [0, 0, 1, 1], [], []>} : vector<96x32xbf16>, vector<32x256xbf16>, vector<96x256xf32> -> vector<96x256xf32>
    %159 = vector.broadcast %157 : vector<96x1xf32> to vector<96x256xf32>
    %160 = arith.addf %158, %159 : vector<96x256xf32>
    %161 = arith.truncf %160 : vector<96x256xf32> to vector<96x256xbf16>
    %162 = vector.extract_strided_slice %161 {offsets = [0, 0], sizes = [32, 256], strides = [1, 1]} : vector<96x256xbf16> to vector<32x256xbf16>
    %163 = vector.extract_strided_slice %161 {offsets = [32, 0], sizes = [32, 256], strides = [1, 1]} : vector<96x256xbf16> to vector<32x256xbf16>
    %164 = vector.extract_strided_slice %161 {offsets = [64, 0], sizes = [32, 256], strides = [1, 1]} : vector<96x256xbf16> to vector<32x256xbf16>
    %165 = vector.extract_strided_slice %162 {offsets = [0, 0], sizes = [32, 128], strides = [1, 1]} : vector<32x256xbf16> to vector<32x128xbf16>
    %166 = vector.extract_strided_slice %163 {offsets = [0, 0], sizes = [32, 128], strides = [1, 1]} : vector<32x256xbf16> to vector<32x128xbf16>
    %167 = vector.extract_strided_slice %164 {offsets = [0, 0], sizes = [32, 128], strides = [1, 1]} : vector<32x256xbf16> to vector<32x128xbf16>
    %cst_52 = arith.constant dense<0.000000e+00> : vector<128x128xf32>
    %168 = tpu.matmul %166, %165, %cst_52 {dimension_numbers = #tpu.dot_dimension_numbers<[0], [0], [1], [1], [0, 1, 1, 1], [], []>} : vector<32x128xbf16>, vector<32x128xbf16>, vector<128x128xf32> -> vector<128x128xf32>
    %c0_53 = arith.constant 0 : index
    %c0_54 = arith.constant 0 : index
    %c0_55 = arith.constant 0 : index
    %169 = vector.load %arg7[%c0_53, %c0_54, %c0_55] : memref<2x128x128xf32, #tpu.memory_space<vmem>>, vector<1x128x128xf32>
    %170 = vector.shape_cast %169 : vector<1x128x128xf32> to vector<128x128xf32>
    %171 = arith.mulf %170, %168 : vector<128x128xf32>
    %cst_56 = arith.constant dense<0xFF800000> : vector<128xf32>
    %172 = vector.multi_reduction <maximumf>, %171, %cst_56 [0] : vector<128x128xf32> to vector<128xf32>
    %173 = vector.shape_cast %172 : vector<128xf32> to vector<1x128xf32>
    %174 = vector.broadcast %173 : vector<1x128xf32> to vector<128x128xf32>
    %175 = arith.subf %171, %174 : vector<128x128xf32>
    %176 = math.exp %175 : vector<128x128xf32>
    %cst_57 = arith.constant dense<0.000000e+00> : vector<128xf32>
    %177 = vector.multi_reduction <add>, %176, %cst_57 [0] : vector<128x128xf32> to vector<128xf32>
    %178 = vector.shape_cast %177 : vector<128xf32> to vector<1x128xf32>
    %179 = tpu.reciprocal %178 {approx = true} : vector<1x128xf32> -> vector<1x128xf32>
    %180 = vector.broadcast %179 : vector<1x128xf32> to vector<128x128xf32>
    %181 = arith.mulf %176, %180 : vector<128x128xf32>
    %182 = arith.truncf %181 : vector<128x128xf32> to vector<128x128xbf16>
    %cst_58 = arith.constant dense<0.000000e+00> : vector<32x128xf32>
    %183 = tpu.matmul %167, %182, %cst_58 {dimension_numbers = #tpu.dot_dimension_numbers<[1], [0], [0], [1], [0, 0, 1, 1], [], []>} : vector<32x128xbf16>, vector<128x128xbf16>, vector<32x128xf32> -> vector<32x128xf32>
    %184 = vector.extract_strided_slice %162 {offsets = [0, 128], sizes = [32, 128], strides = [1, 1]} : vector<32x256xbf16> to vector<32x128xbf16>
    %185 = vector.extract_strided_slice %163 {offsets = [0, 128], sizes = [32, 128], strides = [1, 1]} : vector<32x256xbf16> to vector<32x128xbf16>
    %186 = vector.extract_strided_slice %164 {offsets = [0, 128], sizes = [32, 128], strides = [1, 1]} : vector<32x256xbf16> to vector<32x128xbf16>
    %cst_59 = arith.constant dense<0.000000e+00> : vector<128x128xf32>
    %187 = tpu.matmul %185, %184, %cst_59 {dimension_numbers = #tpu.dot_dimension_numbers<[0], [0], [1], [1], [0, 1, 1, 1], [], []>} : vector<32x128xbf16>, vector<32x128xbf16>, vector<128x128xf32> -> vector<128x128xf32>
    %c1_60 = arith.constant 1 : index
    %c0_61 = arith.constant 0 : index
    %c0_62 = arith.constant 0 : index
    %188 = vector.load %arg7[%c1_60, %c0_61, %c0_62] : memref<2x128x128xf32, #tpu.memory_space<vmem>>, vector<1x128x128xf32>
    %189 = vector.shape_cast %188 : vector<1x128x128xf32> to vector<128x128xf32>
    %190 = arith.mulf %189, %187 : vector<128x128xf32>
    %cst_63 = arith.constant dense<0xFF800000> : vector<128xf32>
    %191 = vector.multi_reduction <maximumf>, %190, %cst_63 [0] : vector<128x128xf32> to vector<128xf32>
    %192 = vector.shape_cast %191 : vector<128xf32> to vector<1x128xf32>
    %193 = vector.broadcast %192 : vector<1x128xf32> to vector<128x128xf32>
    %194 = arith.subf %190, %193 : vector<128x128xf32>
    %195 = math.exp %194 : vector<128x128xf32>
    %cst_64 = arith.constant dense<0.000000e+00> : vector<128xf32>
    %196 = vector.multi_reduction <add>, %195, %cst_64 [0] : vector<128x128xf32> to vector<128xf32>
    %197 = vector.shape_cast %196 : vector<128xf32> to vector<1x128xf32>
    %198 = tpu.reciprocal %197 {approx = true} : vector<1x128xf32> -> vector<1x128xf32>
    %199 = vector.broadcast %198 : vector<1x128xf32> to vector<128x128xf32>
    %200 = arith.mulf %195, %199 : vector<128x128xf32>
    %201 = arith.truncf %200 : vector<128x128xf32> to vector<128x128xbf16>
    %cst_65 = arith.constant dense<0.000000e+00> : vector<32x128xf32>
    %202 = tpu.matmul %186, %201, %cst_65 {dimension_numbers = #tpu.dot_dimension_numbers<[1], [0], [0], [1], [0, 0, 1, 1], [], []>} : vector<32x128xbf16>, vector<128x128xbf16>, vector<32x128xf32> -> vector<32x128xf32>
    %203 = tpu.concatenate %183, %202 in 1 : vector<32x128xf32>, vector<32x128xf32> -> vector<32x256xf32>
    %204 = arith.truncf %203 : vector<32x256xf32> to vector<32x256xbf16>
    %c128 = arith.constant 128 : index
    %c0_66 = arith.constant 0 : index
    %205 = vector.load %arg4[%c128, %c0_66] : memref<448x32xbf16, #tpu.memory_space<vmem>>, vector<32x32xbf16>
    %c128_67 = arith.constant 128 : index
    %c0_68 = arith.constant 0 : index
    %206 = vector.load %arg5[%c128_67, %c0_68] : memref<448x1xf32, #tpu.memory_space<vmem>>, vector<32x1xf32>
    %cst_69 = arith.constant dense<0.000000e+00> : vector<32x256xf32>
    %207 = tpu.matmul %205, %204, %cst_69 {dimension_numbers = #tpu.dot_dimension_numbers<[1], [0], [0], [1], [0, 0, 1, 1], [], []>} : vector<32x32xbf16>, vector<32x256xbf16>, vector<32x256xf32> -> vector<32x256xf32>
    %208 = vector.broadcast %206 : vector<32x1xf32> to vector<32x256xf32>
    %209 = arith.addf %207, %208 : vector<32x256xf32>
    %cst_70 = arith.constant 0.000000e+00 : f32
    %210 = vector.broadcast %cst_70 : f32 to vector<32x256xf32>
    %211 = arith.maximumf %209, %210 : vector<32x256xf32>
    %212 = arith.truncf %211 : vector<32x256xf32> to vector<32x256xbf16>
    %c160 = arith.constant 160 : index
    %c0_71 = arith.constant 0 : index
    %213 = vector.load %arg4[%c160, %c0_71] : memref<448x32xbf16, #tpu.memory_space<vmem>>, vector<32x32xbf16>
    %c160_72 = arith.constant 160 : index
    %c0_73 = arith.constant 0 : index
    %214 = vector.load %arg5[%c160_72, %c0_73] : memref<448x1xf32, #tpu.memory_space<vmem>>, vector<32x1xf32>
    %cst_74 = arith.constant dense<0.000000e+00> : vector<32x256xf32>
    %215 = tpu.matmul %213, %212, %cst_74 {dimension_numbers = #tpu.dot_dimension_numbers<[1], [0], [0], [1], [0, 0, 1, 1], [], []>} : vector<32x32xbf16>, vector<32x256xbf16>, vector<32x256xf32> -> vector<32x256xf32>
    %216 = vector.broadcast %214 : vector<32x1xf32> to vector<32x256xf32>
    %217 = arith.addf %215, %216 : vector<32x256xf32>
    %cst_75 = arith.constant 0.000000e+00 : f32
    %218 = vector.broadcast %cst_75 : f32 to vector<32x256xf32>
    %219 = arith.maximumf %217, %218 : vector<32x256xf32>
    %220 = arith.truncf %219 : vector<32x256xf32> to vector<32x256xbf16>
    %c192 = arith.constant 192 : index
    %c0_76 = arith.constant 0 : index
    %221 = vector.load %arg4[%c192, %c0_76] : memref<448x32xbf16, #tpu.memory_space<vmem>>, vector<32x32xbf16>
    %c192_77 = arith.constant 192 : index
    %c0_78 = arith.constant 0 : index
    %222 = vector.load %arg5[%c192_77, %c0_78] : memref<448x1xf32, #tpu.memory_space<vmem>>, vector<32x1xf32>
    %cst_79 = arith.constant dense<0.000000e+00> : vector<32x256xf32>
    %223 = tpu.matmul %221, %220, %cst_79 {dimension_numbers = #tpu.dot_dimension_numbers<[1], [0], [0], [1], [0, 0, 1, 1], [], []>} : vector<32x32xbf16>, vector<32x256xbf16>, vector<32x256xf32> -> vector<32x256xf32>
    %224 = vector.broadcast %222 : vector<32x1xf32> to vector<32x256xf32>
    %225 = arith.addf %223, %224 : vector<32x256xf32>
    %226 = arith.addf %154, %225 : vector<32x256xf32>
    %227 = arith.truncf %226 : vector<32x256xf32> to vector<32x256xbf16>
    %c224 = arith.constant 224 : index
    %c0_80 = arith.constant 0 : index
    %228 = vector.load %arg4[%c224, %c0_80] : memref<448x32xbf16, #tpu.memory_space<vmem>>, vector<32x32xbf16>
    %c224_81 = arith.constant 224 : index
    %c0_82 = arith.constant 0 : index
    %229 = vector.load %arg5[%c224_81, %c0_82] : memref<448x1xf32, #tpu.memory_space<vmem>>, vector<32x1xf32>
    %cst_83 = arith.constant dense<0.000000e+00> : vector<32x256xf32>
    %230 = tpu.matmul %228, %227, %cst_83 {dimension_numbers = #tpu.dot_dimension_numbers<[1], [0], [0], [1], [0, 0, 1, 1], [], []>} : vector<32x32xbf16>, vector<32x256xbf16>, vector<32x256xf32> -> vector<32x256xf32>
    %231 = vector.broadcast %229 : vector<32x1xf32> to vector<32x256xf32>
    %232 = arith.addf %230, %231 : vector<32x256xf32>
    %cst_84 = arith.constant 0.000000e+00 : f32
    %233 = vector.broadcast %cst_84 : f32 to vector<32x256xf32>
    %234 = arith.maximumf %232, %233 : vector<32x256xf32>
    %235 = arith.truncf %234 : vector<32x256xf32> to vector<32x256xbf16>
    %c256 = arith.constant 256 : index
    %c0_85 = arith.constant 0 : index
    %236 = vector.load %arg4[%c256, %c0_85] : memref<448x32xbf16, #tpu.memory_space<vmem>>, vector<96x32xbf16>
    %c256_86 = arith.constant 256 : index
    %c0_87 = arith.constant 0 : index
    %237 = vector.load %arg5[%c256_86, %c0_87] : memref<448x1xf32, #tpu.memory_space<vmem>>, vector<96x1xf32>
    %cst_88 = arith.constant dense<0.000000e+00> : vector<96x256xf32>
    %238 = tpu.matmul %236, %235, %cst_88 {dimension_numbers = #tpu.dot_dimension_numbers<[1], [0], [0], [1], [0, 0, 1, 1], [], []>} : vector<96x32xbf16>, vector<32x256xbf16>, vector<96x256xf32> -> vector<96x256xf32>
    %239 = vector.broadcast %237 : vector<96x1xf32> to vector<96x256xf32>
    %240 = arith.addf %238, %239 : vector<96x256xf32>
    %241 = arith.truncf %240 : vector<96x256xf32> to vector<96x256xbf16>
    %242 = vector.extract_strided_slice %241 {offsets = [0, 0], sizes = [32, 256], strides = [1, 1]} : vector<96x256xbf16> to vector<32x256xbf16>
    %243 = vector.extract_strided_slice %241 {offsets = [32, 0], sizes = [32, 256], strides = [1, 1]} : vector<96x256xbf16> to vector<32x256xbf16>
    %244 = vector.extract_strided_slice %241 {offsets = [64, 0], sizes = [32, 256], strides = [1, 1]} : vector<96x256xbf16> to vector<32x256xbf16>
    %245 = vector.extract_strided_slice %242 {offsets = [0, 0], sizes = [32, 128], strides = [1, 1]} : vector<32x256xbf16> to vector<32x128xbf16>
    %246 = vector.extract_strided_slice %243 {offsets = [0, 0], sizes = [32, 128], strides = [1, 1]} : vector<32x256xbf16> to vector<32x128xbf16>
    %247 = vector.extract_strided_slice %244 {offsets = [0, 0], sizes = [32, 128], strides = [1, 1]} : vector<32x256xbf16> to vector<32x128xbf16>
    %cst_89 = arith.constant dense<0.000000e+00> : vector<128x128xf32>
    %248 = tpu.matmul %246, %245, %cst_89 {dimension_numbers = #tpu.dot_dimension_numbers<[0], [0], [1], [1], [0, 1, 1, 1], [], []>} : vector<32x128xbf16>, vector<32x128xbf16>, vector<128x128xf32> -> vector<128x128xf32>
    %c0_90 = arith.constant 0 : index
    %c0_91 = arith.constant 0 : index
    %c0_92 = arith.constant 0 : index
    %249 = vector.load %arg7[%c0_90, %c0_91, %c0_92] : memref<2x128x128xf32, #tpu.memory_space<vmem>>, vector<1x128x128xf32>
    %250 = vector.shape_cast %249 : vector<1x128x128xf32> to vector<128x128xf32>
    %251 = arith.mulf %250, %248 : vector<128x128xf32>
    %cst_93 = arith.constant dense<0xFF800000> : vector<128xf32>
    %252 = vector.multi_reduction <maximumf>, %251, %cst_93 [0] : vector<128x128xf32> to vector<128xf32>
    %253 = vector.shape_cast %252 : vector<128xf32> to vector<1x128xf32>
    %254 = vector.broadcast %253 : vector<1x128xf32> to vector<128x128xf32>
    %255 = arith.subf %251, %254 : vector<128x128xf32>
    %256 = math.exp %255 : vector<128x128xf32>
    %cst_94 = arith.constant dense<0.000000e+00> : vector<128xf32>
    %257 = vector.multi_reduction <add>, %256, %cst_94 [0] : vector<128x128xf32> to vector<128xf32>
    %258 = vector.shape_cast %257 : vector<128xf32> to vector<1x128xf32>
    %259 = tpu.reciprocal %258 {approx = true} : vector<1x128xf32> -> vector<1x128xf32>
    %260 = vector.broadcast %259 : vector<1x128xf32> to vector<128x128xf32>
    %261 = arith.mulf %256, %260 : vector<128x128xf32>
    %262 = arith.truncf %261 : vector<128x128xf32> to vector<128x128xbf16>
    %cst_95 = arith.constant dense<0.000000e+00> : vector<32x128xf32>
    %263 = tpu.matmul %247, %262, %cst_95 {dimension_numbers = #tpu.dot_dimension_numbers<[1], [0], [0], [1], [0, 0, 1, 1], [], []>} : vector<32x128xbf16>, vector<128x128xbf16>, vector<32x128xf32> -> vector<32x128xf32>
    %264 = vector.extract_strided_slice %242 {offsets = [0, 128], sizes = [32, 128], strides = [1, 1]} : vector<32x256xbf16> to vector<32x128xbf16>
    %265 = vector.extract_strided_slice %243 {offsets = [0, 128], sizes = [32, 128], strides = [1, 1]} : vector<32x256xbf16> to vector<32x128xbf16>
    %266 = vector.extract_strided_slice %244 {offsets = [0, 128], sizes = [32, 128], strides = [1, 1]} : vector<32x256xbf16> to vector<32x128xbf16>
    %cst_96 = arith.constant dense<0.000000e+00> : vector<128x128xf32>
    %267 = tpu.matmul %265, %264, %cst_96 {dimension_numbers = #tpu.dot_dimension_numbers<[0], [0], [1], [1], [0, 1, 1, 1], [], []>} : vector<32x128xbf16>, vector<32x128xbf16>, vector<128x128xf32> -> vector<128x128xf32>
    %c1_97 = arith.constant 1 : index
    %c0_98 = arith.constant 0 : index
    %c0_99 = arith.constant 0 : index
    %268 = vector.load %arg7[%c1_97, %c0_98, %c0_99] : memref<2x128x128xf32, #tpu.memory_space<vmem>>, vector<1x128x128xf32>
    %269 = vector.shape_cast %268 : vector<1x128x128xf32> to vector<128x128xf32>
    %270 = arith.mulf %269, %267 : vector<128x128xf32>
    %cst_100 = arith.constant dense<0xFF800000> : vector<128xf32>
    %271 = vector.multi_reduction <maximumf>, %270, %cst_100 [0] : vector<128x128xf32> to vector<128xf32>
    %272 = vector.shape_cast %271 : vector<128xf32> to vector<1x128xf32>
    %273 = vector.broadcast %272 : vector<1x128xf32> to vector<128x128xf32>
    %274 = arith.subf %270, %273 : vector<128x128xf32>
    %275 = math.exp %274 : vector<128x128xf32>
    %cst_101 = arith.constant dense<0.000000e+00> : vector<128xf32>
    %276 = vector.multi_reduction <add>, %275, %cst_101 [0] : vector<128x128xf32> to vector<128xf32>
    %277 = vector.shape_cast %276 : vector<128xf32> to vector<1x128xf32>
    %278 = tpu.reciprocal %277 {approx = true} : vector<1x128xf32> -> vector<1x128xf32>
    %279 = vector.broadcast %278 : vector<1x128xf32> to vector<128x128xf32>
    %280 = arith.mulf %275, %279 : vector<128x128xf32>
    %281 = arith.truncf %280 : vector<128x128xf32> to vector<128x128xbf16>
    %cst_102 = arith.constant dense<0.000000e+00> : vector<32x128xf32>
    %282 = tpu.matmul %266, %281, %cst_102 {dimension_numbers = #tpu.dot_dimension_numbers<[1], [0], [0], [1], [0, 0, 1, 1], [], []>} : vector<32x128xbf16>, vector<128x128xbf16>, vector<32x128xf32> -> vector<32x128xf32>
    %283 = tpu.concatenate %263, %282 in 1 : vector<32x128xf32>, vector<32x128xf32> -> vector<32x256xf32>
    %284 = arith.truncf %283 : vector<32x256xf32> to vector<32x256xbf16>
    %c352 = arith.constant 352 : index
    %c0_103 = arith.constant 0 : index
    %285 = vector.load %arg4[%c352, %c0_103] : memref<448x32xbf16, #tpu.memory_space<vmem>>, vector<32x32xbf16>
    %c352_104 = arith.constant 352 : index
    %c0_105 = arith.constant 0 : index
    %286 = vector.load %arg5[%c352_104, %c0_105] : memref<448x1xf32, #tpu.memory_space<vmem>>, vector<32x1xf32>
    %cst_106 = arith.constant dense<0.000000e+00> : vector<32x256xf32>
    %287 = tpu.matmul %285, %284, %cst_106 {dimension_numbers = #tpu.dot_dimension_numbers<[1], [0], [0], [1], [0, 0, 1, 1], [], []>} : vector<32x32xbf16>, vector<32x256xbf16>, vector<32x256xf32> -> vector<32x256xf32>
    %288 = vector.broadcast %286 : vector<32x1xf32> to vector<32x256xf32>
    %289 = arith.addf %287, %288 : vector<32x256xf32>
    %cst_107 = arith.constant 0.000000e+00 : f32
    %290 = vector.broadcast %cst_107 : f32 to vector<32x256xf32>
    %291 = arith.maximumf %289, %290 : vector<32x256xf32>
    %292 = arith.truncf %291 : vector<32x256xf32> to vector<32x256xbf16>
    %c384 = arith.constant 384 : index
    %c0_108 = arith.constant 0 : index
    %293 = vector.load %arg4[%c384, %c0_108] : memref<448x32xbf16, #tpu.memory_space<vmem>>, vector<32x32xbf16>
    %c384_109 = arith.constant 384 : index
    %c0_110 = arith.constant 0 : index
    %294 = vector.load %arg5[%c384_109, %c0_110] : memref<448x1xf32, #tpu.memory_space<vmem>>, vector<32x1xf32>
    %cst_111 = arith.constant dense<0.000000e+00> : vector<32x256xf32>
    %295 = tpu.matmul %293, %292, %cst_111 {dimension_numbers = #tpu.dot_dimension_numbers<[1], [0], [0], [1], [0, 0, 1, 1], [], []>} : vector<32x32xbf16>, vector<32x256xbf16>, vector<32x256xf32> -> vector<32x256xf32>
    %296 = vector.broadcast %294 : vector<32x1xf32> to vector<32x256xf32>
    %297 = arith.addf %295, %296 : vector<32x256xf32>
    %cst_112 = arith.constant 0.000000e+00 : f32
    %298 = vector.broadcast %cst_112 : f32 to vector<32x256xf32>
    %299 = arith.maximumf %297, %298 : vector<32x256xf32>
    %300 = arith.truncf %299 : vector<32x256xf32> to vector<32x256xbf16>
    %c416 = arith.constant 416 : index
    %c0_113 = arith.constant 0 : index
    %301 = vector.load %arg4[%c416, %c0_113] : memref<448x32xbf16, #tpu.memory_space<vmem>>, vector<32x32xbf16>
    %c416_114 = arith.constant 416 : index
    %c0_115 = arith.constant 0 : index
    %302 = vector.load %arg5[%c416_114, %c0_115] : memref<448x1xf32, #tpu.memory_space<vmem>>, vector<32x1xf32>
    %cst_116 = arith.constant dense<0.000000e+00> : vector<32x256xf32>
    %303 = tpu.matmul %301, %300, %cst_116 {dimension_numbers = #tpu.dot_dimension_numbers<[1], [0], [0], [1], [0, 0, 1, 1], [], []>} : vector<32x32xbf16>, vector<32x256xbf16>, vector<32x256xf32> -> vector<32x256xf32>
    %304 = vector.broadcast %302 : vector<32x1xf32> to vector<32x256xf32>
    %305 = arith.addf %303, %304 : vector<32x256xf32>
    %306 = arith.addf %234, %305 : vector<32x256xf32>
    %c0_117 = arith.constant 0 : index
    %c0_118 = arith.constant 0 : index
    %c0_119 = arith.constant 0 : index
    %307 = vector.load %arg6[%c0_117, %c0_118, %c0_119] : memref<1x32x256xf32, #tpu.memory_space<vmem>>, vector<1x32x256xf32>
    %308 = vector.shape_cast %307 : vector<1x32x256xf32> to vector<32x256xf32>
    %309 = vector.shape_cast %306 : vector<32x256xf32> to vector<1x32x256xf32>
    tpu.vector_store %arg6[%c0_117, %c0_118, %c0_119], %309 {strides = array<i32>} : memref<1x32x256xf32, #tpu.memory_space<vmem>>, vector<1x32x256xf32>,
    return
  }
  func.func @transform_0(%arg0: i32) -> (i32, i32, i32) {
    %c0_i32 = arith.constant 0 : i32
    %c0_i32_0 = arith.constant 0 : i32
    %c0_i32_1 = arith.constant 0 : i32
    return %arg0, %c0_i32, %c0_i32_0 : i32, i32, i32
  }
  func.func @transform_1(%arg0: i32) -> (i32, i32, i32, i32) {
    %c0_i32 = arith.constant 0 : i32
    %c0_i32_0 = arith.constant 0 : i32
    %c0_i32_1 = arith.constant 0 : i32
    %c0_i32_2 = arith.constant 0 : i32
    return %arg0, %c0_i32, %c0_i32_0, %c0_i32_1 : i32, i32, i32, i32
  }
  func.func @transform_2(%arg0: i32) -> (i32, i32) {
    %c0_i32 = arith.constant 0 : i32
    %c0_i32_0 = arith.constant 0 : i32
    %c0_i32_1 = arith.constant 0 : i32
    return %c0_i32, %c0_i32_0 : i32, i32
  }
  func.func @transform_3(%arg0: i32) -> (i32, i32) {
    %c0_i32 = arith.constant 0 : i32
    %c0_i32_0 = arith.constant 0 : i32
    %c0_i32_1 = arith.constant 0 : i32
    return %c0_i32, %c0_i32_0 : i32, i32
  }
  func.func @transform_4(%arg0: i32) -> (i32, i32) {
    %c0_i32 = arith.constant 0 : i32
    %c0_i32_0 = arith.constant 0 : i32
    %c0_i32_1 = arith.constant 0 : i32
    return %c0_i32, %c0_i32_0 : i32, i32
  }
  func.func @transform_5(%arg0: i32) -> (i32, i32, i32) {
    %c0_i32 = arith.constant 0 : i32
    %c0_i32_0 = arith.constant 0 : i32
    %c0_i32_1 = arith.constant 0 : i32
    return %arg0, %c0_i32, %c0_i32_0 : i32, i32, i32
  }
}

</mosaic_0001>

<bundles_post_ra>
// kernel: tpu_custom_call.1
= control target key start
LH: loop header
LB: loop body
LE: loop exit
PB: predicated region body
PF: predicated region fallthrough
CT: control target
= control target key end

     0   :  { %10 = vsyncpa [#allocation4], 0  ;;  %s8316_s0 = inlined_call_operand.vmem [shape: f32[2,3,128], index: 0, kind: input, shape index: {}]   ;;  %s8317_s1 = inlined_call_operand.vmem [shape: f32[2,2,3,128], index: 1, kind: input, shape index: {}]   ;;  %s8318_s2 = inlined_call_operand.vmem [shape: f32[32,8], index: 2, kind: input, shape index: {}]   ;;  %s8319_s3 = inlined_call_operand.vmem [shape: bf16[448,32], index: 3, kind: input, shape index: {}]   ;;  %s8320_s4 = inlined_call_operand.vmem [shape: f32[448,1], index: 4, kind: input, shape index: {}]   ;;  %s8321_s5 = inlined_call_operand.hbm [shape: f32[2,32,256], index: 5, kind: output, shape index: {}]  }
   0x1   :  { %12 = vsyncpa [#allocation4 + $0x1], 0  ;;  %s5966_s18 = smov 0   ;;  %s5968_s19 = smov 0  }
   0x2   :  { %s5970_s20 = smov 0   ;;  %s5972_s21 = smov 0  }
   0x3 LB: > { %s5987_s22 = sadd.s32 4294967295, %s5924_s21   ;;  %s5008_s23 = sadd.s32 4294967294, %s5924_s21   ;;  %s5924_s21 = sphi %s5972_s21, %s8583_s21   ;;  %s5920_s20 = sphi %s5970_s20, %s8582_s20   ;;  %s5916_s19 = sphi %s5968_s19, %s8581_s19   ;;  %s5912_s18 = sphi %s5966_s18, %s8580_s18  }
   0x4   : > { %s5991_s24 = sadd.s32 1, %s5924_s21   ;;  %s140_s25 = sadd.s32 1, %s5920_s20 }
   0x5   : > { %s137_s26 = ssub.s32 %s5924_s21, %s5991_s24  ;;  %p150_p0 = scmp.ne.s32.totalorder %s5920_s20, %s5916_s19 }
   0x6   : > { %p138_p1 = scmp.eq.s32.totalorder %s137_s26, 0  ;;  %p151_p2 = scmp.eq.s32.totalorder %s5987_s22, 1 }
   0x7   : > { %p156_p3 = scmp.ne.s32.totalorder %s5916_s19, %s5912_s18  ;;  %p157_p4 = scmp.eq.s32.totalorder %s5008_s23, 1 }
   0x8   : > { %s6002_s27 = scalar_select %p138_p1, %s5920_s20, %s140_s25  }
   0x9   : > { %p6004_p5 = por %p151_p2, %p150_p0  ;;  %p6008_p6 = por %p157_p4, %p156_p3 }
   0xa   : > { %p5011_p7 = scmp.ge.s32.totalorder %s5924_s21, 1  ;;  %p199_p8 = scmp.lt.s32.totalorder %s5924_s21, 3 }
   0xc   : > { %p200_p9 = pnand %p5011_p7, %p199_p8 }
   0xe   : > { %203 = sbr.rel (%p200_p9) target bundleno = 4656 (0x1230), region = 40 }
  0x15   : > { %p231_p10 = scmp.lt.s32.totalorder %s5987_s22, 1  ;;  %v8330_v0 = vmov 0   ;;  %vm246_vm0 = vcmask 1042432   ;;  %v241_v6 = vld [vmem:[%s8318_s2] sm:$0xff]  ;;  %v242_v7 = vld [vmem:[%s8318_s2 + $0x8] sm:$0xff]  ;;  %v5927_v8 = vmov 1   ;;  %v798_v33 = vlaneseq }
  0x16   : > { %5583 = vset.pattern.permute.xlu1 %v8330_v0  ;;  %v5928_v9 = vmov 2   ;;  %v5929_v10 = vmov 4   ;;  %v5930_v11 = vmov 3   ;;  %v243_v12 = vld [vmem:[%s8318_s2 + $0x10] sm:$0xff]  ;;  %v244_v13 = vld [vmem:[%s8318_s2 + $0x18] sm:$0xff]  ;;  %v5931_v14 = vmov 5  }
  0x17   : > { %s232_s30 = scalar_select %p231_p10, %s5987_s22, 1  ;;  %v5932_v15 = vmov 6   ;;  %vm285_vm1 = vcmask 23552   ;;  %v799_v37 = vshrl.u32 %v798_v33, 7  ;;  %vm2299_vm2 = vcmask 261120  }
  0x18   : > { %s228_s16 = sand.u32 1, %s5916_s19   ;;  %s5162_s25 = sshll.u32 %s5987_s22, 10 }
  0x19   : > { %s5013_s6 = sshll.u32 %s232_s30, 2  ;;  %s5161_s7 = sshll.u32 %s232_s30, 3  ;;  %v800_v41 = vsub.s32 0, %v799_v37  ;;  %v824_v49 = vsub.s32 1, %v799_v37  ;;  %v852_v63 = vsub.s32 2, %v799_v37 }
  0x1a   : > { %s234_s10 = scalar_lea.vmem %s8316_s0, %s5013_s6  ;;  %s6023_s13 = scalar_lea.vmem %s8317_s1, %s5161_s7 }
  0x1b   : > { %v6025_v1 = vld [vmem:[%s234_s10] sm:$0x7]  ;;  %v6028_v2 = vld [vmem:[%s6023_s13 + $0x4] sm:$0x7]  ;;  %s5012_s17 = sshll.u32 %s228_s16, 6  ;;  %s8267_s7 = scalar_lea.hbm %s8321_s5, %s5162_s25 }
  0x1c   : > { %v6031_v3 = vld [vmem:[%s6023_s13] sm:$0x7]  ;;  %253 = vxpose.xlu0.b32.start.end [1/1] (short) %v6025_v1, 128  ;;  %v1595_v4 = vsel %vm246_vm0, %v6028_v2, 0.0  ;;  %5532 = vmatprep.subr.msk.mxu1 %vm246_vm0, %v6025_v1  ;;  %v247_v16 = vsel %vm246_vm0, %v6025_v1, 0.0  ;;  %s230_s23 = scalar_lea.vmem [#allocation3], %s5012_s17  ;;  %s8275_s22 = scalar_lea.sflag [#allocation4], %s228_s16 }
  0x1d   : > { %1596 = vadd.xlane.f32.xlu1 %v1595_v4  ;;  %5533 = vmatpush3.msk.msra.mxu1 %vm246_vm0, %v6025_v1  ;;  %v883_v5 = vsel %vm246_vm0, %v6031_v3, 0.0  ;;  %s4934_s26 = sshll.u32 %s230_s23, 4  ;;  %s5933_s9 = smov [#allocation3]   ;;  %s8269_s26 = int_to_ptr.vmem [resolvable:$true] %s4934_s26 }
  0x1e   : > { %5320 = vmatprep.subr.msk.mxu1 %vm246_vm0, %v6031_v3  ;;  %5294 = vmatprep.subr.msk.mxu0 %vm246_vm0, %v6025_v1  ;;  %s5862_s8 = scalar_lea.vmem %s8269_s26, 1024  ;;  %s5866_s10 = sshll.u32 %s5933_s9, 4  ;;  %s5867_s10 = int_to_ptr.vmem [resolvable:$false] %s5866_s10 }
  0x1f   : > { %5295 = vmatpush3.msk.msra.mxu0 %vm246_vm0, %v6025_v1  ;;  %p5863_p11 = scmp.ne.s32.totalorder %s8269_s26, %s5862_s8  ;;  %s5868_s11 = scalar_lea.vmem %s5867_s10, 2048 }
  0x20   : > { %5346 = vmatprep.subr.msk.mxu0 %vm246_vm0, %v6028_v2  ;;  %p5869_p0 = scmp.lt.s32.totalorder %s8269_s26, %s5867_s10  ;;  %p5870_p1 = scmp.lt.s32.totalorder %s5868_s11, %s5862_s8 }
  0x21   : > { %884 = vadd.xlane.f32.xlu1 %v883_v5  ;;  %p5864_p12 = pnand %p5863_p11, %p6004_p5 }
  0x22   : > { %p5871_p2 = por %p5870_p1, %p5869_p0 }
  0x23   : > { %p5865_p13 = pneg %p5864_p12 }
  0x25   : > { %p5872_p3 = pnand %p5871_p2, %p5865_p13 }
  0x32   : > { %780 = vperm.xlu1 %5583, %v241_v6  }
  0x36   : > { %785 = vperm.xlu1 %5583, %v242_v7  }
  0x3a   : > { %5584 = vset.pattern.permute.xlu1 %v5927_v8 }
  0x3b   : > { %807 = vperm.xlu1 %5584, %v241_v6  }
  0x3f   : > { %811 = vperm.xlu1 %5584, %v242_v7  }
  0x43   : > { %5585 = vset.pattern.permute.xlu1 %v5928_v9 }
  0x44   : > { %835 = vperm.xlu1 %5585, %v241_v6  }
  0x45   : > { %5594 = vset.pattern.permute.xlu0 %v5929_v10 }
  0x48   : > { %839 = vperm.xlu1 %5585, %v242_v7  }
  0x4c   : > { %5586 = vset.pattern.permute.xlu1 %v5930_v11 }
  0x4d   : > { %1510 = vperm.xlu1 %5586, %v241_v6  }
  0x51   : > { %1514 = vperm.xlu1 %5586, %v242_v7  }
  0x55   : > { %5587 = vset.pattern.permute.xlu1 %v5929_v10 }
  0x56   : > { %1534 = vperm.xlu1 %5587, %v241_v6  }
  0x5a   : > { %1538 = vperm.xlu1 %5587, %v242_v7  }
  0x5e   : > { %5588 = vset.pattern.permute.xlu1 %v8330_v0 }
  0x5f   : > { %790 = vperm.xlu1 %5588, %v243_v12  }
  0x63   : > { %795 = vperm.xlu1 %5588, %v244_v13  }
  0x67   : > { %5589 = vset.pattern.permute.xlu1 %v5927_v8 }
  0x68   : > { %815 = vperm.xlu1 %5589, %v243_v12  }
  0x6c   : > { %819 = vperm.xlu1 %5589, %v244_v13  }
  0x70   : > { %5590 = vset.pattern.permute.xlu1 %v5931_v14 }
  0x71   : > { %1562 = vperm.xlu1 %5590, %v241_v6  }
  0x75   : > { %1566 = vperm.xlu1 %5590, %v242_v7  }
  0x79   : > { %5591 = vset.pattern.permute.xlu1 %v5928_v9 }
  0x7a   : > { %843 = vperm.xlu1 %5591, %v243_v12  }
  0x7e   : > { %847 = vperm.xlu1 %5591, %v244_v13  }
  0x82   : > { %5592 = vset.pattern.permute.xlu1 %v5932_v15 }
  0x83   : > { %863 = vperm.xlu1 %5592, %v241_v6  }
  0x85   : > { %248 = vadd.xlane.f32.xlu0 %v247_v16 }
  0x87   : > { %867 = vperm.xlu1 %5592, %v242_v7  }
  0x8b   : > { %5593 = vset.pattern.permute.xlu1 %v5930_v11 }
  0x8c   : > { %1518 = vperm.xlu1 %5593, %v243_v12  }
  0x90   : > { %1522 = vperm.xlu1 %5593, %v244_v13  }
  0x94   : > { %5595 = vset.pattern.permute.xlu1 %v5929_v10 }
  0x95   : > { %1546 = vperm.xlu1 %5595, %v244_v13  }
  0x99   : > { %5596 = vset.pattern.permute.xlu1 %v5931_v14 }
  0x9a   : > { %1570 = vperm.xlu1 %5596, %v243_v12  }
  0x9b   : > { %1542 = vperm.xlu0 %5594, %v243_v12  }
  0x9c   : > { %v269_v17 = vpop.trf.xlu0 }
  0x9d   : > { %5296 = vmatprep.mubr.msk.f32.mxu0 %vm285_vm1, %v269_v17 }
  0x9e   : > { %1574 = vperm.xlu1 %5596, %v244_v13  }
  0x9f   : > { %5598 = vset.pattern.permute.xlu0 %v8330_v0 }
  0xa0   : > { %v270_v18 = vpop.trf.xlu0 }
  0xa1   : > { %5297 = vmatmul.mubr.msk.f32.vlgmr.msra.gmra.mrb[0].mxu0 %vm285_vm1, %v270_v18 }
  0xa2   : > { %5597 = vset.pattern.permute.xlu1 %v5932_v15  ;;  %5347 = vmatpush3.msk.msra.mxu0 %vm246_vm0, %v6028_v2 }
  0xa3   : > { %871 = vperm.xlu1 %5597, %v243_v12  }
  0xa4   : > { %v271_v19 = vpop.trf.xlu0 }
  0xa5   : > { %5299 = vmatprep.mubr.msk.f32.mxu0 %vm285_vm1, %v271_v19 }
  0xa7   : > { %875 = vperm.xlu1 %5597, %v244_v13  }
  0xa8   : > { %v272_v20 = vpop.trf.xlu0 }
  0xa9   : > { %5300 = vmatmul.mubr.msk.f32.gmra.mrb[2].mxu0 %vm285_vm1, %v272_v20 }
  0xaa   : > { %v6072_v21 = vpop.xlane.xlu1 %1596 }
  0xab   : > { %v1598_v14 = vmul.f32 0.0078125, %v6072_v21 }
  0xac   : > { %v273_v22 = vpop.trf.xlu0 }
  0xad   : > { %5302 = vmatprep.mubr.msk.f32.mxu0 %vm285_vm1, %v273_v22  ;;  %v1599_v16 = vsub.f32 %v6028_v2, %v1598_v14 }
  0xae   : > { %v885_v23 = vpop.xlane.xlu1 %884 }
  0xaf   : > { %v886_v34 = vmul.f32 0.0078125, %v885_v23  ;;  %v2232_v18 = vrot.slane %v1599_v16, %v824_v49  ;;  %v2224_v20 = vrot.slane %v1599_v16, %v800_v41  ;;  %v2244_v22 = vrot.slane %v1599_v16, %v852_v63 }
  0xb0   : > { %v274_v24 = vpop.trf.xlu0 }
  0xb1   : > { %5303 = vmatmul.mubr.msk.f32.gmra.mrb[4].mxu0 %vm285_vm1, %v274_v24  ;;  %v887_v38 = vsub.f32 %v6031_v3, %v886_v34 }
  0xb2   : > { %v6076_v25 = vpop.permute.xlu1 %780 }
  0xb3   : > { %v6095_v42 = vrot.slane %v887_v38, %v800_v41  ;;  %v6102_v50 = vrot.slane %v887_v38, %v824_v49  ;;  %v6113_v4 = vrot.slane %v887_v38, %v852_v63 }
  0xb4   : > { %v275_v26 = vpop.trf.xlu0 }
  0xb5   : > { %5305 = vmatprep.mubr.msk.f32.mxu0 %vm285_vm1, %v275_v26 }
  0xb6   : > { %v6079_v27 = vpop.permute.xlu1 %785 }
  0xb8   : > { %v276_v28 = vpop.trf.xlu0 }
  0xb9   : > { %5306 = vmatmul.mubr.msk.f32.gmra.mrb[6].mxu0 %vm285_vm1, %v276_v28 }
  0xba   : > { %v6082_v29 = vpop.permute.xlu1 %807 }
  0xbc   : > { %v277_v30 = vpop.trf.xlu0 }
  0xbd   : > { %5308 = vmatprep.mubr.msk.f32.mxu0 %vm285_vm1, %v277_v30 }
  0xbe   : > { %v6085_v31 = vpop.permute.xlu1 %811 }
  0xc0   : > { %v278_v32 = vpop.trf.xlu0 }
  0xc1   : > { %5309 = vmatmul.mubr.msk.f32.gmra.mrb[8].mxu0 %vm285_vm1, %v278_v32 }
  0xc3   : > { %v6088_v35 = vpop.permute.xlu1 %835 }
  0xc4   : > { %v279_v36 = vpop.trf.xlu0 }
  0xc5   : > { %5311 = vmatprep.mubr.msk.f32.mxu0 %vm285_vm1, %v279_v36 }
  0xc7   : > { %v6092_v39 = vpop.permute.xlu1 %839 }
  0xc8   : > { %v280_v40 = vpop.trf.xlu0 }
  0xc9   : > { %5312 = vmatmul.mubr.msk.f32.gmra.mrb[10].mxu0 %vm285_vm1, %v280_v40 }
  0xcc   : > { %v1511_v43 = vpop.permute.xlu1 %1510  ;;  %v281_v44 = vpop.trf.xlu0 }
  0xcd   : > { %v1529_v45 = vmul.f32 %v6095_v42, %v1511_v43  ;;  %5314 = vmatprep.mubr.msk.f32.mxu0 %vm285_vm1, %v281_v44  ;;  %v2225_v30 = vmul.f32 %v2224_v20, %v1511_v43  ;;  %v2265_v43 = vld [vmem:[%s8320_s4] sm:$0xff] }
  0xce   : > { %2271 = vperm.xlu0 %5598, %v2265_v43  }
  0xd0   : > { %888 = vxpose.xlu1.b32.start.end [1/1] (short) %v6031_v3, 128  ;;  %v1515_v46 = vpop.permute.xlu1 %1514  ;;  %v282_v47 = vpop.trf.xlu0 }
  0xd1   : > { %v1530_v48 = vmul.f32 %v6095_v42, %v1515_v46  ;;  %5315 = vmatmul.mubr.msk.f32.gmra.mrb[12].mxu0 %vm285_vm1, %v282_v47  ;;  %v2226_v34 = vmul.f32 %v2224_v20, %v1515_v46 }
  0xd4   : > { %v283_v51 = vpop.trf.xlu0 }
  0xd5   : > { %v1535_v52 = vpop.permute.xlu1 %1534  ;;  %5317 = vmatprep.mubr.msk.f32.mxu1 %vm285_vm1, %v283_v51 }
  0xd6   : > { %v1553_v53 = vmul.f32 %v6102_v50, %v1535_v52  ;;  %v2233_v23 = vmul.f32 %v2232_v18, %v1535_v52 }
  0xd8   : > { %v1557_v54 = vadd.f32 %v1553_v53, %v1529_v45  ;;  %v284_v55 = vpop.trf.xlu0  ;;  %v2237_v37 = vadd.f32 %v2233_v23, %v2225_v30 }
  0xd9   : > { %v1539_v56 = vpop.permute.xlu1 %1538  ;;  %5318 = vmatmul.mubr.msk.f32.vlgmr.msra.gmra.mrb[0].mxu1 %vm285_vm1, %v284_v55 }
  0xda   : > { %v1554_v57 = vmul.f32 %v6102_v50, %v1539_v56  ;;  %5321 = vmatpush3.msk.msra.mxu1 %vm246_vm0, %v6031_v3  ;;  %v2234_v26 = vmul.f32 %v2232_v18, %v1539_v56 }
  0xdc   : > { %v1558_v58 = vadd.f32 %v1554_v57, %v1530_v48  ;;  %v2238_v40 = vadd.f32 %v2234_v26, %v2226_v34 }
  0xde   : > { %v791_v59 = vpop.permute.xlu1 %790 }
  0xe2   : > { %v796_v60 = vpop.permute.xlu1 %795 }
  0xe7   : > { %v816_v61 = vpop.permute.xlu1 %815 }
  0xeb   : > { %v6110_v62 = vpop.permute.xlu1 %819 }
  0xee   : > { %5599 = vset.pattern.permute.xlu1 %v8330_v0 }
  0xf0   : > { %v1563_v5 = vpop.permute.xlu1 %1562 }
  0xf1   : > { %v1581_v6 = vmul.f32 %v6113_v4, %v1563_v5  ;;  %v2245_v32 = vmul.f32 %v2244_v22, %v1563_v5 }
  0xf3   : > { %v6116_v7 = vadd.f32 %v1581_v6, %v1557_v54  ;;  %v2249_v45 = vadd.f32 %v2245_v32, %v2237_v37 }
  0xf4   : > { %v1567_v8 = vpop.permute.xlu1 %1566 }
  0xf5   : > { %v1582_v9 = vmul.f32 %v6113_v4, %v1567_v8  ;;  %v2246_v36 = vmul.f32 %v2244_v22, %v1567_v8 }
  0xf7   : > { %v6119_v3 = vadd.f32 %v1582_v9, %v1558_v58  ;;  %v2250_v53 = vadd.f32 %v2246_v36, %v2238_v40 }
  0xf9   : > { %v844_v10 = vpop.permute.xlu1 %843 }
  0xfd   : > { %v6121_v11 = vpop.permute.xlu1 %847 }
 0x102   : > { %v864_v12 = vpop.permute.xlu1 %863 }
 0x106   : > { %v6123_v13 = vpop.permute.xlu1 %867 }
 0x10b   : > { %v1519_v15 = vpop.permute.xlu1 %1518 }
 0x10c   : > { %v1531_v54 = vmul.f32 %v6095_v42, %v1519_v15 }
 0x10f   : > { %v1523_v17 = vpop.permute.xlu1 %1522 }
 0x112   : > { %v249_v19 = vpop.xlane.xlu0 %248 }
 0x113   : > { %v251_v24 = vmul.f32 0.0078125, %v249_v19 }
 0x114   : > { %v1547_v28 = vpop.permute.xlu1 %1546 }
 0x115   : > { %v252_v33 = vsub.f32 %v6025_v1, %v251_v24  ;;  %v1556_v14 = vmul.f32 %v6102_v50, %v1547_v28  ;;  %v2236_v19 = vmul.f32 %v2232_v18, %v1547_v28 }
 0x117   : > { %v801_v21 = vrot.slane %v252_v33, %v800_v41  ;;  %v825_v38 = vrot.slane %v252_v33, %v824_v49  ;;  %v853_v44 = vrot.slane %v252_v33, %v852_v63  ;;  %v2227_v49 = vmul.f32 %v2224_v20, %v1519_v15 }
 0x119   : > { %v1571_v47 = vpop.permute.xlu1 %1570  ;;  %v804_v48 = vmul.f32 %v801_v21, %v791_v59  ;;  %v828_v51 = vmul.f32 %v825_v38, %v816_v61  ;;  %v802_v52 = vmul.f32 %v801_v21, %v6076_v25  ;;  %v803_v55 = vmul.f32 %v801_v21, %v6079_v27  ;;  %v2266_v25 = vld [vmem:[%s8320_s4 + $0x8] sm:$0xff] }
 0x11a   : > { %v1543_v46 = vpop.permute.xlu0 %1542  ;;  %v826_v41 = vmul.f32 %v825_v38, %v6082_v29  ;;  %v827_v58 = vmul.f32 %v825_v38, %v6085_v31  ;;  %v1532_v59 = vmul.f32 %v6095_v42, %v1523_v17  ;;  %v854_v63 = vmul.f32 %v853_v44, %v6088_v35  ;;  %2276 = vperm.xlu0 %5598, %v2266_v25   ;;  %v2267_v35 = vld [vmem:[%s8320_s4 + $0x10] sm:$0xff] }
 0x11b   : > { %v1555_v56 = vmul.f32 %v6102_v50, %v1543_v46  ;;  %v2235_v57 = vmul.f32 %v2232_v18, %v1543_v46  ;;  %v805_v5 = vmul.f32 %v801_v21, %v796_v60  ;;  %v2228_v27 = vmul.f32 %v2224_v20, %v1523_v17  ;;  %v2390_v46 = vld [vmem:[%s8320_s4 + $0x58] sm:$0xff] }
 0x11c   : > { %v830_v61 = vadd.f32 %v826_v41, %v802_v52  ;;  %v832_v29 = vadd.f32 %v828_v51, %v804_v48  ;;  %v831_v8 = vadd.f32 %v827_v58, %v803_v55  ;;  %v855_v9 = vmul.f32 %v853_v44, %v6092_v39  ;;  %v2383_v55 = vld [vmem:[%s8320_s4 + $0x20] sm:$0xff]  ;;  %v2384_v41 = vld [vmem:[%s8320_s4 + $0x28] sm:$0xff] }
 0x11d   : > { %v1575_v6 = vpop.permute.xlu1 %1574  ;;  %v1559_v15 = vadd.f32 %v1555_v56, %v1531_v54  ;;  %v829_v16 = vmul.f32 %v825_v38, %v6110_v62  ;;  %v2239_v23 = vadd.f32 %v2235_v57, %v2227_v49  ;;  %v856_v42 = vmul.f32 %v853_v44, %v844_v10  ;;  %v2389_v54 = vld [vmem:[%s8320_s4 + $0x50] sm:$0xff]  ;;  %v2386_v56 = vld [vmem:[%s8320_s4 + $0x38] sm:$0xff] }
 0x11e   : > { %v858_v31 = vadd.f32 %v854_v63, %v830_v61  ;;  %v859_v24 = vadd.f32 %v855_v9, %v831_v8  ;;  %v1583_v60 = vmul.f32 %v6113_v4, %v1571_v47  ;;  %v2247_v17 = vmul.f32 %v2244_v22, %v1571_v47  ;;  %2281 = vperm.xlu0 %5598, %v2267_v35   ;;  %v2385_v49 = vld [vmem:[%s8320_s4 + $0x30] sm:$0xff] }
 0x11f   : > { %v833_v39 = vadd.f32 %v829_v16, %v805_v5  ;;  %v1584_v50 = vmul.f32 %v6113_v4, %v1575_v6  ;;  %v2248_v26 = vmul.f32 %v2244_v22, %v1575_v6  ;;  %v860_v30 = vadd.f32 %v856_v42, %v832_v29  ;;  %v2268_v4 = vld [vmem:[%s8320_s4 + $0x18] sm:$0xff] }
 0x120   : > { %v878_v20 = vadd.f32 %v864_v12, %v858_v31  ;;  %v879_v62 = vadd.f32 %v6123_v13, %v859_v24  ;;  %v1587_v18 = vadd.f32 %v1583_v60, %v1559_v15  ;;  %v857_v10 = vmul.f32 %v853_v44, %v6121_v11 }
 0x121   : > { %v2251_v36 = vadd.f32 %v2247_v17, %v2239_v23  ;;  %v1560_v22 = vadd.f32 %v1556_v14, %v1532_v59  ;;  %v2240_v21 = vadd.f32 %v2236_v19, %v2228_v27  ;;  %v5600_v17 = vld [vmem:[%s8319_s3] sm:$0xff]  }
 0x122   : > { %v872_v32 = vpop.permute.xlu1 %871  ;;  %v2253_v28 = vadd.f32 %v2249_v45, %v878_v20  ;;  %v1589_v33 = vadd.f32 %v6116_v7, %v878_v20  ;;  %v2254_v37 = vadd.f32 %v2250_v53, %v879_v62  ;;  %v1590_v12 = vadd.f32 %v6119_v3, %v879_v62  ;;  %2286 = vperm.xlu0 %5598, %v2268_v4   ;;  %v2388_v3 = vld [vmem:[%s8320_s4 + $0x48] sm:$0xff] }
 0x123   : > { %v880_v34 = vadd.f32 %v872_v32, %v860_v30  ;;  %v861_v13 = vadd.f32 %v857_v10, %v833_v39  ;;  %v1588_v7 = vadd.f32 %v1584_v50, %v1560_v22  ;;  %v2252_v44 = vadd.f32 %v2248_v26, %v2240_v21  ;;  %v5601_v50 = vld [vmem:[%s8319_s3 + $0x8] sm:$0xff]  }
 0x124   : > { %v2258_v45 = vpack.c.bf16 %v2254_v37, %v2253_v28  ;;  %v2257_v47 = vpack.c.bf16 %v1590_v12, %v1589_v33  ;;  %v2387_v33 = vld [vmem:[%s8320_s4 + $0x40] sm:$0xff] }
 0x125   : > { %v1591_v38 = vadd.f32 %v1587_v18, %v880_v34  ;;  %v2255_v40 = vadd.f32 %v2251_v36, %v880_v34  ;;  %v482_v34 = vmul.f32 %v6025_v1, %v6025_v1 }
 0x126   : > { %v876_v11 = vpop.permute.xlu1 %875  ;;  %2306 = vmatprep.subr.bf16.mxu1 %v2258_v45  ;;  %2422 = vperm.xlu0 %5598, %v2388_v3  }
 0x127   : > { %v881_v48 = vadd.f32 %v876_v11, %v861_v13  ;;  %v483_v36 = vsel %vm246_vm0, %v482_v34, 0.0 }
 0x128   : > { %v484_v37 = vrot.slane %v483_v36, 4 }
 0x129   : > { %v1592_v51 = vadd.f32 %v1588_v7, %v881_v48  ;;  %v2256_v52 = vadd.f32 %v2252_v44, %v881_v48 }
 0x12a   : > { %2427 = vperm.xlu0 %5598, %v2389_v54   ;;  %2417 = vperm.xlu1 %5599, %v2387_v33   ;;  %v485_v12 = vadd.f32 %v484_v37, %v483_v36 }
 0x12b   : > { %v2259_v43 = vpack.c.bf16 %v1592_v51, %v1591_v38  ;;  %v2260_v53 = vpack.c.bf16 %v2256_v52, %v2255_v40 }
 0x12c   : > { %v486_v21 = vrot.slane %v485_v12, 2 }
 0x12e   : > { %2432 = vperm.xlu0 %5598, %v2390_v46   ;;  %v487_v13 = vadd.f32 %v486_v21, %v485_v12 }
 0x130   : > { %v488_v45 = vrot.slane %v487_v13, 1 }
 0x132   : > { %2397 = vperm.xlu0 %5598, %v2383_v55  }
 0x136   : > { %2402 = vperm.xlu0 %5598, %v2384_v41  }
 0x13a   : > { %2407 = vperm.xlu0 %5598, %v2385_v49  }
 0x13e   : > { %2412 = vperm.xlu0 %5598, %v2386_v56  }
 0x14d   : > { %v2272_v54 = vpop.permute.xlu0 %2271 }
 0x150   : > { %v904_v57 = vpop.trf.xlu1 }
 0x151   : > { %5322 = vmatprep.mubr.msk.f32.mxu1 %vm285_vm1, %v904_v57 }
 0x154   : > { %v905_v58 = vpop.trf.xlu1 }
 0x155   : > { %5323 = vmatmul.mubr.msk.f32.vlgmr.msra.gmra.mrb[2].mxu1 %vm285_vm1, %v905_v58 }
 0x156   : > { %2307 = vmatpush1.bf16.msra.mxu1 %v2257_v47  ;;  %v6252_v47 = vadd.f32 %v488_v45, %v487_v13 }
 0x157   : > { %2308 = vmatprep.subr.bf16.mxu1 %v2260_v53 }
 0x158   : > { %v906_v25 = vpop.trf.xlu1  ;;  %490 = vxpose.xlu1.b32.start.end [1/1] (short) %v6252_v47, 128 }
 0x159   : > { %5325 = vmatprep.mubr.msk.f32.mxu1 %vm285_vm1, %v906_v25 }
 0x15a   : > { %2309 = vmatpush1.bf16.msra.mxu1 %v2259_v43 }
 0x15c   : > { %v907_v59 = vpop.trf.xlu1  ;;  %1600 = vxpose.xlu0.b32.start.end [1/1] (short) %v6028_v2, 128 }
 0x15d   : > { %5326 = vmatmul.mubr.msk.f32.gmra.mrb[4].mxu1 %vm285_vm1, %v907_v59 }
 0x160   : > { %v908_v61 = vpop.trf.xlu1 }
 0x161   : > { %5328 = vmatprep.mubr.msk.f32.mxu1 %vm285_vm1, %v908_v61 }
 0x164   : > { %v909_v63 = vpop.trf.xlu1 }
 0x165   : > { %5329 = vmatmul.mubr.msk.f32.gmra.mrb[6].mxu1 %vm285_vm1, %v909_v63 }
 0x168   : > { %v910_v5 = vpop.trf.xlu1 }
 0x169   : > { %5331 = vmatprep.mubr.msk.f32.mxu1 %vm285_vm1, %v910_v5 }
 0x16c   : > { %v911_v27 = vpop.trf.xlu1 }
 0x16d   : > { %5332 = vmatmul.mubr.msk.f32.gmra.mrb[8].mxu1 %vm285_vm1, %v911_v27 }
 0x170   : > { %v912_v6 = vpop.trf.xlu1 }
 0x171   : > { %5334 = vmatprep.mubr.msk.f32.mxu1 %vm285_vm1, %v912_v6 }
 0x174   : > { %v913_v29 = vpop.trf.xlu1  ;;  %v6189_v9 = vpop.f32.mrb[0].mxu0 }
 0x175   : > { %5335 = vmatmul.mubr.msk.f32.gmra.mrb[10].mxu1 %vm285_vm1, %v913_v29  ;;  %v6192_v2 = vpop.f32.mrb[1].mxu0 }
 0x178   : > { %v914_v8 = vpop.trf.xlu1 }
 0x179   : > { %5337 = vmatprep.mubr.msk.f32.mxu1 %vm285_vm1, %v914_v8 }
 0x17c   : > { %v915_v14 = vpop.trf.xlu1  ;;  %v6194_v15 = vpop.f32.mrb[2].mxu0 }
 0x17d   : > { %5338 = vmatmul.mubr.msk.f32.gmra.mrb[12].mxu1 %vm285_vm1, %v915_v14  ;;  %v6197_v31 = vpop.f32.mrb[3].mxu0 }
 0x180   : > { %v916_v16 = vpop.trf.xlu1 }
 0x181   : > { %5340 = vmatprep.mubr.msk.f32.mxu1 %vm285_vm1, %v916_v16 }
 0x184   : > { %v917_v19 = vpop.trf.xlu1  ;;  %v6200_v23 = vpop.f32.mrb[4].mxu0 }
 0x185   : > { %5341 = vmatmul.mubr.msk.f32.gmra.mrb[14].mxu1 %vm285_vm1, %v917_v19  ;;  %v6203_v42 = vpop.f32.mrb[5].mxu0 }
 0x188   : > { %v918_v24 = vpop.trf.xlu1 }
 0x189   : > { %5343 = vmatprep.mubr.msk.f32.mxu1 %vm285_vm1, %v918_v24 }
 0x18c   : > { %v919_v35 = vpop.trf.xlu1  ;;  %v6206_v60 = vpop.f32.mrb[6].mxu0 }
 0x18d   : > { %5344 = vmatmul.mubr.msk.f32.gmra.mrb[16].mxu1 %vm285_vm1, %v919_v35  ;;  %v6212_v20 = vpop.f32.mrb[7].mxu0 }
 0x18e   : > { %2338 = vmatprep.mubr.bf16.mxu1 %v8330_v0 }
 0x191   : > { %5070 = vmatmul.mubr.msk.bf16.vlgmr.msra.gmra.mrb[20].mxu1 %vm2299_vm2, %v5600_v17 }
 0x192   : > { %2348 = vmatprep.mubr.bf16.mxu1 %v8330_v0 }
 0x194   : > { %v6217_v39 = vpop.f32.mrb[8].mxu0 }
 0x195   : > { %v6222_v26 = vpop.f32.mrb[9].mxu0 }
 0x199   : > { %5071 = vmatmul.mubr.msk.bf16.gmra.mrb[24].mxu1 %vm2299_vm2, %v5601_v50  ;;  %v2277_v41 = vpop.permute.xlu0 %2276 }
 0x19a   : > { %2535 = vmatprep.mubr.bf16.mxu1 %v8330_v0 }
 0x19c   : > { %v6226_v30 = vpop.f32.mrb[10].mxu0 }
 0x19d   : > { %v6228_v62 = vpop.f32.mrb[11].mxu0  ;;  %v2282_v63 = vpop.permute.xlu0 %2281 }
 0x1a1   : > { %v2287_v35 = vpop.permute.xlu0 %2286 }
 0x1a4   : > { %v6234_v28 = vpop.f32.mrb[12].mxu0 }
 0x1a5   : > { %v6236_v10 = vpop.f32.mrb[13].mxu0 }
 0x1ac   : > { %v6230_v32 = vpop.f32.mrb[0].mxu1 }
 0x1ad   : > { %v6232_v18 = vpop.f32.mrb[1].mxu1 }
 0x228   : > { %v6244_v4 = vpop.f32.mrb[2].mxu1 }
 0x229   : > { %v6246_v22 = vpop.f32.mrb[3].mxu1 }
 0x230   : > { %v6248_v38 = vpop.f32.mrb[4].mxu1 }
 0x231   : > { %v6250_v40 = vpop.f32.mrb[5].mxu1 }
 0x238   : > { %v6254_v11 = vpop.f32.mrb[6].mxu1 }
 0x239   : > { %v6256_v1 = vpop.f32.mrb[7].mxu1 }
 0x240   : > { %v6259_v7 = vpop.f32.mrb[8].mxu1 }
 0x241   : > { %v6261_v44 = vpop.f32.mrb[9].mxu1 }
 0x248   : > { %v6263_v48 = vpop.f32.mrb[10].mxu1 }
 0x249   : > { %v6265_v3 = vpop.f32.mrb[11].mxu1 }
 0x250   : > { %v6267_v51 = vpop.f32.mrb[12].mxu1 }
 0x251   : > { %v6269_v52 = vpop.f32.mrb[13].mxu1 }
 0x258   : > { %v6271_v43 = vpop.f32.mrb[14].mxu1 }
 0x259   : > { %v6273_v53 = vpop.f32.mrb[15].mxu1 }
 0x260   : > { %v6275_v46 = vpop.f32.mrb[16].mxu1 }
 0x261   : > { %v6277_v55 = vpop.f32.mrb[17].mxu1 }
 0x264   : > { %v2340_v49 = vpop.f32.mrb[20].mxu1 }
 0x265   : > { %v2342_v56 = vpop.f32.mrb[21].mxu1  ;;  %v6281_v25 = vadd.f32 %v2340_v49, %v2272_v54  ;;  %v5602_v49 = vld [vmem:[%s8319_s3 + $0x10] sm:$0xff]  }
 0x266   : > { %v6279_v57 = vadd.f32 %v2342_v56, %v2272_v54  ;;  %v2344_v58 = vpop.f32.mrb[22].mxu1  ;;  %v5603_v56 = vld [vmem:[%s8319_s3 + $0x18] sm:$0xff]  }
 0x267   : > { %8391 = vst [vmem:[#allocation7_spill] sm:$0xff] %v6281_v25  ;;  %v6283_v59 = vadd.f32 %v2344_v58, %v2277_v41  ;;  %v2346_v61 = vpop.f32.mrb[23].mxu1  ;;  %v8329_v8 = vmax.f32 %v6281_v25, 0.0  ;;  %v5604_v58 = vld [vmem:[%s8319_s3 + $0x20] sm:$0xff]  }
 0x268   : > { %8390 = vst [vmem:[#allocation6_spill] sm:$0xff] %v6279_v57  ;;  %v6285_v5 = vadd.f32 %v2346_v61, %v2277_v41  ;;  %v8327_v6 = vmax.f32 %v6279_v57, 0.0  ;;  %v5605_v61 = vld [vmem:[%s8319_s3 + $0x28] sm:$0xff]  }
 0x269   : > { %8392 = vst [vmem:[#allocation8_spill] sm:$0xff] %v6283_v59  ;;  %v8328_v27 = vmax.f32 %v6283_v59, 0.0 }
 0x26a   : > { %8393 = vst [vmem:[#allocation9_spill] sm:$0xff] %v6285_v5  ;;  %v8326_v29 = vmax.f32 %v6285_v5, 0.0 }
 0x26b   : > { %v2367_v19 = vpack.c.bf16 %v8328_v27, %v8329_v8 }
 0x26c   : > { %v2368_v14 = vpack.c.bf16 %v8326_v29, %v8327_v6  ;;  %v2350_v16 = vpop.f32.mrb[24].mxu1 }
 0x26d   : > { %v2352_v24 = vpop.f32.mrb[25].mxu1  ;;  %v6301_v33 = vadd.f32 %v2350_v16, %v2282_v63 }
 0x26e   : > { %v6299_v17 = vadd.f32 %v2352_v24, %v2282_v63  ;;  %v2354_v50 = vpop.f32.mrb[26].mxu1  ;;  %2503 = vmatprep.subr.bf16.mxu1 %v2368_v14  ;;  %v6339_v63 = vpop.permute.xlu0 %2422 }
 0x26f   : > { %8395 = vst [vmem:[#allocation11_spill] sm:$0xff] %v6301_v33  ;;  %v6303_v34 = vadd.f32 %v2354_v50, %v2287_v35  ;;  %v2356_v36 = vpop.f32.mrb[27].mxu1  ;;  %2504 = vmatpush1.bf16.msra.mxu1 %v2367_v19  ;;  %v8325_v45 = vmax.f32 %v6301_v33, 0.0 }
 0x270   : > { %8394 = vst [vmem:[#allocation10_spill] sm:$0xff] %v6299_v17  ;;  %v6305_v37 = vadd.f32 %v2356_v36, %v2287_v35  ;;  %v8323_v21 = vmax.f32 %v6299_v17, 0.0 }
 0x271   : > { %8396 = vst [vmem:[#allocation12_spill] sm:$0xff] %v6303_v34  ;;  %v8324_v12 = vmax.f32 %v6303_v34, 0.0 }
 0x272   : > { %8397 = vst [vmem:[#allocation13_spill] sm:$0xff] %v6305_v37  ;;  %v8322_v13 = vmax.f32 %v6305_v37, 0.0  ;;  %v6341_v14 = vpop.permute.xlu0 %2427 }
 0x273   : > { %v2369_v41 = vpack.c.bf16 %v8324_v12, %v8325_v45 }
 0x274   : > { %v2370_v54 = vpack.c.bf16 %v8322_v13, %v8323_v21 }
 0x276   : > { %2505 = vmatprep.subr.bf16.mxu1 %v2370_v54  ;;  %v6343_v16 = vpop.permute.xlu0 %2432 }
 0x277   : > { %2506 = vmatpush1.bf16.msra.mxu1 %v2369_v41 }
 0x27a   : > { %5078 = vmatmul.mubr.msk.bf16.vlgmr.msra.gmra.mrb[28].mxu1 %vm2299_vm2, %v5602_v49  ;;  %v2398_v19 = vpop.permute.xlu0 %2397 }
 0x27b   : > { %2545 = vmatprep.mubr.bf16.mxu1 %v8330_v0 }
 0x27e   : > { %v2403_v24 = vpop.permute.xlu0 %2402 }
 0x282   : > { %5079 = vmatmul.mubr.msk.bf16.gmra.mrb[32].mxu1 %vm2299_vm2, %v5603_v56  ;;  %v2408_v35 = vpop.permute.xlu0 %2407 }
 0x283   : > { %2555 = vmatprep.mubr.bf16.mxu1 %v8330_v0 }
 0x286   : > { %v2413_v50 = vpop.permute.xlu0 %2412 }
 0x28a   : > { %5080 = vmatmul.mubr.msk.bf16.gmra.mrb[36].mxu1 %vm2299_vm2, %v5604_v58  ;;  %v1616_v36 = vpop.trf.xlu0 }
 0x28b   : > { %2565 = vmatprep.mubr.bf16.mxu1 %v8330_v0  ;;  %5348 = vmatprep.mubr.msk.f32.mxu0 %vm285_vm1, %v1616_v36 }
 0x28e   : > { %v1617_v54 = vpop.trf.xlu0 }
 0x28f   : > { %5349 = vmatmul.mubr.msk.f32.vlgmr.msra.gmra.mrb[14].mxu0 %vm285_vm1, %v1617_v54 }
 0x292   : > { %5081 = vmatmul.mubr.msk.bf16.gmra.mrb[40].mxu1 %vm2299_vm2, %v5605_v61  ;;  %v1618_v41 = vpop.trf.xlu0 }
 0x293   : > { %2575 = vmatprep.mubr.bf16.mxu1 %v8330_v0  ;;  %5351 = vmatprep.mubr.msk.f32.mxu0 %vm285_vm1, %v1618_v41 }
 0x296   : > { %v1619_v49 = vpop.trf.xlu0 }
 0x297   : > { %5352 = vmatmul.mubr.msk.f32.gmra.mrb[16].mxu0 %vm285_vm1, %v1619_v49 }
 0x29a   : > { %v1620_v56 = vpop.trf.xlu0 }
 0x29b   : > { %5354 = vmatprep.mubr.msk.f32.mxu0 %vm285_vm1, %v1620_v56 }
 0x29e   : > { %v1621_v58 = vpop.trf.xlu0 }
 0x29f   : > { %5355 = vmatmul.mubr.msk.f32.gmra.mrb[18].mxu0 %vm285_vm1, %v1621_v58 }
 0x2a2   : > { %v1622_v61 = vpop.trf.xlu0 }
 0x2a3   : > { %5357 = vmatprep.mubr.msk.f32.mxu0 %vm285_vm1, %v1622_v61 }
 0x2a6   : > { %v1623_v13 = vpop.trf.xlu0 }
 0x2a7   : > { %5358 = vmatmul.mubr.msk.f32.gmra.mrb[20].mxu0 %vm285_vm1, %v1623_v13 }
 0x2aa   : > { %v1624_v36 = vpop.trf.xlu0 }
 0x2ab   : > { %5360 = vmatprep.mubr.msk.f32.mxu0 %vm285_vm1, %v1624_v36 }
 0x2ae   : > { %v1625_v54 = vpop.trf.xlu0 }
 0x2af   : > { %5361 = vmatmul.mubr.msk.f32.gmra.mrb[22].mxu0 %vm285_vm1, %v1625_v54 }
 0x2b2   : > { %v1626_v41 = vpop.trf.xlu0 }
 0x2b3   : > { %5363 = vmatprep.mubr.msk.f32.mxu0 %vm285_vm1, %v1626_v41 }
 0x2b6   : > { %v1627_v49 = vpop.trf.xlu0 }
 0x2b7   : > { %5364 = vmatmul.mubr.msk.f32.gmra.mrb[24].mxu0 %vm285_vm1, %v1627_v49 }
 0x2ba   : > { %v1628_v56 = vpop.trf.xlu0 }
 0x2bb   : > { %5366 = vmatprep.mubr.msk.f32.mxu0 %vm285_vm1, %v1628_v56 }
 0x2be   : > { %v1629_v58 = vpop.trf.xlu0 }
 0x2bf   : > { %5367 = vmatmul.mubr.msk.f32.gmra.mrb[26].mxu0 %vm285_vm1, %v1629_v58 }
 0x2c2   : > { %v1630_v61 = vpop.trf.xlu0 }
 0x2c3   : > { %5369 = vmatprep.mubr.msk.f32.mxu0 %vm285_vm1, %v1630_v61 }
 0x2c6   : > { %v1631_v13 = vpop.trf.xlu0 }
 0x2c7   : > { %5370 = vmatmul.mubr.msk.f32.gmra.mrb[28].mxu0 %vm285_vm1, %v1631_v13 }
 0x34d   : > { %v2537_v36 = vpop.f32.mrb[28].mxu1 }
 0x34e   : > { %v2539_v54 = vpop.f32.mrb[29].mxu1  ;;  %v2538_v12 = vadd.f32 %v2537_v36, %v2398_v19 }
 0x34f   : > { %v2541_v21 = vpop.f32.mrb[30].mxu1  ;;  %v2540_v29 = vadd.f32 %v2539_v54, %v2398_v19 }
 0x350   : > { %v2542_v41 = vadd.f32 %v2541_v21, %v2403_v24  ;;  %v2543_v45 = vpop.f32.mrb[31].mxu1  ;;  %v2418_v21 = vpop.permute.xlu1 %2417 }
 0x351   : > { %v2544_v49 = vadd.f32 %v2543_v45, %v2403_v24 }
 0x352   : > { %v2596_v6 = vpack.c.bf16 %v2542_v41, %v2538_v12 }
 0x353   : > { %v2597_v27 = vpack.c.bf16 %v2544_v49, %v2540_v29  ;;  %v5860_v49 = vld [vmem:[%s6023_s13] sm:$0x7] }
 0x354   : > { %5372 = vmatprep.subr.bf16.mxu0 %v2596_v6 }
 0x355   : > { %v2547_v56 = vpop.f32.mrb[32].mxu1  ;;  %5373 = vmatpush3.bf16.msra.mxu0 %v2596_v6  ;;  %5412 = vmatprep.subr.bf16.mxu1 %v2597_v27 }
 0x356   : > { %v2549_v58 = vpop.f32.mrb[33].mxu1  ;;  %5413 = vmatpush3.bf16.msra.mxu1 %v2597_v27  ;;  %v2548_v8 = vadd.f32 %v2547_v56, %v2408_v35  ;;  %v1116_v56 = vmul.f32 %v5860_v49, %v5860_v49 }
 0x357   : > { %v2551_v61 = vpop.f32.mrb[34].mxu1  ;;  %v2550_v37 = vadd.f32 %v2549_v58, %v2408_v35 }
 0x358   : > { %v2552_v0 = vadd.f32 %v2551_v61, %v2413_v50  ;;  %v2553_v13 = vpop.f32.mrb[35].mxu1 }
 0x359   : > { %v2554_v17 = vadd.f32 %v2553_v13, %v2413_v50 }
 0x35a   : > { %v2598_v34 = vpack.c.bf16 %v2552_v0, %v2548_v8 }
 0x35b   : > { %v2599_v36 = vpack.c.bf16 %v2554_v17, %v2550_v37 }
 0x35c   : > { %5374 = vmatprep.subr.bf16.mxu0 %v2598_v34 }
 0x35d   : > { %v2557_v19 = vpop.f32.mrb[36].mxu1  ;;  %5375 = vmatpush3.bf16.msra.mxu0 %v2598_v34  ;;  %5414 = vmatprep.subr.bf16.mxu1 %v2599_v36 }
 0x35e   : > { %v2559_v29 = vpop.f32.mrb[37].mxu1  ;;  %5415 = vmatpush3.bf16.msra.mxu1 %v2599_v36  ;;  %v2558_v6 = vadd.f32 %v2557_v19, %v2418_v21  ;;  %v1117_v36 = vsel %vm246_vm0, %v1116_v56, 0.0  ;;  %v5861_v19 = vld [vmem:[%s6023_s13 + $0x4] sm:$0x7] }
 0x35f   : > { %v2561_v12 = vpop.f32.mrb[38].mxu1  ;;  %v2560_v24 = vadd.f32 %v2559_v29, %v2418_v21  ;;  %v6369_v21 = vpop.trf.xlu1  ;;  %v1828_v29 = vmul.f32 %v5861_v19, %v5861_v19 }
 0x360   : > { %v2562_v27 = vadd.f32 %v2561_v12, %v6339_v63  ;;  %v2563_v45 = vpop.f32.mrb[39].mxu1  ;;  %v1118_v12 = vrot.slane %v1117_v36, 4 }
 0x361   : > { %v2564_v54 = vadd.f32 %v2563_v45, %v6339_v63 }
 0x362   : > { %v2600_v35 = vpack.c.bf16 %v2562_v27, %v2558_v6  ;;  %v1829_v6 = vsel %vm246_vm0, %v1828_v29, 0.0  ;;  %v1119_v27 = vadd.f32 %v1118_v12, %v1117_v36 }
 0x363   : > { %v2601_v50 = vpack.c.bf16 %v2564_v54, %v2560_v24  ;;  %v507_v45 = vpop.trf.xlu1  ;;  %v1830_v24 = vrot.slane %v1829_v6, 4 }
 0x364   : > { %2608 = vxpose.xlu0.c.b16.start [1/2] (short) %v2600_v35, 128  ;;  %v1120_v54 = vrot.slane %v1119_v27, 2 }
 0x365   : > { %v2567_v0 = vpop.f32.mrb[40].mxu1  ;;  %2941 = vxpose.xlu1.c.b16.start [1/2] (short) %v2601_v50, 128 }
 0x366   : > { %v2569_v8 = vpop.f32.mrb[41].mxu1  ;;  %v2568_v34 = vadd.f32 %v2567_v0, %v6341_v14  ;;  %v1121_v50 = vadd.f32 %v1120_v54, %v1119_v27  ;;  %v8398_v0 = vmov 0  }
 0x367   : > { %v2571_v17 = vpop.f32.mrb[42].mxu1  ;;  %v2570_v58 = vadd.f32 %v2569_v8, %v6341_v14  ;;  %v5606_v14 = vld [vmem:[%s8319_s3 + $0x30] sm:$0xff]   ;;  %v508_v35 = vpop.trf.xlu1 }
 0x368   : > { %v2572_v37 = vadd.f32 %v2571_v17, %v6343_v16  ;;  %v2573_v41 = vpop.f32.mrb[43].mxu1  ;;  %5082 = vmatmul.mubr.msk.bf16.gmra.mrb[44].mxu1 %vm2299_vm2, %v5606_v14  ;;  %v1122_v17 = vrot.slane %v1121_v50, 1 }
 0x369   : > { %v2574_v61 = vadd.f32 %v2573_v41, %v6343_v16  ;;  %v1831_v16 = vadd.f32 %v1830_v24, %v1829_v6  ;;  %2585 = vmatprep.mubr.bf16.mxu1 %v8398_v0 }
 0x36a   : > { %v2602_v63 = vpack.c.bf16 %v2572_v37, %v2568_v34  ;;  %v5607_v37 = vld [vmem:[%s8319_s3 + $0x38] sm:$0xff]   ;;  %v6382_v49 = vadd.f32 %v1122_v17, %v1121_v50 }
 0x36b   : > { %v2603_v13 = vpack.c.bf16 %v2574_v61, %v2570_v58  ;;  %v1832_v8 = vrot.slane %v1831_v16, 2  ;;  %v509_v34 = vpop.trf.xlu1 }
 0x36c   : > { %2609 = vxpose.xlu0.c.b16.end [2/2] (short) %v2602_v63, 128 }
 0x36d   : > { %2942 = vxpose.xlu1.c.b16.end [2/2] (short) %v2603_v13, 128  ;;  %v1833_v41 = vadd.f32 %v1832_v8, %v1831_v16 }
 0x36f   : > { %v1834_v56 = vrot.slane %v1833_v41, 1  ;;  %v510_v58 = vpop.trf.xlu1 }
 0x370   : > { %5083 = vmatmul.mubr.msk.bf16.gmra.mrb[48].mxu1 %vm2299_vm2, %v5607_v37 }
 0x371   : > { %v6385_v61 = vadd.f32 %v1834_v56, %v1833_v41 }
 0x373   : > { %8399 = vst [vmem:[#allocation14_spill] sm:$0xff] %v6385_v61  ;;  %v511_v63 = vpop.trf.xlu1 }
 0x377   : > { %v512_v13 = vpop.trf.xlu1 }
 0x37b   : > { %v513_v36 = vpop.trf.xlu1 }
 0x37f   : > { %v6388_v19 = vpop.trf.xlu1 }
 0x383   : > { %v6390_v29 = vpop.trf.xlu1 }
 0x387   : > { %v6392_v12 = vpop.trf.xlu1 }
 0x388   : > { %1124 = vxpose.xlu0.b32.start.end [1/1] (short) %v6382_v49, 128 }
 0x38b   : > { %v6394_v6 = vpop.trf.xlu1 }
 0x38f   : > { %1836 = vxpose.xlu1.b32.start.end [1/1] (short) %v6385_v61, 128  ;;  %v6396_v27 = vpop.trf.xlu1 }
 0x393   : > { %v6398_v24 = vpop.trf.xlu1 }
 0x397   : > { %v6400_v54 = vpop.trf.xlu1 }
 0x39b   : > { %v6402_v14 = vpop.trf.xlu1 }
 0x3ce   : > { %v2616_v16 = vpop.trf.xlu0 }
 0x3cf   : > { %5376 = vmatprep.mubr.msk.bf16.mxu0 %vm2299_vm2, %v2616_v16  ;;  %v2949_v50 = vpop.trf.xlu1 }
 0x3d0   : > { %5416 = vmatprep.mubr.msk.bf16.mxu1 %vm2299_vm2, %v2949_v50 }
 0x3d2   : > { %v2617_v8 = vpop.trf.xlu0 }
 0x3d3   : > { %5377 = vmatmul.mubr.msk.bf16.vlgmr.msra.gmra.mrb[32].mxu0 %vm2299_vm2, %v2617_v8  ;;  %v2950_v17 = vpop.trf.xlu1 }
 0x3d4   : > { %5417 = vmatmul.mubr.msk.bf16.vlgmr.msra.gmra.mrb[52].mxu1 %vm2299_vm2, %v2950_v17 }
 0x3d6   : > { %v2618_v37 = vpop.trf.xlu0 }
 0x3d7   : > { %5380 = vmatprep.mubr.msk.bf16.mxu0 %vm2299_vm2, %v2618_v37  ;;  %v2951_v41 = vpop.trf.xlu1 }
 0x3d8   : > { %5420 = vmatprep.mubr.msk.bf16.mxu1 %vm2299_vm2, %v2951_v41 }
 0x3da   : > { %v2619_v56 = vpop.trf.xlu0 }
 0x3db   : > { %5381 = vmatmul.mubr.msk.bf16.gmra.mrb[36].mxu0 %vm2299_vm2, %v2619_v56  ;;  %v2952_v33 = vpop.trf.xlu1 }
 0x3dc   : > { %5421 = vmatmul.mubr.msk.bf16.gmra.mrb[56].mxu1 %vm2299_vm2, %v2952_v33 }
 0x3de   : > { %v2620_v16 = vpop.trf.xlu0 }
 0x3df   : > { %5384 = vmatprep.mubr.msk.bf16.mxu0 %vm2299_vm2, %v2620_v16  ;;  %v2953_v50 = vpop.trf.xlu1  ;;  %v6422_v16 = vpop.f32.mrb[14].mxu0 }
 0x3e0   : > { %5424 = vmatprep.mubr.msk.bf16.mxu1 %vm2299_vm2, %v2953_v50  ;;  %v6424_v50 = vpop.f32.mrb[15].mxu0 }
 0x3e2   : > { %v2621_v8 = vpop.trf.xlu0 }
 0x3e3   : > { %5385 = vmatmul.mubr.msk.bf16.gmra.mrb[40].mxu0 %vm2299_vm2, %v2621_v8  ;;  %v2954_v17 = vpop.trf.xlu1  ;;  %v6426_v8 = vpop.f32.mrb[16].mxu0 }
 0x3e4   : > { %5425 = vmatmul.mubr.msk.bf16.gmra.mrb[60].mxu1 %vm2299_vm2, %v2954_v17 }
 0x3e6   : > { %v2622_v37 = vpop.trf.xlu0 }
 0x3e7   : > { %5388 = vmatprep.mubr.msk.bf16.mxu0 %vm2299_vm2, %v2622_v37  ;;  %v2955_v41 = vpop.trf.xlu1  ;;  %v6428_v37 = vpop.f32.mrb[17].mxu0 }
 0x3e8   : > { %5428 = vmatprep.mubr.msk.bf16.mxu1 %vm2299_vm2, %v2955_v41 }
 0x3e9   : > { %529 = vperm.xlu1 %5599, %v507_v45  }
 0x3ea   : > { %v2623_v33 = vpop.trf.xlu0 }
 0x3eb   : > { %5389 = vmatmul.mubr.msk.bf16.gmra.mrb[44].mxu0 %vm2299_vm2, %v2623_v33  ;;  %v2956_v56 = vpop.trf.xlu1 }
 0x3ec   : > { %5429 = vmatmul.mubr.msk.bf16.gmra.mrb[64].mxu1 %vm2299_vm2, %v2956_v56 }
 0x3ed   : > { %524 = vperm.xlu0 %5598, %v6369_v21   ;;  %3354 = vmatprep.mubr.bf16.mxu1 %v8398_v0 }
 0x3f1   : > { %534 = vperm.xlu0 %5598, %v508_v35  }
 0x3f5   : > { %539 = vperm.xlu0 %5598, %v509_v34   ;;  %v6430_v34 = vpop.f32.mrb[18].mxu0 }
 0x3f9   : > { %544 = vperm.xlu0 %5598, %v510_v58  }
 0x3fd   : > { %549 = vperm.xlu0 %5598, %v511_v63   ;;  %v6432_v63 = vpop.f32.mrb[19].mxu0 }
 0x3fe   : > { %v6434_v56 = vpop.f32.mrb[20].mxu0 }
 0x3ff   : > { %8400 = vst [vmem:[#allocation15_spill] sm:$0xff] %v6434_v56  ;;  %v6436_v5 = vpop.f32.mrb[21].mxu0 }
 0x401   : > { %554 = vperm.xlu0 %5598, %v512_v13  }
 0x405   : > { %559 = vperm.xlu0 %5598, %v513_v36  }
 0x408   : > { %v1140_v45 = vpop.trf.xlu0 }
 0x409   : > { %1158 = vperm.xlu0 %5598, %v1140_v45  }
 0x40c   : > { %v1141_v17 = vpop.trf.xlu0 }
 0x40d   : > { %1163 = vperm.xlu1 %5599, %v1141_v17  }
 0x40f   : > { %v1852_v21 = vpop.trf.xlu1 }
 0x410   : > { %v1142_v41 = vpop.trf.xlu0 }
 0x411   : > { %1168 = vperm.xlu0 %5598, %v1142_v41   ;;  %v6438_v41 = vpop.f32.mrb[22].mxu0 }
 0x412   : > { %v6440_v25 = vpop.f32.mrb[23].mxu0 }
 0x413   : > { %v1853_v35 = vpop.trf.xlu1  ;;  %8401 = vst [vmem:[#allocation16_spill] sm:$0xff] %v6440_v25 }
 0x414   : > { %v1143_v58 = vpop.trf.xlu0 }
 0x415   : > { %1173 = vperm.xlu1 %5599, %v1143_v58   ;;  %v6443_v58 = vpop.f32.mrb[24].mxu0 }
 0x416   : > { %8402 = vst [vmem:[#allocation17_spill] sm:$0xff] %v6443_v58  ;;  %v6445_v0 = vpop.f32.mrb[25].mxu0 }
 0x417   : > { %v1854_v13 = vpop.trf.xlu1  ;;  %8403 = vst [vmem:[#allocation18_spill] sm:$0xff] %v6445_v0  ;;  %v6447_v56 = vpop.f32.mrb[26].mxu0 }
 0x418   : > { %v1144_v36 = vpop.trf.xlu0  ;;  %8404 = vst [vmem:[#allocation19_spill] sm:$0xff] %v6447_v56 }
 0x419   : > { %1178 = vperm.xlu0 %5598, %v1144_v36  }
 0x41b   : > { %v1855_v33 = vpop.trf.xlu1 }
 0x41c   : > { %v1145_v45 = vpop.trf.xlu0 }
 0x41d   : > { %1183 = vperm.xlu1 %5599, %v1145_v45   ;;  %v6451_v45 = vpop.f32.mrb[27].mxu0 }
 0x41f   : > { %v1856_v57 = vpop.trf.xlu1 }
 0x420   : > { %v1146_v17 = vpop.trf.xlu0 }
 0x421   : > { %1188 = vperm.xlu0 %5598, %v1146_v17   ;;  %v6453_v17 = vpop.f32.mrb[28].mxu0 }
 0x422   : > { %v6455_v25 = vpop.f32.mrb[29].mxu0 }
 0x423   : > { %v1857_v36 = vpop.trf.xlu1  ;;  %8405 = vst [vmem:[#allocation20_spill] sm:$0xff] %v6455_v25 }
 0x424   : > { %v1147_v59 = vpop.trf.xlu0 }
 0x425   : > { %564 = vperm.xlu0 %5598, %v6388_v19   ;;  %1193 = vperm.xlu1 %5599, %v1147_v59  }
 0x427   : > { %v1858_v59 = vpop.trf.xlu1 }
 0x428   : > { %v1148_v61 = vpop.trf.xlu0 }
 0x429   : > { %574 = vperm.xlu0 %5598, %v6392_v12   ;;  %569 = vperm.xlu1 %5599, %v6390_v29  }
 0x42b   : > { %v1859_v0 = vpop.trf.xlu1 }
 0x42c   : > { %v1149_v19 = vpop.trf.xlu0 }
 0x42d   : > { %579 = vperm.xlu1 %5599, %v6394_v6   ;;  %1198 = vperm.xlu0 %5598, %v1148_v61  }
 0x42f   : > { %v1860_v12 = vpop.trf.xlu1 }
 0x430   : > { %v1150_v58 = vpop.trf.xlu0 }
 0x431   : > { %1203 = vperm.xlu1 %5599, %v1149_v19   ;;  %1208 = vperm.xlu0 %5598, %v1150_v58  }
 0x433   : > { %v1861_v6 = vpop.trf.xlu1 }
 0x434   : > { %v1151_v56 = vpop.trf.xlu0 }
 0x435   : > { %584 = vperm.xlu0 %5598, %v6396_v27   ;;  %1213 = vperm.xlu1 %5599, %v1151_v56  }
 0x437   : > { %v1862_v19 = vpop.trf.xlu1 }
 0x438   : > { %v1152_v29 = vpop.trf.xlu0 }
 0x439   : > { %594 = vperm.xlu0 %5598, %v6400_v54   ;;  %589 = vperm.xlu1 %5599, %v6398_v24  }
 0x43b   : > { %v1863_v27 = vpop.trf.xlu1 }
 0x43c   : > { %v1153_v25 = vpop.trf.xlu0 }
 0x43d   : > { %599 = vperm.xlu1 %5599, %v6402_v14   ;;  %1218 = vperm.xlu0 %5598, %v1152_v29  }
 0x43f   : > { %v1864_v54 = vpop.trf.xlu1 }
 0x440   : > { %v1154_v61 = vpop.trf.xlu0 }
 0x441   : > { %1223 = vperm.xlu1 %5599, %v1153_v25   ;;  %1228 = vperm.xlu0 %5598, %v1154_v61   ;;  %v3285_v61 = vld [vmem:[%s8320_s4 + $0x98] sm:$0xff] }
 0x443   : > { %v1865_v24 = vpop.trf.xlu1 }
 0x444   : > { %v1155_v58 = vpop.trf.xlu0 }
 0x445   : > { %1870 = vperm.xlu0 %5598, %v1852_v21   ;;  %1233 = vperm.xlu1 %5599, %v1155_v58   ;;  %v2391_v21 = vld [vmem:[%s8320_s4 + $0x60] sm:$0xff] }
 0x447   : > { %v1866_v14 = vpop.trf.xlu1 }
 0x449   : > { %1880 = vperm.xlu0 %5598, %v1854_v13   ;;  %1875 = vperm.xlu1 %5599, %v1853_v35   ;;  %v3282_v35 = vld [vmem:[%s8320_s4 + $0x80] sm:$0xff]  ;;  %v2394_v13 = vld [vmem:[%s8320_s4 + $0x78] sm:$0xff] }
 0x44b   : > { %v1867_v25 = vpop.trf.xlu1 }
 0x44d   : > { %1890 = vperm.xlu0 %5598, %v1856_v57   ;;  %1885 = vperm.xlu1 %5599, %v1855_v33   ;;  %v2393_v57 = vld [vmem:[%s8320_s4 + $0x70] sm:$0xff]  ;;  %v6477_v33 = vpop.f32.mrb[44].mxu1 }
 0x44e   : > { %8406 = vst [vmem:[#allocation21_spill] sm:$0xff] %v6477_v33 }
 0x451   : > { %1900 = vperm.xlu0 %5598, %v1858_v59   ;;  %1895 = vperm.xlu1 %5599, %v1857_v36   ;;  %v3284_v36 = vld [vmem:[%s8320_s4 + $0x90] sm:$0xff]  ;;  %v3283_v59 = vld [vmem:[%s8320_s4 + $0x88] sm:$0xff] }
 0x455   : > { %1910 = vperm.xlu0 %5598, %v1860_v12   ;;  %1905 = vperm.xlu1 %5599, %v1859_v0   ;;  %v2392_v0 = vld [vmem:[%s8320_s4 + $0x68] sm:$0xff] }
 0x459   : > { %1920 = vperm.xlu0 %5598, %v1862_v19   ;;  %1915 = vperm.xlu1 %5599, %v1861_v6   ;;  %v3391_v6 = vld [vmem:[%s8320_s4 + $0xa0] sm:$0xff] }
 0x45d   : > { %1930 = vperm.xlu0 %5598, %v1864_v54   ;;  %1925 = vperm.xlu1 %5599, %v1863_v27   ;;  %v619_v27 = vmul.f32 2.0, %v6189_v9 }
 0x461   : > { %1940 = vperm.xlu0 %5598, %v1866_v14   ;;  %1935 = vperm.xlu1 %5599, %v1865_v24   ;;  %v6494_v24 = vpop.f32.mrb[45].mxu1  ;;  %v3393_v14 = vld [vmem:[%s8320_s4 + $0xb0] sm:$0xff] }
 0x462   : > { %8407 = vst [vmem:[#allocation22_spill] sm:$0xff] %v6494_v24 }
 0x465   : > { %2437 = vperm.xlu0 %5598, %v2391_v21   ;;  %1945 = vperm.xlu1 %5599, %v1867_v25   ;;  %v3392_v25 = vld [vmem:[%s8320_s4 + $0xa8] sm:$0xff]  ;;  %v618_v21 = vmul.f32 2.0, %v6192_v2  ;;  %v3394_v2 = vld [vmem:[%s8320_s4 + $0xb8] sm:$0xff] }
 0x468   : > { %v530_v29 = vpop.permute.xlu1 %529 }
 0x469   : > { %2447 = vperm.xlu0 %5598, %v2393_v57   ;;  %2442 = vperm.xlu1 %5599, %v2392_v0   ;;  %v603_v58 = vadd.f32 %v530_v29, %v6252_v47  ;;  %v3500_v29 = vld [vmem:[%s8320_s4 + $0xc0] sm:$0xff] }
 0x46b   : > { %v635_v57 = vsub.f32 %v603_v58, %v619_v27  ;;  %v622_v58 = vmul.f32 2.0, %v6203_v42  ;;  %v624_v27 = vmul.f32 2.0, %v6212_v20  ;;  %v6536_v42 = vmul.f32 2.0, %v6226_v30 }
 0x46c   : > { %v525_v56 = vpop.permute.xlu0 %524 }
 0x46d   : > { %3288 = vperm.xlu0 %5598, %v3282_v35   ;;  %2452 = vperm.xlu1 %5599, %v2394_v13   ;;  %v602_v54 = vadd.f32 %v525_v56, %v6252_v47  ;;  %v6504_v35 = vpop.f32.mrb[46].mxu1  ;;  %v620_v13 = vmul.f32 2.0, %v6197_v31 }
 0x46e   : > { %8408 = vst [vmem:[#allocation23_spill] sm:$0xff] %v6504_v35 }
 0x46f   : > { %v634_v56 = vsub.f32 %v602_v54, %v618_v21 }
 0x470   : > { %v535_v12 = vpop.permute.xlu0 %534 }
 0x471   : > { %3298 = vperm.xlu0 %5598, %v3284_v36   ;;  %3293 = vperm.xlu1 %5599, %v3283_v59   ;;  %v604_v0 = vadd.f32 %v535_v12, %v6252_v47  ;;  %v621_v12 = vmul.f32 2.0, %v6194_v15  ;;  %v6529_v21 = vmax.f32 %v634_v56, 0.0  ;;  %v6563_v56 = vmul.f32 2.0, %v6234_v28 }
 0x472   : > { %v6579_v28 = vmul.f32 2.0, %v6254_v11  ;;  %v6597_v11 = vmul.f32 2.0, %v6261_v44 }
 0x473   : > { %v636_v31 = vsub.f32 %v604_v0, %v620_v13  ;;  %v3501_v0 = vld [vmem:[%s8320_s4 + $0xc8] sm:$0xff]  ;;  %v6560_v13 = vmul.f32 2.0, %v6246_v22  ;;  %v6576_v22 = vmul.f32 2.0, %v6250_v40  ;;  %vm668_vm5 = vcmp.eq.f32.partialorder %v6529_v21, inf }
 0x474   : > { %v540_v19 = vpop.permute.xlu0 %539  ;;  %vm670_vm6 = vcmp.eq.f32.partialorder %v6529_v21, 0.0 }
 0x475   : > { %3397 = vperm.xlu0 %5598, %v3391_v6   ;;  %3303 = vperm.xlu1 %5599, %v3285_v61   ;;  %v605_v36 = vadd.f32 %v540_v19, %v6252_v47  ;;  %v6516_v6 = vmax.f32 %v635_v57, 0.0  ;;  %v623_v61 = vmul.f32 2.0, %v6200_v23  ;;  %v6521_v19 = vmul.f32 2.0, %v6206_v60 }
 0x476   : > { %v6533_v23 = vmul.f32 2.0, %v6222_v26  ;;  %v6539_v60 = vmul.f32 2.0, %v6228_v62  ;;  %v6551_v26 = vmul.f32 2.0, %v6232_v18  ;;  %v6554_v30 = vmax.f32 %v636_v31, 0.0 }
 0x477   : > { %v637_v15 = vsub.f32 %v605_v36, %v621_v12  ;;  %5628 = vrsqrt.f32 %v6516_v6  ;;  %v6557_v62 = vmul.f32 2.0, %v6244_v4  ;;  %v6566_v36 = vmul.f32 2.0, %v6236_v10  ;;  %v3503_v12 = vld [vmem:[%s8320_s4 + $0xd8] sm:$0xff] }
 0x478   : > { %v545_v9 = vpop.permute.xlu0 %544  ;;  %5630 = vrsqrt.f32 %v6529_v21  ;;  %v6573_v4 = vmul.f32 2.0, %v6248_v38  ;;  %v6590_v31 = vmul.f32 2.0, %v6256_v1  ;;  %v6593_v38 = vmul.f32 2.0, %v6259_v7 }
 0x479   : > { %3407 = vperm.xlu0 %5598, %v3393_v14   ;;  %3402 = vperm.xlu1 %5599, %v3392_v25   ;;  %v606_v59 = vadd.f32 %v545_v9, %v6252_v47  ;;  %v6524_v14 = vpop.f32.mrb[47].mxu1  ;;  %v6527_v25 = vmul.f32 2.0, %v6217_v39  ;;  %v3502_v39 = vld [vmem:[%s8320_s4 + $0xd0] sm:$0xff]  ;;  %v6548_v9 = vmul.f32 2.0, %v6230_v32  ;;  %v6569_v18 = vmax.f32 %v637_v15, 0.0 }
 0x47a   : > { %8409 = vst [vmem:[#allocation24_spill] sm:$0xff] %v6524_v14  ;;  %5632 = vrsqrt.f32 %v6554_v30  ;;  %v6609_v15 = vmul.f32 2.0, %v6269_v52  ;;  %v3611_v52 = vld [vmem:[%s8320_s4 + $0xf0] sm:$0xff]  ;;  %v8420_v14 = vld [vmem:[#allocation19_spill] sm:$0xff]  ;;  %vm675_vm3 = vcmp.eq.f32.partialorder %v6516_v6, inf  ;;  %vm677_vm4 = vcmp.eq.f32.partialorder %v6516_v6, 0.0 }
 0x47b   : > { %v638_v20 = vsub.f32 %v606_v59, %v622_v58  ;;  %v6603_v58 = vmul.f32 2.0, %v6265_v3  ;;  %5634 = vrsqrt.f32 %v6569_v18  ;;  %v6619_v3 = vmul.f32 2.0, %v6273_v53 }
 0x47c   : > { %v550_v54 = vpop.permute.xlu0 %549  ;;  %v6692_v35 = vmul.f32 2.0, %v8420_v14  ;;  %vm682_vm7 = vcmp.eq.f32.partialorder %v6554_v30, inf  ;;  %vm684_vm8 = vcmp.eq.f32.partialorder %v6554_v30, 0.0  ;;  %vm689_vm9 = vcmp.eq.f32.partialorder %v6569_v18, inf }
 0x47d   : > { %v607_v57 = vadd.f32 %v550_v54, %v6252_v47  ;;  %3506 = vperm.xlu0 %5598, %v3500_v29   ;;  %3412 = vperm.xlu1 %5599, %v3394_v2   ;;  %v6581_v10 = vmax.f32 %v638_v20, 0.0  ;;  %v3609_v2 = vld [vmem:[%s8320_s4 + $0xe0] sm:$0xff]  ;;  %v6606_v54 = vmul.f32 2.0, %v6267_v51  ;;  %v6622_v51 = vmul.f32 2.0, %v6275_v46 }
 0x47e   : > { %v6641_v20 = vmul.f32 2.0, %v6424_v50  ;;  %v3730_v50 = vld [vmem:[%s8320_s4 + $0x120] sm:$0xff]  ;;  %8421 = vst [vmem:[#allocation19_spill] sm:$0xff] %v6692_v35  ;;  %vm691_vm10 = vcmp.eq.f32.partialorder %v6569_v18, 0.0 }
 0x47f   : > { %v639_v59 = vsub.f32 %v607_v57, %v623_v61  ;;  %v6600_v61 = vmul.f32 2.0, %v6263_v48  ;;  %v6616_v48 = vmul.f32 2.0, %v6271_v43  ;;  %5636 = vrsqrt.f32 %v6581_v10 }
 0x480   : > { %v555_v32 = vpop.permute.xlu0 %554  ;;  %v6632_v57 = vmul.f32 2.0, %v6277_v55  ;;  %v6635_v43 = vmul.f32 2.0, %v6422_v16  ;;  %v6650_v55 = vmul.f32 2.0, %v6430_v34  ;;  %vm696_vm11 = vcmp.eq.f32.partialorder %v6581_v10, inf }
 0x481   : > { %v608_v29 = vadd.f32 %v555_v32, %v6252_v47  ;;  %3516 = vperm.xlu0 %5598, %v3502_v39   ;;  %3511 = vperm.xlu1 %5599, %v3501_v0   ;;  %v6612_v7 = vmax.f32 %v639_v59, 0.0  ;;  %v6644_v39 = vmul.f32 2.0, %v6426_v8  ;;  %v6647_v0 = vmul.f32 2.0, %v6428_v37  ;;  %v5629_v59 = vpop.eup %5628  ;;  %v8410_v37 = vld [vmem:[#allocation15_spill] sm:$0xff] }
 0x482   : > { %v6658_v8 = vmul.f32 2.0, %v6432_v63  ;;  %vm698_vm12 = vcmp.eq.f32.partialorder %v6581_v10, 0.0 }
 0x483   : > { %v640_v40 = vsub.f32 %v608_v29, %v624_v27  ;;  %v3610_v27 = vld [vmem:[%s8320_s4 + $0xe8] sm:$0xff]  ;;  %5638 = vrsqrt.f32 %v6612_v7  ;;  %v6663_v29 = vpop.f32.mrb[48].mxu1  ;;  %vm703_vm13 = vcmp.eq.f32.partialorder %v6612_v7, inf  ;;  %vm705_vm14 = vcmp.eq.f32.partialorder %v6612_v7, 0.0 }
 0x484   : > { %v560_v1 = vpop.permute.xlu0 %559  ;;  %8411 = vst [vmem:[#allocation15_spill] sm:$0xff] %v6663_v29 }
 0x485   : > { %v609_v44 = vadd.f32 %v560_v1, %v6252_v47  ;;  %3615 = vperm.xlu0 %5598, %v3609_v2   ;;  %3521 = vperm.xlu1 %5599, %v3503_v12   ;;  %v6637_v53 = vmax.f32 %v640_v40, 0.0  ;;  %v3612_v2 = vld [vmem:[%s8320_s4 + $0xf8] sm:$0xff]  ;;  %v6671_v12 = vmul.f32 2.0, %v6436_v5  ;;  %v6674_v40 = vmul.f32 2.0, %v6438_v41  ;;  %v8413_v1 = vld [vmem:[#allocation16_spill] sm:$0xff] }
 0x486   : > { %v6677_v63 = vmul.f32 2.0, %v8413_v1  ;;  %v6695_v1 = vmul.f32 2.0, %v6451_v45  ;;  %v3732_v45 = vld [vmem:[%s8320_s4 + $0x130] sm:$0xff] }
 0x487   : > { %v641_v46 = vsub.f32 %v609_v44, %v6521_v19  ;;  %v6661_v19 = vmul.f32 2.0, %v8410_v37  ;;  %8412 = vst [vmem:[#allocation25_spill] sm:$0xff] %v6674_v40  ;;  %v6679_v44 = vpop.f32.mrb[49].mxu1  ;;  %5640 = vrsqrt.f32 %v6637_v53  ;;  %v8417_v37 = vld [vmem:[#allocation18_spill] sm:$0xff]  ;;  %vm710_vm15 = vcmp.eq.f32.partialorder %v6637_v53, inf }
 0x488   : > { %v1159_v32 = vpop.permute.xlu0 %1158  ;;  %8414 = vst [vmem:[#allocation16_spill] sm:$0xff] %v6679_v44  ;;  %v6687_v29 = vmul.f32 2.0, %v8417_v37  ;;  %v6689_v5 = vpop.f32.mrb[50].mxu1  ;;  %8422 = vst [vmem:[#allocation27_spill] sm:$0xff] %v6695_v1  ;;  %v6698_v44 = vmul.f32 2.0, %v6453_v17  ;;  %v3731_v17 = vld [vmem:[%s8320_s4 + $0x128] sm:$0xff] }
 0x489   : > { %v1236_v16 = vadd.f32 %v1159_v32, %v6382_v49  ;;  %3625 = vperm.xlu0 %5598, %v3611_v52   ;;  %3620 = vperm.xlu1 %5599, %v3610_v27   ;;  %v6665_v34 = vmax.f32 %v641_v46, 0.0  ;;  %v5631_v52 = vpop.eup %5630  ;;  %v8415_v46 = vld [vmem:[#allocation17_spill] sm:$0xff]  ;;  %8419 = vst [vmem:[#allocation26_spill] sm:$0xff] %v6689_v5  ;;  %vm712_vm0 = vcmp.eq.f32.partialorder %v6637_v53, 0.0 }
 0x48a   : > { %v6684_v32 = vmul.f32 2.0, %v8415_v46  ;;  %8418 = vst [vmem:[#allocation18_spill] sm:$0xff] %v6687_v29  ;;  %8423 = vst [vmem:[#allocation28_spill] sm:$0xff] %v6698_v44  ;;  %v5633_v46 = vpop.eup %5632  ;;  %v667_v14 = vmul.f32 %v5631_v52, %v6529_v21  ;;  %v3733_v44 = vld [vmem:[%s8320_s4 + $0x138] sm:$0xff] }
 0x48b   : > { %v1268_v27 = vsub.f32 %v1236_v16, %v6560_v13  ;;  %v674_v13 = vmul.f32 %v5629_v59, %v6516_v6  ;;  %v6701_v16 = vpop.f32.mrb[51].mxu1  ;;  %5642 = vrsqrt.f32 %v6665_v34  ;;  %v678_v59 = vand.u32 2147483648, %v6516_v6 }
 0x48c   : > { %8416 = vst [vmem:[#allocation17_spill] sm:$0xff] %v6684_v32  ;;  %v1164_v41 = vpop.permute.xlu1 %1163  ;;  %8424 = vst [vmem:[#allocation29_spill] sm:$0xff] %v6701_v16  ;;  %v681_v5 = vmul.f32 %v5633_v46, %v6554_v30  ;;  %v3726_v46 = vld [vmem:[%s8320_s4 + $0x100] sm:$0xff]  ;;  %vm717_vm1 = vcmp.eq.f32.partialorder %v6665_v34, inf }
 0x48d   : > { %v6703_v24 = vmax.f32 %v1268_v27, 0.0  ;;  %v1237_v37 = vadd.f32 %v1164_v41, %v6382_v49  ;;  %3760 = vperm.xlu0 %5598, %v3730_v50   ;;  %3630 = vperm.xlu1 %5599, %v3612_v2   ;;  %v5635_v50 = vpop.eup %5634  ;;  %v671_v27 = vand.u32 2147483648, %v6529_v21  ;;  %v676_v52 = vsel %vm675_vm3, %v6516_v6, %v674_v13 }
 0x48e   : > { %v5637_v41 = vpop.eup %5636  ;;  %v669_v13 = vsel %vm668_vm5, %v6529_v21, %v667_v14  ;;  %v6749_v35 = vsel %vm677_vm4, %v678_v59, %v676_v52  ;;  %v683_v14 = vsel %vm682_vm7, %v6554_v30, %v681_v5  ;;  %v3728_v5 = vld [vmem:[%s8320_s4 + $0x110] sm:$0xff]  ;;  %v3727_v59 = vld [vmem:[%s8320_s4 + $0x108] sm:$0xff]  ;;  %v706_v21 = vand.u32 2147483648, %v6612_v7 }
 0x48f   : > { %5644 = vrsqrt.f32 %v6703_v24  ;;  %v1269_v2 = vsub.f32 %v1237_v37, %v6557_v62  ;;  %v685_v37 = vand.u32 2147483648, %v6554_v30  ;;  %v695_v1 = vmul.f32 %v5637_v41, %v6581_v10 }
 0x490   : > { %v1169_v16 = vpop.permute.xlu0 %1168  ;;  %vm719_vm3 = vcmp.eq.f32.partialorder %v6665_v34, 0.0  ;;  %vm1302_vm4 = vcmp.eq.f32.partialorder %v6703_v24, inf  ;;  %vm1304_vm5 = vcmp.eq.f32.partialorder %v6703_v24, 0.0 }
 0x491   : > { %v6728_v33 = vmax.f32 %v1269_v2, 0.0  ;;  %v1238_v62 = vadd.f32 %v1169_v16, %v6382_v49  ;;  %3770 = vperm.xlu0 %5598, %v3732_v45   ;;  %3765 = vperm.xlu1 %5599, %v3731_v17   ;;  %v688_v16 = vmul.f32 %v5635_v50, %v6569_v18  ;;  %v692_v45 = vand.u32 2147483648, %v6569_v18  ;;  %v5639_v17 = vpop.eup %5638 }
 0x492   : > { %v699_v50 = vand.u32 2147483648, %v6581_v10  ;;  %v5641_v29 = vpop.eup %5640  ;;  %v6782_v41 = vsel %vm684_vm8, %v685_v37, %v683_v14  ;;  %v697_v52 = vsel %vm696_vm11, %v6581_v10, %v695_v1  ;;  %v720_v14 = vand.u32 2147483648, %v6665_v34 }
 0x493   : > { %5646 = vrsqrt.f32 %v6728_v33  ;;  %v1270_v2 = vsub.f32 %v1238_v62, %v6576_v22  ;;  %v6763_v22 = vsel %vm670_vm6, %v671_v27, %v669_v13  ;;  %v709_v13 = vmul.f32 %v5641_v29, %v6637_v53  ;;  %v3729_v29 = vld [vmem:[%s8320_s4 + $0x118] sm:$0xff] }
 0x494   : > { %v1174_v32 = vpop.permute.xlu1 %1173  ;;  %vm1309_vm6 = vcmp.eq.f32.partialorder %v6728_v33, inf  ;;  %vm1311_vm7 = vcmp.eq.f32.partialorder %v6728_v33, 0.0 }
 0x495   : > { %v6758_v40 = vmax.f32 %v1270_v2, 0.0  ;;  %v1239_v6 = vadd.f32 %v1174_v32, %v6382_v49  ;;  %3740 = vperm.xlu0 %5598, %v3726_v46   ;;  %3775 = vperm.xlu1 %5599, %v3733_v44   ;;  %v690_v32 = vsel %vm689_vm9, %v6569_v18, %v688_v16  ;;  %v702_v44 = vmul.f32 %v5639_v17, %v6612_v7  ;;  %v5643_v62 = vpop.eup %5642 }
 0x496   : > { %v713_v16 = vand.u32 2147483648, %v6637_v53  ;;  %v6796_v1 = vsel %vm691_vm10, %v692_v45, %v690_v32  ;;  %v6805_v2 = vsel %vm698_vm12, %v699_v50, %v697_v52  ;;  %v711_v50 = vsel %vm710_vm15, %v6637_v53, %v709_v13 }
 0x497   : > { %5648 = vrsqrt.f32 %v6758_v40  ;;  %v1271_v27 = vsub.f32 %v1239_v6, %v6573_v4  ;;  %8425 = vst [vmem:[#allocation30_spill] sm:$0xff] %v6805_v2  ;;  %v704_v18 = vsel %vm703_vm13, %v6612_v7, %v702_v44  ;;  %v1305_v6 = vand.u32 2147483648, %v6703_v24 }
 0x498   : > { %v1179_v46 = vpop.permute.xlu0 %1178  ;;  %v6827_v52 = vsel %vm705_vm14, %v706_v21, %v704_v18  ;;  %vm1316_vm8 = vcmp.eq.f32.partialorder %v6758_v40, inf  ;;  %v1312_v7 = vand.u32 2147483648, %v6728_v33  ;;  %v6841_v21 = vsel %vm712_vm0, %v713_v16, %v711_v50 }
 0x499   : > { %v5645_v17 = vpop.eup %5644  ;;  %v6791_v4 = vmax.f32 %v1271_v27, 0.0  ;;  %v1240_v30 = vadd.f32 %v1179_v46, %v6382_v49  ;;  %3750 = vperm.xlu0 %5598, %v3728_v5   ;;  %3745 = vperm.xlu1 %5599, %v3727_v59   ;;  %v716_v59 = vmul.f32 %v5643_v62, %v6665_v34  ;;  %8426 = vst [vmem:[#allocation31_spill] sm:$0xff] %v6827_v52  ;;  %8427 = vst [vmem:[#allocation32_spill] sm:$0xff] %v6841_v21 }
 0x49a   : > { %v1301_v37 = vmul.f32 %v5645_v17, %v6703_v24  ;;  %vm1318_vm9 = vcmp.eq.f32.partialorder %v6758_v40, 0.0  ;;  %v1319_v53 = vand.u32 2147483648, %v6758_v40 }
 0x49b   : > { %5650 = vrsqrt.f32 %v6791_v4  ;;  %v1272_v45 = vsub.f32 %v1240_v30, %v6590_v31  ;;  %vm1323_vm10 = vcmp.eq.f32.partialorder %v6791_v4, inf  ;;  %vm1325_vm11 = vcmp.eq.f32.partialorder %v6791_v4, 0.0 }
 0x49c   : > { %v1184_v5 = vpop.permute.xlu1 %1183  ;;  %v1303_v10 = vsel %vm1302_vm4, %v6703_v24, %v1301_v37  ;;  %v3734_v24 = vld [vmem:[%s8320_s4 + $0x140] sm:$0xff]  ;;  %v718_v37 = vsel %vm717_vm1, %v6665_v34, %v716_v59 }
 0x49d   : > { %v5647_v32 = vpop.eup %5646  ;;  %v6822_v44 = vmax.f32 %v1272_v45, 0.0  ;;  %v1241_v31 = vadd.f32 %v1184_v5, %v6382_v49  ;;  %3755 = vperm.xlu1 %5599, %v3729_v29   ;;  %v1306_v27 = vsel %vm1304_vm5, %v1305_v6, %v1303_v10  ;;  %v3735_v6 = vld [vmem:[%s8320_s4 + $0x148] sm:$0xff]  ;;  %v6863_v59 = vsel %vm719_vm3, %v720_v14, %v718_v37 }
 0x49e   : > { %v1412_v46 = vsub.f32 %v6763_v22, %v1306_v27  ;;  %v1308_v13 = vmul.f32 %v5647_v32, %v6728_v33  ;;  %8428 = vst [vmem:[#allocation33_spill] sm:$0xff] %v6863_v59 }
 0x49f   : > { %v1273_v62 = vsub.f32 %v1241_v31, %v6579_v28  ;;  %5652 = vrsqrt.f32 %v6822_v44  ;;  %vm1330_vm12 = vcmp.eq.f32.partialorder %v6822_v44, inf  ;;  %vm1332_vm13 = vcmp.eq.f32.partialorder %v6822_v44, 0.0 }
 0x4a0   : > { %v1189_v17 = vpop.permute.xlu0 %1188  ;;  %v1428_v30 = vmul.f32 %v1412_v46, %v1412_v46  ;;  %v1310_v29 = vsel %vm1309_vm6, %v6728_v33, %v1308_v13  ;;  %v1326_v46 = vand.u32 2147483648, %v6791_v4 }
 0x4a1   : > { %v5649_v18 = vpop.eup %5648  ;;  %v1242_v28 = vadd.f32 %v1189_v17, %v6382_v49  ;;  %3780 = vperm.xlu1 %5599, %v3734_v24   ;;  %v1313_v16 = vsel %vm1311_vm7, %v1312_v7, %v1310_v29  ;;  %v6851_v45 = vmax.f32 %v1273_v62, 0.0  ;;  %v3736_v29 = vld [vmem:[%s8320_s4 + $0x150] sm:$0xff] }
 0x4a2   : > { %v1315_v33 = vmul.f32 %v5649_v18, %v6758_v40  ;;  %v1445_v5 = vmul.f32 0.6944444, %v1428_v30  ;;  %v1413_v10 = vsub.f32 %v6749_v35, %v1313_v16 }
 0x4a3   : > { %v1274_v50 = vsub.f32 %v1242_v28, %v6597_v11  ;;  %5654 = vrsqrt.f32 %v6851_v45  ;;  %vm1337_vm3 = vcmp.eq.f32.partialorder %v6851_v45, inf  ;;  %vm1339_vm4 = vcmp.eq.f32.partialorder %v6851_v45, 0.0 }
 0x4a4   : > { %v1194_v32 = vpop.permute.xlu1 %1193  ;;  %v565_v31 = vpop.permute.xlu0 %564  ;;  %v1317_v27 = vsel %vm1316_vm8, %v6758_v40, %v1315_v33  ;;  %v1461_v24 = vsub.f32 1.0, %v1445_v5  ;;  %v1429_v13 = vmul.f32 %v1413_v10, %v1413_v10 }
 0x4a5   : > { %v5651_v62 = vpop.eup %5650  ;;  %v6869_v11 = vmax.f32 %v1274_v50, 0.0  ;;  %v1243_v7 = vadd.f32 %v1194_v32, %v6382_v49  ;;  %v610_v17 = vadd.f32 %v565_v31, %v6252_v47  ;;  %3785 = vperm.xlu1 %5599, %v3735_v6   ;;  %v1320_v34 = vsel %vm1318_vm9, %v1319_v53, %v1317_v27 }
 0x4a6   : > { %v1414_v14 = vsub.f32 %v6782_v41, %v1320_v34  ;;  %v6877_v30 = vpop.f32.mrb[32].mxu0  ;;  %v1322_v37 = vmul.f32 %v5651_v62, %v6791_v4  ;;  %v1446_v18 = vmul.f32 0.6944444, %v1429_v13  ;;  %v6890_v5 = vmax.f32 %v1461_v24, 0.0  ;;  %v3737_v24 = vld [vmem:[%s8320_s4 + $0x158] sm:$0xff] }
 0x4a7   : > { %5656 = vrsqrt.f32 %v6869_v11  ;;  %v1275_v28 = vsub.f32 %v1243_v7, %v6593_v38  ;;  %v642_v40 = vsub.f32 %v610_v17, %v6533_v23  ;;  %v2682_v53 = vpop.f32.mrb[33].mxu0  ;;  %v6888_v6 = vpop.f32.mrb[52].mxu1  ;;  %vm1344_vm14 = vcmp.eq.f32.partialorder %v6869_v11, inf }
 0x4a8   : > { %8429 = vst [vmem:[#allocation34_spill] sm:$0xff] %v6888_v6  ;;  %v1430_v33 = vmul.f32 %v1414_v14, %v1414_v14  ;;  %8430 = vst [vmem:[#allocation35_spill] sm:$0xff] %v6890_v5  ;;  %v570_v10 = vpop.permute.xlu1 %569  ;;  %v575_v50 = vpop.permute.xlu0 %574  ;;  %v1324_v32 = vsel %vm1323_vm10, %v6791_v4, %v1322_v37  ;;  %v1462_v31 = vsub.f32 1.0, %v1446_v18  ;;  %vm1346_vm15 = vcmp.eq.f32.partialorder %v6869_v11, 0.0 }
 0x4a9   : > { %v6895_v38 = vmax.f32 %v1275_v28, 0.0  ;;  %v6897_v23 = vmax.f32 %v642_v40, 0.0  ;;  %v611_v27 = vadd.f32 %v570_v10, %v6252_v47  ;;  %v612_v13 = vadd.f32 %v575_v50, %v6252_v47  ;;  %3790 = vperm.xlu1 %5599, %v3736_v29   ;;  %v6901_v62 = vpop.f32.mrb[34].mxu0  ;;  %v6907_v7 = vpop.f32.mrb[53].mxu1 }
 0x4aa   : > { %8431 = vst [vmem:[#allocation36_spill] sm:$0xff] %v6907_v7  ;;  %v1447_v17 = vmul.f32 0.6944444, %v1430_v33  ;;  %v1327_v34 = vsel %vm1325_vm11, %v1326_v46, %v1324_v32  ;;  %v6911_v14 = vmax.f32 %v1462_v31, 0.0  ;;  %v2685_v37 = vpop.f32.mrb[35].mxu0  ;;  %v6914_v29 = vpop.f32.mrb[54].mxu1  ;;  %v6925_v33 = vmul.f32 %v2682_v53, %v6890_v5 }
 0x4ab   : > { %8433 = vst [vmem:[#allocation38_spill] sm:$0xff] %v6914_v29  ;;  %v5653_v28 = vpop.eup %5652  ;;  %5658 = vrsqrt.f32 %v6895_v38  ;;  %v643_v40 = vsub.f32 %v611_v27, %v6527_v25  ;;  %v644_v10 = vsub.f32 %v612_v13, %v6539_v60  ;;  %v1415_v50 = vsub.f32 %v6796_v1, %v1327_v34  ;;  %v6921_v4 = vpop.f32.mrb[55].mxu1 }
 0x4ac   : > { %8432 = vst [vmem:[#allocation37_spill] sm:$0xff] %v6911_v14  ;;  %8434 = vst [vmem:[#allocation39_spill] sm:$0xff] %v6921_v4  ;;  %5660 = vrsqrt.f32 %v6897_v23  ;;  %v1463_v46 = vsub.f32 1.0, %v1447_v17  ;;  %v6928_v32 = vmul.f32 %v2685_v37, %v6911_v14  ;;  %v580_v31 = vpop.permute.xlu1 %579  ;;  %v1199_v18 = vpop.permute.xlu0 %1198  ;;  %v1347_v17 = vand.u32 2147483648, %v6869_v11 }
 0x4ad   : > { %8435 = vst [vmem:[#allocation40_spill] sm:$0xff] %v6925_v33  ;;  %v6930_v25 = vmax.f32 %v643_v40, 0.0  ;;  %v6932_v60 = vmax.f32 %v644_v10, 0.0  ;;  %v1431_v27 = vmul.f32 %v1415_v50, %v1415_v50  ;;  %v613_v13 = vadd.f32 %v580_v31, %v6252_v47  ;;  %3795 = vperm.xlu1 %5599, %v3737_v24  }
 0x4ae   : > { %8436 = vst [vmem:[#allocation41_spill] sm:$0xff] %v6928_v32  ;;  %v6936_v34 = vmax.f32 %v1463_v46, 0.0  ;;  %v1244_v53 = vadd.f32 %v1199_v18, %v6382_v49  ;;  %v6940_v37 = vpop.f32.mrb[36].mxu0  ;;  %v1329_v16 = vmul.f32 %v5653_v28, %v6822_v44  ;;  %vm1351_vm0 = vcmp.eq.f32.partialorder %v6895_v38, inf  ;;  %v6950_v46 = vpop.eup %5654 }
 0x4af   : > { %5662 = vrsqrt.f32 %v6930_v25  ;;  %v1448_v40 = vmul.f32 0.6944444, %v1431_v27  ;;  %v645_v10 = vsub.f32 %v613_v13, %v6536_v42  ;;  %v6945_v50 = vpop.f32.mrb[37].mxu0  ;;  %v6948_v24 = vpop.f32.mrb[56].mxu1  ;;  %vm1353_vm1 = vcmp.eq.f32.partialorder %v6895_v38, 0.0 }
 0x4b0   : > { %8437 = vst [vmem:[#allocation42_spill] sm:$0xff] %v6936_v34  ;;  %8438 = vst [vmem:[#allocation43_spill] sm:$0xff] %v6948_v24  ;;  %v6954_v18 = vmul.f32 %v6877_v30, %v6936_v34  ;;  %5664 = vrsqrt.f32 %v6932_v60  ;;  %v1276_v28 = vsub.f32 %v1244_v53, %v6603_v58  ;;  %v1204_v31 = vpop.permute.xlu1 %1203  ;;  %v1209_v27 = vpop.permute.xlu0 %1208  ;;  %v1331_v42 = vsel %vm1330_vm12, %v6822_v44, %v1329_v16 }
 0x4b1   : > { %v5657_v13 = vpop.eup %5656  ;;  %v1464_v14 = vsub.f32 1.0, %v1448_v40  ;;  %v6961_v5 = vmax.f32 %v645_v10, 0.0  ;;  %v1245_v24 = vadd.f32 %v1204_v31, %v6382_v49  ;;  %v1246_v4 = vadd.f32 %v1209_v27, %v6382_v49  ;;  %v6966_v30 = vpop.f32.mrb[38].mxu0 }
 0x4b2   : > { %8439 = vst [vmem:[#allocation44_spill] sm:$0xff] %v6954_v18  ;;  %v6968_v34 = vpop.f32.mrb[57].mxu1  ;;  %v2779_v58 = vmax.f32 %v6954_v18, %v6925_v33  ;;  %v6972_v53 = vmax.f32 %v1276_v28, 0.0  ;;  %v1343_v16 = vmul.f32 %v5657_v13, %v6869_v11  ;;  %v8441_v40 = vand.u32 2147483648, %v6822_v44  ;;  %v6979_v31 = vpop.f32.mrb[39].mxu0 }
 0x4b3   : > { %8440 = vst [vmem:[#allocation45_spill] sm:$0xff] %v6968_v34  ;;  %v6981_v27 = vpop.f32.mrb[58].mxu1  ;;  %v6983_v29 = vmax.f32 %v1464_v14, 0.0  ;;  %5666 = vrsqrt.f32 %v6961_v5  ;;  %v1277_v34 = vsub.f32 %v1245_v24, %v6600_v61  ;;  %v1278_v28 = vsub.f32 %v1246_v4, %v6609_v15 }
 0x4b4   : > { %v1334_v10 = vsel %vm1332_vm13, %v8441_v40, %v1331_v42  ;;  %8442 = vst [vmem:[#allocation46_spill] sm:$0xff] %v6981_v27  ;;  %v6988_v18 = vpop.f32.mrb[59].mxu1  ;;  %5668 = vrsqrt.f32 %v6972_v53  ;;  %v1214_v13 = vpop.permute.xlu1 %1213  ;;  %v1345_v44 = vsel %vm1344_vm14, %v6869_v11, %v1343_v16  ;;  %v1354_v14 = vand.u32 2147483648, %v6895_v38 }
 0x4b5   : > { %8443 = vst [vmem:[#allocation47_spill] sm:$0xff] %v6983_v29  ;;  %8444 = vst [vmem:[#allocation48_spill] sm:$0xff] %v6988_v18  ;;  %v585_v33 = vpop.permute.xlu0 %584  ;;  %v1416_v42 = vsub.f32 %v6805_v2, %v1334_v10  ;;  %v5659_v40 = vpop.eup %5658  ;;  %v6998_v61 = vmul.f32 %v6901_v62, %v6983_v29  ;;  %v7000_v15 = vmax.f32 %v1277_v34, 0.0  ;;  %v7002_v4 = vmax.f32 %v1278_v28, 0.0 }
 0x4b6   : > { %v1247_v24 = vadd.f32 %v1214_v13, %v6382_v49  ;;  %v7006_v18 = vpop.eup %5660  ;;  %v614_v16 = vadd.f32 %v585_v33, %v6252_v47  ;;  %v1348_v10 = vsel %vm1346_vm15, %v1347_v17, %v1345_v44  ;;  %v1350_v2 = vmul.f32 %v5659_v40, %v6895_v38  ;;  %v7013_v62 = vpop.f32.mrb[40].mxu0 }
 0x4b7   : > { %8445 = vst [vmem:[#allocation49_spill] sm:$0xff] %v6998_v61  ;;  %v1432_v27 = vmul.f32 %v1416_v42, %v1416_v42  ;;  %v7016_v34 = vmax.f32 %v6998_v61, %v2779_v58  ;;  %5670 = vrsqrt.f32 %v7000_v15  ;;  %v1418_v13 = vsub.f32 %v6841_v21, %v1348_v10  ;;  %v7021_v33 = vpop.f32.mrb[41].mxu0  ;;  %v7023_v11 = vpop.f32.mrb[60].mxu1 }
 0x4b8   : > { %v1279_v28 = vsub.f32 %v1247_v24, %v6606_v54  ;;  %8446 = vst [vmem:[#allocation50_spill] sm:$0xff] %v7023_v11  ;;  %5672 = vrsqrt.f32 %v7002_v4  ;;  %v646_v17 = vsub.f32 %v614_v16, %v6566_v36  ;;  %v590_v42 = vpop.permute.xlu1 %589  ;;  %v1352_v58 = vsel %vm1351_vm0, %v6895_v38, %v1350_v2  ;;  %v7037_v21 = vpop.f32.mrb[42].mxu0 }
 0x4b9   : > { %v1449_v44 = vmul.f32 0.6944444, %v1432_v27  ;;  %v595_v40 = vpop.permute.xlu0 %594  ;;  %v7030_v29 = vpop.eup %5662  ;;  %v2780_v54 = vmax.f32 %v6928_v32, %v7016_v34  ;;  %v1434_v10 = vmul.f32 %v1418_v13, %v1418_v13  ;;  %v615_v11 = vadd.f32 %v590_v42, %v6252_v47 }
 0x4ba   : > { %v7034_v24 = vmax.f32 %v1279_v28, 0.0  ;;  %v5665_v36 = vpop.eup %5664  ;;  %v7039_v27 = vmax.f32 %v646_v17, 0.0  ;;  %v616_v61 = vadd.f32 %v595_v40, %v6252_v47  ;;  %v1355_v2 = vsel %vm1353_vm1, %v1354_v14, %v1352_v58  ;;  %v7044_v7 = vpop.f32.mrb[43].mxu0 }
 0x4bb   : > { %v1465_v16 = vsub.f32 1.0, %v1449_v44  ;;  %v1451_v34 = vmul.f32 0.6944444, %v1434_v10  ;;  %v647_v28 = vsub.f32 %v615_v11, %v6563_v56  ;;  %v1419_v13 = vsub.f32 %v6863_v59, %v1355_v2 }
 0x4bc   : > { %5674 = vrsqrt.f32 %v7034_v24  ;;  %v648_v17 = vsub.f32 %v616_v61, %v6551_v26  ;;  %v1336_v44 = vmul.f32 %v6950_v46, %v6851_v45  ;;  %v600_v38 = vpop.permute.xlu1 %599  ;;  %vm738_vm5 = vcmp.eq.f32.partialorder %v6932_v60, inf }
 0x4bd   : > { %5676 = vrsqrt.f32 %v7039_v27  ;;  %v7050_v42 = vmax.f32 %v1465_v16, 0.0  ;;  %v1219_v14 = vpop.permute.xlu0 %1218  ;;  %v7055_v40 = vpop.eup %5666  ;;  %v1467_v58 = vsub.f32 1.0, %v1451_v34  ;;  %v7057_v32 = vmax.f32 %v647_v28, 0.0 }
 0x4be   : > { %v1435_v10 = vmul.f32 %v1419_v13, %v1419_v13  ;;  %v617_v56 = vadd.f32 %v600_v38, %v6252_v47  ;;  %v7060_v11 = vpop.eup %5668  ;;  %v7066_v26 = vmax.f32 %v648_v17, 0.0  ;;  %v1338_v46 = vsel %vm1337_vm3, %v6851_v45, %v1336_v44  ;;  %v7072_v2 = vpop.f32.mrb[44].mxu0 }
 0x4bf   : > { %8447 = vst [vmem:[#allocation51_spill] sm:$0xff] %v7050_v42  ;;  %v7064_v16 = vmul.f32 %v6945_v50, %v7050_v42  ;;  %v1248_v61 = vadd.f32 %v1219_v14, %v6382_v49  ;;  %v7074_v34 = vpop.f32.mrb[61].mxu1  ;;  %v7076_v28 = vmax.f32 %v1467_v58, 0.0  ;;  %5678 = vrsqrt.f32 %v7057_v32  ;;  %v7083_v17 = vpop.f32.mrb[45].mxu0 }
 0x4c0   : > { %8448 = vst [vmem:[#allocation52_spill] sm:$0xff] %v7074_v34  ;;  %v1452_v47 = vmul.f32 0.6944444, %v1435_v10  ;;  %v8450_v50 = vand.u32 2147483648, %v6851_v45  ;;  %v7085_v38 = vpop.f32.mrb[62].mxu1  ;;  %5680 = vrsqrt.f32 %v7066_v26  ;;  %v649_v14 = vsub.f32 %v617_v56, %v6548_v9  ;;  %v1224_v42 = vpop.permute.xlu1 %1223 }
 0x4c1   : > { %8449 = vst [vmem:[#allocation53_spill] sm:$0xff] %v7076_v28  ;;  %8451 = vst [vmem:[#allocation54_spill] sm:$0xff] %v7085_v38  ;;  %v1280_v58 = vsub.f32 %v1248_v61, %v6619_v3  ;;  %v1229_v34 = vpop.permute.xlu0 %1228  ;;  %v7091_v10 = vpop.eup %5670  ;;  %v7095_v45 = vmul.f32 %v6940_v37, %v7076_v28  ;;  %vm740_vm6 = vcmp.eq.f32.partialorder %v6932_v60, 0.0  ;;  %vm1372_vm7 = vcmp.eq.f32.partialorder %v7002_v4, inf }
 0x4c2   : > { %v1341_v13 = vsel %vm1339_vm4, %v8450_v50, %v1338_v46  ;;  %v1468_v46 = vsub.f32 1.0, %v1452_v47  ;;  %v1249_v50 = vadd.f32 %v1224_v42, %v6382_v49  ;;  %v1250_v38 = vadd.f32 %v1229_v34, %v6382_v49  ;;  %v7099_v59 = vpop.f32.mrb[46].mxu0  ;;  %v5673_v9 = vpop.eup %5672 }
 0x4c3   : > { %v1417_v44 = vsub.f32 %v6827_v52, %v1341_v13  ;;  %8452 = vst [vmem:[#allocation55_spill] sm:$0xff] %v7095_v45  ;;  %v7101_v13 = vpop.f32.mrb[63].mxu1  ;;  %v7103_v3 = vmax.f32 %v649_v14, 0.0  ;;  %v7105_v61 = vmax.f32 %v1280_v58, 0.0  ;;  %v737_v52 = vmul.f32 %v5665_v36, %v6932_v60  ;;  %v7108_v6 = vpop.f32.mrb[47].mxu0 }
 0x4c4   : > { %8453 = vst [vmem:[#allocation56_spill] sm:$0xff] %v7101_v13  ;;  %v2778_v37 = vmax.f32 %v7095_v45, %v2780_v54  ;;  %v7111_v47 = vmax.f32 %v1468_v46, 0.0  ;;  %v1281_v42 = vsub.f32 %v1249_v50, %v6616_v48  ;;  %v1282_v34 = vsub.f32 %v1250_v38, %v6632_v57  ;;  %v7134_v45 = vpop.f32.mrb[64].mxu1 }
 0x4c5   : > { %v1433_v56 = vmul.f32 %v1417_v44, %v1417_v44  ;;  %5682 = vrsqrt.f32 %v7103_v3  ;;  %v1234_v44 = vpop.permute.xlu1 %1233  ;;  %v1871_v14 = vpop.permute.xlu0 %1870  ;;  %vm1374_vm8 = vcmp.eq.f32.partialorder %v7002_v4, 0.0  ;;  %vm724_vm9 = vcmp.eq.f32.partialorder %v6897_v23, inf }
 0x4c6   : > { %8454 = vst [vmem:[#allocation57_spill] sm:$0xff] %v7111_v47  ;;  %v7118_v36 = vpop.eup %5674  ;;  %v2783_v58 = vmax.f32 %v7064_v16, %v2778_v37  ;;  %v7123_v54 = vmul.f32 %v6966_v30, %v7111_v47  ;;  %5684 = vrsqrt.f32 %v7105_v61  ;;  %v7126_v48 = vmax.f32 %v1281_v42, 0.0 }
 0x4c7   : > { %v1450_v28 = vmul.f32 0.6944444, %v1433_v56  ;;  %v7128_v57 = vpop.eup %5676  ;;  %v7130_v46 = vmax.f32 %v1282_v34, 0.0  ;;  %v1251_v50 = vadd.f32 %v1234_v44, %v6382_v49  ;;  %v8456_v56 = vld [vmem:[#allocation14_spill] sm:$0xff]  ;;  %v739_v30 = vsel %vm738_vm5, %v6932_v60, %v737_v52 }
 0x4c8   : > { %8455 = vst [vmem:[#allocation58_spill] sm:$0xff] %v7123_v54  ;;  %v1948_v13 = vadd.f32 %v1871_v14, %v8456_v56  ;;  %8457 = vst [vmem:[#allocation14_spill] sm:$0xff] %v7134_v45  ;;  %v7137_v37 = vmax.f32 %v7123_v54, %v2783_v58  ;;  %5686 = vrsqrt.f32 %v7126_v48  ;;  %v741_v42 = vand.u32 2147483648, %v6932_v60 }
 0x4c9   : > { %v1466_v38 = vsub.f32 1.0, %v1450_v28  ;;  %5688 = vrsqrt.f32 %v7130_v46  ;;  %v1283_v28 = vsub.f32 %v1251_v50, %v6622_v51  ;;  %v1876_v34 = vpop.permute.xlu1 %1875  ;;  %v1881_v44 = vpop.permute.xlu0 %1880  ;;  %vm726_vm10 = vcmp.eq.f32.partialorder %v6897_v23, 0.0 }
 0x4ca   : > { %v1980_v49 = vsub.f32 %v1948_v13, %v6641_v20  ;;  %v7147_v14 = vpop.eup %5678  ;;  %v1949_v58 = vadd.f32 %v1876_v34, %v8456_v56  ;;  %v1950_v45 = vadd.f32 %v1881_v44, %v8456_v56  ;;  %v7153_v52 = vsel %vm740_vm6, %v741_v42, %v739_v30 }
 0x4cb   : > { %v7142_v47 = vmax.f32 %v1466_v38, 0.0  ;;  %8459 = vst [vmem:[#allocation60_spill] sm:$0xff] %v7153_v52  ;;  %v1371_v38 = vmul.f32 %v5673_v9, %v7002_v4  ;;  %v7156_v54 = vpop.eup %5680  ;;  %v7162_v20 = vmax.f32 %v1283_v28, 0.0  ;;  %v7171_v9 = vpop.f32.mrb[65].mxu1  ;;  %v1375_v42 = vand.u32 2147483648, %v7002_v4 }
 0x4cc   : > { %v7164_v13 = vmax.f32 %v1980_v49, 0.0  ;;  %v1981_v50 = vsub.f32 %v1949_v58, %v6635_v43  ;;  %v1982_v60 = vsub.f32 %v1950_v45, %v6647_v0  ;;  %8460 = vst [vmem:[#allocation61_spill] sm:$0xff] %v7171_v9  ;;  %v723_v28 = vmul.f32 %v7006_v18, %v6897_v23  ;;  %v7185_v49 = vpop.f32.mrb[66].mxu1 }
 0x4cd   : > { %8458 = vst [vmem:[#allocation59_spill] sm:$0xff] %v7142_v47  ;;  %v7160_v51 = vmul.f32 %v6979_v31, %v7142_v47  ;;  %v1373_v30 = vsel %vm1372_vm7, %v7002_v4, %v1371_v38  ;;  %5690 = vrsqrt.f32 %v7162_v20  ;;  %v1886_v45 = vpop.permute.xlu1 %1885  ;;  %8461 = vst [vmem:[#allocation62_spill] sm:$0xff] %v7185_v49  ;;  %v727_v18 = vand.u32 2147483648, %v6897_v23  ;;  %v1891_v4 = vpop.permute.xlu0 %1890 }
 0x4ce   : > { %5692 = vrsqrt.f32 %v7164_v13  ;;  %v7180_v43 = vmax.f32 %v1981_v50, 0.0  ;;  %v7182_v0 = vmax.f32 %v1982_v60, 0.0  ;;  %v1376_v44 = vsel %vm1374_vm8, %v1375_v42, %v1373_v30  ;;  %v7192_v38 = vpop.f32.mrb[67].mxu1 }
 0x4cf   : > { %v7187_v34 = vpop.eup %5682  ;;  %v725_v58 = vsel %vm724_vm9, %v6897_v23, %v723_v28  ;;  %8462 = vst [vmem:[#allocation63_spill] sm:$0xff] %v7192_v38  ;;  %v1422_v60 = vsub.f32 %v7153_v52, %v1376_v44  ;;  %v1357_v31 = vmul.f32 %v7060_v11, %v6972_v53  ;;  %vm1358_vm11 = vcmp.eq.f32.partialorder %v6972_v53, inf }
 0x4d0   : > { %v7194_v50 = vpop.eup %5684  ;;  %5694 = vrsqrt.f32 %v7180_v43  ;;  %v7202_v30 = vsel %vm726_vm10, %v727_v18, %v725_v58  ;;  %vm1360_vm12 = vcmp.eq.f32.partialorder %v6972_v53, 0.0  ;;  %v1361_v23 = vand.u32 2147483648, %v6972_v53 }
 0x4d1   : > { %5696 = vrsqrt.f32 %v7182_v0  ;;  %8463 = vst [vmem:[#allocation64_spill] sm:$0xff] %v7202_v30  ;;  %v1438_v28 = vmul.f32 %v1422_v60, %v1422_v60  ;;  %v1359_v47 = vsel %vm1358_vm11, %v6972_v53, %v1357_v31  ;;  %v1951_v44 = vadd.f32 %v1886_v45, %v8456_v56 }
 0x4d2   : > { %v7206_v42 = vpop.eup %5686  ;;  %v1952_v38 = vadd.f32 %v1891_v4, %v8456_v56  ;;  %v1362_v49 = vsel %vm1360_vm12, %v1361_v23, %v1359_v47  ;;  %v744_v58 = vmul.f32 %v7055_v40, %v6961_v5  ;;  %vm745_vm13 = vcmp.eq.f32.partialorder %v6961_v5, inf  ;;  %v1896_v40 = vpop.permute.xlu1 %1895 }
 0x4d3   : > { %v7211_v11 = vpop.eup %5688  ;;  %vm747_vm14 = vcmp.eq.f32.partialorder %v6961_v5, 0.0  ;;  %v1455_v18 = vmul.f32 0.6944444, %v1438_v28  ;;  %v1420_v9 = vsub.f32 %v7202_v30, %v1362_v49  ;;  %v1983_v60 = vsub.f32 %v1951_v44, %v6644_v39  ;;  %v1901_v49 = vpop.permute.xlu0 %1900 }
 0x4d4   : > { %v1984_v53 = vsub.f32 %v1952_v38, %v6658_v8  ;;  %v746_v31 = vsel %vm745_vm13, %v6961_v5, %v744_v58  ;;  %v748_v45 = vand.u32 2147483648, %v6961_v5  ;;  %v1378_v47 = vmul.f32 %v7118_v36, %v7034_v24 }
 0x4d5   : > { %vm1379_vm15 = vcmp.eq.f32.partialorder %v7034_v24, inf  ;;  %v1471_v4 = vsub.f32 1.0, %v1455_v18  ;;  %v1436_v23 = vmul.f32 %v1420_v9, %v1420_v9  ;;  %v7225_v52 = vmax.f32 %v1983_v60, 0.0 }
 0x4d6   : > { %v7227_v28 = vmax.f32 %v1984_v53, 0.0  ;;  %v7233_v8 = vsel %vm747_vm14, %v748_v45, %v746_v31  ;;  %v1380_v38 = vsel %vm1379_vm15, %v7034_v24, %v1378_v47  ;;  %vm1381_vm0 = vcmp.eq.f32.partialorder %v7034_v24, 0.0 }
 0x4d7   : > { %v7229_v39 = vpop.eup %5690  ;;  %8464 = vst [vmem:[#allocation65_spill] sm:$0xff] %v7233_v8  ;;  %v1382_v36 = vand.u32 2147483648, %v7034_v24  ;;  %v7240_v9 = vmax.f32 %v1471_v4, 0.0  ;;  %v1453_v58 = vmul.f32 0.6944444, %v1436_v23  ;;  %5698 = vrsqrt.f32 %v7225_v52  ;;  %v1906_v23 = vpop.permute.xlu1 %1905 }
 0x4d8   : > { %v7238_v44 = vpop.eup %5692  ;;  %v730_v18 = vmul.f32 %v7030_v29, %v6930_v25  ;;  %5700 = vrsqrt.f32 %v7227_v28  ;;  %vm731_vm1 = vcmp.eq.f32.partialorder %v6930_v25, inf  ;;  %vm733_vm3 = vcmp.eq.f32.partialorder %v6930_v25, 0.0 }
 0x4d9   : > { %8465 = vst [vmem:[#allocation66_spill] sm:$0xff] %v7240_v9  ;;  %v1383_v5 = vsel %vm1381_vm0, %v1382_v36, %v1380_v38  ;;  %v7252_v24 = vmul.f32 %v7013_v62, %v7240_v9  ;;  %v1469_v53 = vsub.f32 1.0, %v1453_v58  ;;  %v734_v29 = vand.u32 2147483648, %v6930_v25 }
 0x4da   : > { %v7248_v60 = vpop.eup %5694  ;;  %v1423_v31 = vsub.f32 %v7233_v8, %v1383_v5  ;;  %v732_v45 = vsel %vm731_vm1, %v6930_v25, %v730_v18  ;;  %v1364_v4 = vmul.f32 %v7091_v10, %v7000_v15  ;;  %vm1365_vm4 = vcmp.eq.f32.partialorder %v7000_v15, inf  ;;  %v1911_v5 = vpop.permute.xlu0 %1910 }
 0x4db   : > { %8466 = vst [vmem:[#allocation67_spill] sm:$0xff] %v7252_v24  ;;  %v7256_v47 = vpop.eup %5696  ;;  %vm1367_vm5 = vcmp.eq.f32.partialorder %v7000_v15, 0.0  ;;  %v8467_v62 = vmax.f32 %v7160_v51, %v7137_v37  ;;  %v7267_v36 = vmax.f32 %v1469_v53, 0.0  ;;  %v1368_v18 = vand.u32 2147483648, %v7000_v15 }
 0x4dc   : > { %v1439_v58 = vmul.f32 %v1423_v31, %v1423_v31  ;;  %v7272_v9 = vsel %vm733_vm3, %v734_v29, %v732_v45  ;;  %v1366_v10 = vsel %vm1365_vm4, %v7000_v15, %v1364_v4  ;;  %v1953_v8 = vadd.f32 %v1896_v40, %v8456_v56 }
 0x4dd   : > { %v2782_v38 = vmax.f32 %v7252_v24, %v8467_v62  ;;  %8468 = vst [vmem:[#allocation68_spill] sm:$0xff] %v7267_v36  ;;  %v1954_v30 = vadd.f32 %v1901_v49, %v8456_v56  ;;  %v7279_v37 = vmul.f32 %v7021_v33, %v7267_v36  ;;  %v1369_v62 = vsel %vm1367_vm5, %v1368_v18, %v1366_v10  ;;  %v8501_v36 = vld [vmem:[#allocation32_spill] sm:$0xff] }
 0x4de   : > { %v1456_v53 = vmul.f32 0.6944444, %v1439_v58  ;;  %v1955_v31 = vadd.f32 %v1906_v23, %v8456_v56  ;;  %v1421_v24 = vsub.f32 %v7272_v9, %v1369_v62  ;;  %v1985_v25 = vsub.f32 %v1953_v8, %v6650_v55 }
 0x4df   : > { %v1986_v45 = vsub.f32 %v1954_v30, %v6671_v12  ;;  %v1956_v15 = vadd.f32 %v1911_v5, %v8456_v56  ;;  %v2787_v40 = vmax.f32 %v7279_v37, %v2782_v38  ;;  %v765_v33 = vmul.f32 %v7156_v54, %v7066_v26 }
 0x4e0   : > { %v1472_v29 = vsub.f32 1.0, %v1456_v53  ;;  %v1987_v49 = vsub.f32 %v1955_v31, %v6661_v19  ;;  %v1437_v4 = vmul.f32 %v1421_v24, %v1421_v24  ;;  %v7290_v58 = vmax.f32 %v1985_v25, 0.0 }
 0x4e1   : > { %v7292_v23 = vmax.f32 %v1986_v45, 0.0  ;;  %v1988_v18 = vsub.f32 %v1956_v15, %v6677_v63  ;;  %v7295_v55 = vpop.eup %5698  ;;  %vm766_vm6 = vcmp.eq.f32.partialorder %v7066_v26, inf  ;;  %vm768_vm7 = vcmp.eq.f32.partialorder %v7066_v26, 0.0 }
 0x4e2   : > { %v7297_v12 = vmax.f32 %v1472_v29, 0.0  ;;  %v7299_v30 = vmax.f32 %v1987_v49, 0.0  ;;  %v7303_v19 = vpop.eup %5700  ;;  %v1454_v54 = vmul.f32 0.6944444, %v1437_v4  ;;  %5702 = vrsqrt.f32 %v7290_v58  ;;  %v1921_v4 = vpop.permute.xlu0 %1920 }
 0x4e3   : > { %v7306_v8 = vmax.f32 %v1988_v18, 0.0  ;;  %v767_v24 = vsel %vm766_vm6, %v7066_v26, %v765_v33  ;;  %5704 = vrsqrt.f32 %v7292_v23  ;;  %v769_v38 = vand.u32 2147483648, %v7066_v26 }
 0x4e4   : > { %8469 = vst [vmem:[#allocation69_spill] sm:$0xff] %v7297_v12  ;;  %v7311_v63 = vmul.f32 %v7037_v21, %v7297_v12  ;;  %v1399_v5 = vmul.f32 %v7211_v11, %v7130_v46  ;;  %v1470_v10 = vsub.f32 1.0, %v1454_v54  ;;  %5706 = vrsqrt.f32 %v7299_v30 }
 0x4e5   : > { %vm1400_vm8 = vcmp.eq.f32.partialorder %v7130_v46, inf  ;;  %vm1402_vm9 = vcmp.eq.f32.partialorder %v7130_v46, 0.0  ;;  %5708 = vrsqrt.f32 %v7306_v8  ;;  %v7326_v21 = vsel %vm768_vm7, %v769_v38, %v767_v24 }
 0x4e6   : > { %v7321_v53 = vmax.f32 %v7311_v63, %v2787_v40  ;;  %v1401_v62 = vsel %vm1400_vm8, %v7130_v46, %v1399_v5  ;;  %v7329_v31 = vmax.f32 %v1470_v10, 0.0  ;;  %v1403_v11 = vand.u32 2147483648, %v7130_v46 }
 0x4e7   : > { %v751_v25 = vmul.f32 %v7128_v57, %v7039_v27  ;;  %vm752_vm10 = vcmp.eq.f32.partialorder %v7039_v27, inf  ;;  %vm754_vm11 = vcmp.eq.f32.partialorder %v7039_v27, 0.0  ;;  %v755_v45 = vand.u32 2147483648, %v7039_v27 }
 0x4e8   : > { %8470 = vst [vmem:[#allocation70_spill] sm:$0xff] %v7329_v31  ;;  %v1385_v26 = vmul.f32 %v7194_v50, %v7105_v61  ;;  %vm1386_vm12 = vcmp.eq.f32.partialorder %v7105_v61, inf  ;;  %v7342_v15 = vmul.f32 %v7044_v7, %v7329_v31  ;;  %v1404_v40 = vsel %vm1402_vm9, %v1403_v11, %v1401_v62 }
 0x4e9   : > { %v753_v46 = vsel %vm752_vm10, %v7039_v27, %v751_v25  ;;  %vm1388_vm13 = vcmp.eq.f32.partialorder %v7105_v61, 0.0  ;;  %v1426_v57 = vsub.f32 %v7326_v21, %v1404_v40  ;;  %v1389_v33 = vand.u32 2147483648, %v7105_v61  ;;  %v1916_v27 = vpop.permute.xlu1 %1915 }
 0x4ea   : > { %v7347_v29 = vsel %vm754_vm11, %v755_v45, %v753_v46  ;;  %v1387_v49 = vsel %vm1386_vm12, %v7105_v61, %v1385_v26  ;;  %v2788_v50 = vmax.f32 %v7342_v15, %v7321_v53  ;;  %v772_v7 = vmul.f32 %v7187_v34, %v7103_v3 }
 0x4eb   : > { %vm773_vm14 = vcmp.eq.f32.partialorder %v7103_v3, inf  ;;  %vm775_vm15 = vcmp.eq.f32.partialorder %v7103_v3, 0.0  ;;  %v1442_v18 = vmul.f32 %v1426_v57, %v1426_v57  ;;  %v1390_v54 = vsel %vm1388_vm13, %v1389_v33, %v1387_v49 }
 0x4ec   : > { %v776_v24 = vand.u32 2147483648, %v7103_v3  ;;  %v1406_v38 = vmul.f32 %v7229_v39, %v7162_v20  ;;  %v7360_v61 = vpop.eup %5702  ;;  %v1424_v5 = vsub.f32 %v7347_v29, %v1390_v54  ;;  %v774_v10 = vsel %vm773_vm14, %v7103_v3, %v772_v7 }
 0x4ed   : > { %vm1407_vm0 = vcmp.eq.f32.partialorder %v7162_v20, inf  ;;  %vm1409_vm1 = vcmp.eq.f32.partialorder %v7162_v20, 0.0  ;;  %v7366_v34 = vpop.eup %5704  ;;  %v1459_v53 = vmul.f32 0.6944444, %v1442_v18  ;;  %v1410_v25 = vand.u32 2147483648, %v7162_v20  ;;  %v1931_v18 = vpop.permute.xlu0 %1930 }
 0x4ee   : > { %v7368_v62 = vsel %vm775_vm15, %v776_v24, %v774_v10  ;;  %v1408_v11 = vsel %vm1407_vm0, %v7162_v20, %v1406_v38  ;;  %v7372_v39 = vpop.eup %5706  ;;  %v1440_v45 = vmul.f32 %v1424_v5, %v1424_v5  ;;  %v758_v26 = vmul.f32 %v7147_v14, %v7057_v32  ;;  %v1926_v14 = vpop.permute.xlu1 %1925 }
 0x4ef   : > { %vm759_vm3 = vcmp.eq.f32.partialorder %v7057_v32, inf  ;;  %vm761_vm4 = vcmp.eq.f32.partialorder %v7057_v32, 0.0  ;;  %v7378_v3 = vpop.eup %5708  ;;  %v1475_v40 = vsub.f32 1.0, %v1459_v53  ;;  %v1411_v46 = vsel %vm1409_vm1, %v1410_v25, %v1408_v11 }
 0x4f0   : > { %v762_v57 = vand.u32 2147483648, %v7057_v32  ;;  %v1392_v49 = vmul.f32 %v7206_v42, %v7126_v48  ;;  %v1457_v20 = vmul.f32 0.6944444, %v1440_v45  ;;  %v1427_v33 = vsub.f32 %v7368_v62, %v1411_v46 }
 0x4f1   : > { %v760_v7 = vsel %vm759_vm3, %v7057_v32, %v758_v26  ;;  %vm1393_vm5 = vcmp.eq.f32.partialorder %v7126_v48, inf  ;;  %v7386_v54 = vmax.f32 %v1475_v40, 0.0  ;;  %vm1395_vm6 = vcmp.eq.f32.partialorder %v7126_v48, 0.0 }
 0x4f2   : > { %v7388_v24 = vsel %vm761_vm4, %v762_v57, %v760_v7  ;;  %v1394_v38 = vsel %vm1393_vm5, %v7126_v48, %v1392_v49  ;;  %v1473_v5 = vsub.f32 1.0, %v1457_v20  ;;  %v1443_v10 = vmul.f32 %v1427_v33, %v1427_v33  ;;  %v8473_v57 = vld [vmem:[#allocation25_spill] sm:$0xff]  ;;  %v8474_v20 = vld [vmem:[#allocation18_spill] sm:$0xff] }
 0x4f3   : > { %8471 = vst [vmem:[#allocation71_spill] sm:$0xff] %v7386_v54  ;;  %v1396_v42 = vand.u32 2147483648, %v7126_v48  ;;  %v1957_v53 = vadd.f32 %v1916_v27, %v8456_v56  ;;  %v7396_v32 = vmul.f32 %v7072_v2, %v7386_v54  ;;  %v1958_v11 = vadd.f32 %v1921_v4, %v8456_v56  ;;  %v8475_v2 = vld [vmem:[#allocation17_spill] sm:$0xff] }
 0x4f4   : > { %v1959_v25 = vadd.f32 %v1926_v14, %v8456_v56  ;;  %v1960_v45 = vadd.f32 %v1931_v18, %v8456_v56  ;;  %v7401_v26 = vmax.f32 %v1473_v5, 0.0  ;;  %v1460_v40 = vmul.f32 0.6944444, %v1443_v10  ;;  %v8476_v5 = vld [vmem:[#allocation27_spill] sm:$0xff] }
 0x4f5   : > { %v1397_v46 = vsel %vm1395_vm6, %v1396_v42, %v1394_v38  ;;  %v1989_v49 = vsub.f32 %v1957_v53, %v8473_v57  ;;  %v2790_v48 = vmax.f32 %v7396_v32, %v2788_v50  ;;  %v1990_v33 = vsub.f32 %v1958_v11, %v8474_v20  ;;  %v8477_v11 = vld [vmem:[#allocation20_spill] sm:$0xff]  ;;  %v1936_v20 = vpop.permute.xlu1 %1935 }
 0x4f6   : > { %8472 = vst [vmem:[#allocation72_spill] sm:$0xff] %v7401_v26  ;;  %v1425_v27 = vsub.f32 %v7388_v24, %v1397_v46  ;;  %v1991_v7 = vsub.f32 %v1959_v25, %v8475_v2  ;;  %v7410_v4 = vmul.f32 %v7083_v17, %v7401_v26  ;;  %v1476_v14 = vsub.f32 1.0, %v1460_v40 }
 0x4f7   : > { %v7412_v18 = vmax.f32 %v1989_v49, 0.0  ;;  %v1992_v10 = vsub.f32 %v1960_v45, %v8476_v5  ;;  %v7415_v42 = vmax.f32 %v1990_v33, 0.0  ;;  %v2027_v50 = vmul.f32 %v7256_v47, %v7182_v0 }
 0x4f8   : > { %v1441_v38 = vmul.f32 %v1425_v27, %v1425_v27  ;;  %v7417_v53 = vmax.f32 %v1991_v7, 0.0  ;;  %v7422_v46 = vmul.f32 2.0, %v8477_v11  ;;  %v2786_v25 = vmax.f32 %v7410_v4, %v2790_v48 }
 0x4f9   : > { %v7425_v17 = vmax.f32 %v1476_v14, 0.0  ;;  %5710 = vrsqrt.f32 %v7412_v18  ;;  %v7429_v45 = vmax.f32 %v1992_v10, 0.0  ;;  %vm2028_vm7 = vcmp.eq.f32.partialorder %v7182_v0, inf }
 0x4fa   : > { %v1458_v40 = vmul.f32 0.6944444, %v1441_v38  ;;  %5712 = vrsqrt.f32 %v7415_v42  ;;  %v2029_v47 = vsel %vm2028_vm7, %v7182_v0, %v2027_v50  ;;  %vm2030_vm8 = vcmp.eq.f32.partialorder %v7182_v0, 0.0 }
 0x4fb   : > { %8478 = vst [vmem:[#allocation25_spill] sm:$0xff] %v7425_v17  ;;  %v7434_v57 = vmul.f32 %v7099_v59, %v7425_v17  ;;  %v2031_v49 = vand.u32 2147483648, %v7182_v0  ;;  %5714 = vrsqrt.f32 %v7417_v53  ;;  %v2013_v27 = vmul.f32 %v7238_v44, %v7164_v13 }
 0x4fc   : > { %v1474_v48 = vsub.f32 1.0, %v1458_v40  ;;  %vm2014_vm9 = vcmp.eq.f32.partialorder %v7164_v13, inf  ;;  %vm2016_vm10 = vcmp.eq.f32.partialorder %v7164_v13, 0.0  ;;  %v2017_v59 = vand.u32 2147483648, %v7164_v13 }
 0x4fd   : > { %v2789_v33 = vmax.f32 %v7434_v57, %v2786_v25  ;;  %v2032_v2 = vsel %vm2030_vm8, %v2031_v49, %v2029_v47  ;;  %v2015_v14 = vsel %vm2014_vm9, %v7164_v13, %v2013_v27  ;;  %v2034_v5 = vmul.f32 %v7295_v55, %v7225_v52  ;;  %v1941_v13 = vpop.permute.xlu0 %1940 }
 0x4fe   : > { %v7446_v7 = vmax.f32 %v1474_v48, 0.0  ;;  %v2126_v0 = vsub.f32 %v6782_v41, %v2032_v2  ;;  %v2018_v44 = vsel %vm2016_vm10, %v2017_v59, %v2015_v14  ;;  %vm2035_vm11 = vcmp.eq.f32.partialorder %v7225_v52, inf  ;;  %v1946_v48 = vpop.permute.xlu1 %1945 }
 0x4ff   : > { %vm2037_vm12 = vcmp.eq.f32.partialorder %v7225_v52, 0.0  ;;  %v2038_v10 = vand.u32 2147483648, %v7225_v52  ;;  %v2124_v11 = vsub.f32 %v6763_v22, %v2018_v44  ;;  %v2036_v41 = vsel %vm2035_vm11, %v7225_v52, %v2034_v5  ;;  %v8480_v44 = vld [vmem:[#allocation19_spill] sm:$0xff] }
 0x500   : > { %8479 = vst [vmem:[#allocation18_spill] sm:$0xff] %v7446_v7  ;;  %v7457_v38 = vmul.f32 %v7108_v6, %v7446_v7  ;;  %v2142_v50 = vmul.f32 %v2126_v0, %v2126_v0  ;;  %v2020_v55 = vmul.f32 %v7248_v60, %v7180_v43  ;;  %vm2021_vm13 = vcmp.eq.f32.partialorder %v7180_v43, inf  ;;  %v8499_v7 = vld [vmem:[#allocation67_spill] sm:$0xff] }
 0x501   : > { %v2039_v25 = vsel %vm2037_vm12, %v2038_v10, %v2036_v41  ;;  %vm2023_vm14 = vcmp.eq.f32.partialorder %v7180_v43, 0.0  ;;  %v2140_v49 = vmul.f32 %v2124_v11, %v2124_v11  ;;  %v2024_v52 = vand.u32 2147483648, %v7180_v43 }
 0x502   : > { %v2791_v40 = vmax.f32 %v2789_v33, %v7457_v38  ;;  %v2158_v47 = vmul.f32 0.6944444, %v2142_v50  ;;  %v2127_v6 = vsub.f32 %v6796_v1, %v2039_v25  ;;  %v2022_v22 = vsel %vm2021_vm13, %v7180_v43, %v2020_v55  ;;  %v8482_v43 = vld [vmem:[#allocation28_spill] sm:$0xff] }
 0x503   : > { %v7467_v27 = vpop.eup %5710  ;;  %v1961_v2 = vadd.f32 %v1936_v20, %v8456_v56  ;;  %v1962_v60 = vadd.f32 %v1941_v13, %v8456_v56  ;;  %v2156_v33 = vmul.f32 0.6944444, %v2140_v49  ;;  %v2025_v1 = vsel %vm2023_vm14, %v2024_v52, %v2022_v22 }
 0x504   : > { %v7473_v59 = vpop.eup %5712  ;;  %v2792_v0 = vrot.slane %v2791_v40, 4  ;;  %v2174_v14 = vsub.f32 1.0, %v2158_v47  ;;  %v2143_v5 = vmul.f32 %v2127_v6, %v2127_v6  ;;  %v1963_v11 = vadd.f32 %v1946_v48, %v8456_v56  ;;  %v2438_v48 = vpop.permute.xlu0 %2437 }
 0x505   : > { %v1993_v10 = vsub.f32 %v1961_v2, %v8480_v44  ;;  %v1994_v50 = vsub.f32 %v1962_v60, %v7422_v46  ;;  %v7480_v41 = vpop.eup %5714  ;;  %v2172_v13 = vsub.f32 1.0, %v2156_v33  ;;  %5716 = vrsqrt.f32 %v7429_v45  ;;  %v8483_v46 = vld [vmem:[#allocation34_spill] sm:$0xff]  ;;  %v8489_v44 = vld [vmem:[#allocation21_spill] sm:$0xff] }
 0x506   : > { %v2793_v20 = vmax.f32 %v2791_v40, %v2792_v0  ;;  %v7482_v25 = vmax.f32 %v2174_v14, 0.0  ;;  %v2159_v55 = vmul.f32 0.6944444, %v2143_v5  ;;  %v2125_v47 = vsub.f32 %v6749_v35, %v2025_v1  ;;  %v8486_v35 = vld [vmem:[#allocation36_spill] sm:$0xff] }
 0x507   : > { %v7486_v49 = vmax.f32 %v1993_v10, 0.0  ;;  %v1995_v6 = vsub.f32 %v1963_v11, %v8482_v43  ;;  %v7493_v56 = vmax.f32 %v2172_v13, 0.0  ;;  %v7496_v60 = vmax.f32 %v1994_v50, 0.0  ;;  %v8490_v11 = vld [vmem:[#allocation22_spill] sm:$0xff] }
 0x508   : > { %8481 = vst [vmem:[#allocation17_spill] sm:$0xff] %v7482_v25  ;;  %v2794_v22 = vrot.slane %v2793_v20, 2  ;;  %v7491_v52 = vmul.f32 %v8483_v46, %v7482_v25  ;;  %v2175_v40 = vsub.f32 1.0, %v2159_v55  ;;  %v2141_v2 = vmul.f32 %v2125_v47, %v2125_v47  ;;  %v8491_v47 = vld [vmem:[#allocation38_spill] sm:$0xff] }
 0x509   : > { %8485 = vst [vmem:[#allocation20_spill] sm:$0xff] %v7493_v56  ;;  %5718 = vrsqrt.f32 %v7486_v49  ;;  %v7500_v14 = vmul.f32 %v8486_v35, %v7493_v56  ;;  %v7504_v5 = vmax.f32 %v1995_v6, 0.0  ;;  %v7507_v10 = vadd.f32 %v8489_v44, %v2438_v48  ;;  %v8493_v44 = vld [vmem:[#allocation40_spill] sm:$0xff]  ;;  %v8498_v25 = vld [vmem:[#allocation58_spill] sm:$0xff] }
 0x50a   : > { %8484 = vst [vmem:[#allocation27_spill] sm:$0xff] %v7491_v52  ;;  %v2795_v0 = vmax.f32 %v2793_v20, %v2794_v22  ;;  %v7502_v33 = vmax.f32 %v2175_v40, 0.0  ;;  %v2157_v1 = vmul.f32 0.6944444, %v2141_v2  ;;  %v7510_v13 = vadd.f32 %v8490_v11, %v2438_v48 }
 0x50b   : > { %8487 = vst [vmem:[#allocation19_spill] sm:$0xff] %v7500_v14  ;;  %v2055_v50 = vmul.f32 %v7366_v34, %v7292_v23  ;;  %v3112_v20 = vmax.f32 %v7491_v52, %v7500_v14  ;;  %vm2056_vm15 = vcmp.eq.f32.partialorder %v7292_v23, inf  ;;  %5720 = vrsqrt.f32 %v7496_v60 }
 0x50c   : > { %8488 = vst [vmem:[#allocation28_spill] sm:$0xff] %v7502_v33  ;;  %v2796_v55 = vrot.slane %v2795_v0, 1  ;;  %v7518_v43 = vmul.f32 %v8491_v47, %v7502_v33  ;;  %v2173_v6 = vsub.f32 1.0, %v2157_v1  ;;  %v2059_v46 = vand.u32 2147483648, %v7292_v23 }
 0x50d   : > { %v2057_v22 = vsel %vm2056_vm15, %v7292_v23, %v2055_v50  ;;  %5722 = vrsqrt.f32 %v7504_v5  ;;  %vm2058_vm0 = vcmp.eq.f32.partialorder %v7292_v23, 0.0  ;;  %v2041_v35 = vmul.f32 %v7303_v19, %v7227_v28  ;;  %v8494_v50 = vld [vmem:[#allocation41_spill] sm:$0xff] }
 0x50e   : > { %8492 = vst [vmem:[#allocation34_spill] sm:$0xff] %v7518_v43  ;;  %v2797_v40 = vmax.f32 %v2795_v0, %v2796_v55  ;;  %v7525_v34 = vmax.f32 %v7518_v43, %v3112_v20  ;;  %v7529_v48 = vmax.f32 %v2173_v6, 0.0  ;;  %v2060_v2 = vsel %vm2058_vm0, %v2059_v46, %v2057_v22  ;;  %v8495_v0 = vld [vmem:[#allocation44_spill] sm:$0xff]  ;;  %v8496_v20 = vld [vmem:[#allocation49_spill] sm:$0xff]  ;;  %v8497_v22 = vld [vmem:[#allocation55_spill] sm:$0xff] }
 0x50f   : > { %v2045_v1 = vand.u32 2147483648, %v7227_v28  ;;  %v7538_v56 = vpop.eup %5716  ;;  %vm2042_vm1 = vcmp.eq.f32.partialorder %v7227_v28, inf  ;;  %vm2044_vm3 = vcmp.eq.f32.partialorder %v7227_v28, 0.0  ;;  %v2130_v43 = vsub.f32 %v8501_v36, %v2060_v2 }
 0x510   : > { %v2798_v11 = vsub.f32 %v8493_v44, %v2797_v40  ;;  %v2799_v47 = vsub.f32 %v8494_v50, %v2797_v40  ;;  %v2800_v55 = vsub.f32 %v8495_v0, %v2797_v40  ;;  %v2801_v33 = vsub.f32 %v8496_v20, %v2797_v40 }
 0x511   : > { %v2802_v23 = vsub.f32 %v7064_v16, %v2797_v40  ;;  %v2803_v6 = vsub.f32 %v7160_v51, %v2797_v40  ;;  %v2804_v46 = vsub.f32 %v8497_v22, %v2797_v40  ;;  %v2805_v19 = vsub.f32 %v8498_v25, %v2797_v40 }
 0x512   : > { %v2806_v44 = vsub.f32 %v7279_v37, %v2797_v40  ;;  %v2807_v50 = vsub.f32 %v7342_v15, %v2797_v40  ;;  %v2808_v0 = vsub.f32 %v8499_v7, %v2797_v40  ;;  %v2809_v20 = vsub.f32 %v7311_v63, %v2797_v40  ;;  %v8500_v15 = vld [vmem:[#allocation39_spill] sm:$0xff] }
 0x513   : > { %v7550_v17 = vpop.eup %5718  ;;  %v2810_v16 = vsub.f32 %v7410_v4, %v2797_v40  ;;  %v2811_v51 = vsub.f32 %v7457_v38, %v2797_v40  ;;  %v2812_v25 = vsub.f32 %v7396_v32, %v2797_v40  ;;  %v2813_v22 = vsub.f32 %v7434_v57, %v2797_v40 }
 0x514   : > { %v2814_v26 = vmul.f32 1.442695, %v2798_v11  ;;  %v2816_v37 = vmul.f32 1.442695, %v2799_v47  ;;  %v2818_v54 = vmul.f32 1.442695, %v2800_v55  ;;  %v7558_v7 = vmul.f32 %v8500_v15, %v7529_v48 }
 0x515   : > { %v2820_v63 = vmul.f32 1.442695, %v2801_v33  ;;  %v2822_v31 = vmul.f32 1.442695, %v2802_v23  ;;  %v2824_v12 = vmul.f32 1.442695, %v2803_v6  ;;  %v7561_v14 = vpop.eup %5720  ;;  %v2043_v2 = vsel %vm2042_vm1, %v7227_v28, %v2041_v35 }
 0x516   : > { %5724 = vpow2.f32 %v2814_v26  ;;  %v2826_v4 = vmul.f32 1.442695, %v2804_v46  ;;  %v2828_v52 = vmul.f32 1.442695, %v2805_v19  ;;  %v2830_v38 = vmul.f32 1.442695, %v2806_v44 }
 0x517   : > { %5726 = vpow2.f32 %v2816_v37  ;;  %v2832_v32 = vmul.f32 1.442695, %v2807_v50  ;;  %v2834_v57 = vmul.f32 1.442695, %v2808_v0  ;;  %v2836_v40 = vmul.f32 1.442695, %v2809_v20  ;;  %v7563_v11 = vpop.eup %5722 }
 0x518   : > { %5728 = vpow2.f32 %v2818_v54  ;;  %v2838_v47 = vmul.f32 1.442695, %v2810_v16  ;;  %v2840_v55 = vmul.f32 1.442695, %v2811_v51  ;;  %v2842_v33 = vmul.f32 1.442695, %v2812_v25 }
 0x519   : > { %5730 = vpow2.f32 %v2820_v63  ;;  %v2844_v23 = vmul.f32 1.442695, %v2813_v22  ;;  %v3113_v36 = vmax.f32 %v7558_v7, %v7525_v34  ;;  %v2146_v26 = vmul.f32 %v2130_v43, %v2130_v43  ;;  %v8502_v34 = vld [vmem:[#allocation30_spill] sm:$0xff]  ;;  %v8503_v50 = vld [vmem:[#allocation33_spill] sm:$0xff]  ;;  %v8504_v16 = vld [vmem:[#allocation23_spill] sm:$0xff] }
 0x51a   : > { %5732 = vpow2.f32 %v2822_v31  ;;  %v2062_v6 = vmul.f32 %v7372_v39, %v7299_v30  ;;  %vm2063_vm4 = vcmp.eq.f32.partialorder %v7299_v30, inf  ;;  %v2046_v46 = vsel %vm2044_vm3, %v2045_v1, %v2043_v2  ;;  %v8505_v22 = vld [vmem:[#allocation43_spill] sm:$0xff]  ;;  %v8506_v63 = vld [vmem:[#allocation24_spill] sm:$0xff] }
 0x51b   : > { %5734 = vpow2.f32 %v2824_v12  ;;  %v2162_v54 = vmul.f32 0.6944444, %v2146_v26  ;;  %vm2065_vm5 = vcmp.eq.f32.partialorder %v7299_v30, 0.0  ;;  %v2128_v43 = vsub.f32 %v8502_v34, %v2046_v46  ;;  %v2443_v12 = vpop.permute.xlu1 %2442  ;;  %v2448_v34 = vpop.permute.xlu0 %2447 }
 0x51c   : > { %5736 = vpow2.f32 %v2826_v4  ;;  %v2064_v31 = vsel %vm2063_vm4, %v7299_v30, %v2062_v6  ;;  %v2066_v19 = vand.u32 2147483648, %v7299_v30  ;;  %v2048_v39 = vmul.f32 %v7360_v61, %v7290_v58 }
 0x51d   : > { %5738 = vpow2.f32 %v2828_v52  ;;  %v2178_v35 = vsub.f32 1.0, %v2162_v54  ;;  %vm2049_vm6 = vcmp.eq.f32.partialorder %v7290_v58, inf  ;;  %v2144_v28 = vmul.f32 %v2128_v43, %v2128_v43  ;;  %v8507_v54 = vld [vmem:[#allocation31_spill] sm:$0xff] }
 0x51e   : > { %5740 = vpow2.f32 %v2830_v38  ;;  %v2067_v1 = vsel %vm2065_vm5, %v2066_v19, %v2064_v31  ;;  %vm2051_vm7 = vcmp.eq.f32.partialorder %v7290_v58, 0.0  ;;  %v2050_v30 = vsel %vm2049_vm6, %v7290_v58, %v2048_v39 }
 0x51f   : > { %5742 = vpow2.f32 %v2832_v32  ;;  %v7583_v44 = vmax.f32 %v2178_v35, 0.0  ;;  %v2131_v0 = vsub.f32 %v8503_v50, %v2067_v1  ;;  %v2160_v20 = vmul.f32 0.6944444, %v2144_v28  ;;  %v8509_v50 = vld [vmem:[#allocation15_spill] sm:$0xff] }
 0x520   : > { %v7587_v52 = vpop.eup %5724  ;;  %5744 = vpow2.f32 %v2834_v57  ;;  %v2052_v61 = vand.u32 2147483648, %v7290_v58  ;;  %v2582_v51 = vadd.f32 %v8504_v16, %v2443_v12  ;;  %v7598_v4 = vadd.f32 %v8506_v63, %v2443_v12  ;;  %v2453_v58 = vpop.permute.xlu1 %2452  ;;  %v8511_v16 = vld [vmem:[#allocation26_spill] sm:$0xff] }
 0x521   : > { %v7591_v25 = vpop.eup %5726  ;;  %5746 = vpow2.f32 %v2836_v40  ;;  %v7595_v37 = vmul.f32 %v8505_v22, %v7583_v44  ;;  %v2147_v15 = vmul.f32 %v2131_v0, %v2131_v0  ;;  %v2176_v57 = vsub.f32 1.0, %v2160_v20  ;;  %v8512_v22 = vld [vmem:[#allocation29_spill] sm:$0xff] }
 0x522   : > { %v7600_v38 = vpop.eup %5728  ;;  %5748 = vpow2.f32 %v2838_v47  ;;  %v2846_v32 = vadd.f32 %v7591_v25, %v7587_v52  ;;  %v2053_v26 = vsel %vm2051_vm7, %v2052_v61, %v2050_v30  ;;  %v2604_v19 = vpack.c.bf16 %v2582_v51, %v7507_v10  ;;  %v8510_v10 = vld [vmem:[#allocation16_spill] sm:$0xff] }
 0x523   : > { %v7606_v2 = vpop.eup %5730  ;;  %5750 = vpow2.f32 %v2840_v55  ;;  %v3111_v40 = vmax.f32 %v7595_v37, %v3113_v36  ;;  %v2163_v6 = vmul.f32 0.6944444, %v2147_v15  ;;  %v2129_v46 = vsub.f32 %v8507_v54, %v2053_v26  ;;  %v8513_v54 = vld [vmem:[#allocation46_spill] sm:$0xff] }
 0x524   : > { %v7610_v43 = vpop.eup %5732  ;;  %5752 = vpow2.f32 %v2842_v33  ;;  %v2847_v47 = vadd.f32 %v7600_v38, %v2846_v32  ;;  %v7613_v31 = vmax.f32 %v2176_v57, 0.0  ;;  %v8508_v33 = vld [vmem:[#allocation45_spill] sm:$0xff]  ;;  %v7628_v0 = vadd.f32 %v8509_v50, %v2448_v34  ;;  %5408 = vmatprep.mubr.bf16.mxu0 %v2604_v19 }
 0x525   : > { %v7616_v35 = vpop.eup %5734  ;;  %5754 = vpow2.f32 %v2844_v23  ;;  %v2179_v55 = vsub.f32 1.0, %v2163_v6  ;;  %v2145_v39 = vmul.f32 %v2129_v46, %v2129_v46  ;;  %v7631_v30 = vadd.f32 %v8510_v10, %v2448_v34 }
 0x526   : > { %v7620_v12 = vpop.eup %5736  ;;  %v2848_v28 = vadd.f32 %v7606_v2, %v2847_v47  ;;  %v7625_v1 = vmul.f32 %v8508_v33, %v7613_v31  ;;  %v7638_v51 = vadd.f32 %v8511_v16, %v2453_v58  ;;  %v7641_v15 = vadd.f32 %v8512_v22, %v2453_v58  ;;  %v8518_v47 = vld [vmem:[#allocation65_spill] sm:$0xff] }
 0x527   : > { %v7633_v23 = vpop.eup %5738  ;;  %v7635_v20 = vmax.f32 %v2179_v55, 0.0  ;;  %v2161_v61 = vmul.f32 0.6944444, %v2145_v39  ;;  %v2083_v26 = vmul.f32 %v7473_v59, %v7415_v42  ;;  %vm2084_vm8 = vcmp.eq.f32.partialorder %v7415_v42, inf }
 0x528   : > { %v7643_v63 = vpop.eup %5740  ;;  %v2849_v32 = vadd.f32 %v7610_v43, %v2848_v28  ;;  %v3116_v57 = vmax.f32 %v7625_v1, %v3111_v40  ;;  %vm2086_vm9 = vcmp.eq.f32.partialorder %v7415_v42, 0.0  ;;  %v2087_v55 = vand.u32 2147483648, %v7415_v42 }
 0x529   : > { %v7650_v6 = vpop.eup %5742  ;;  %v7654_v46 = vmul.f32 %v8513_v54, %v7635_v20  ;;  %v2177_v34 = vsub.f32 1.0, %v2161_v61  ;;  %v2085_v59 = vsel %vm2084_vm8, %v7415_v42, %v2083_v26  ;;  %v2069_v50 = vmul.f32 %v7378_v3, %v7306_v8  ;;  %v8516_v26 = vld [vmem:[#allocation60_spill] sm:$0xff] }
 0x52a   : > { %v7660_v58 = vpop.eup %5744  ;;  %v2850_v40 = vadd.f32 %v7616_v35, %v2849_v32  ;;  %vm2070_vm10 = vcmp.eq.f32.partialorder %v7306_v8, inf  ;;  %v2088_v16 = vsel %vm2086_vm9, %v2087_v55, %v2085_v59  ;;  %vm2072_vm11 = vcmp.eq.f32.partialorder %v7306_v8, 0.0  ;;  %v8515_v32 = vld [vmem:[#allocation48_spill] sm:$0xff] }
 0x52b   : > { %v7666_v39 = vpop.eup %5746  ;;  %v3114_v28 = vmax.f32 %v7654_v46, %v3116_v57  ;;  %v7669_v33 = vmax.f32 %v2177_v34, 0.0  ;;  %v2073_v42 = vand.u32 2147483648, %v7306_v8  ;;  %v2134_v54 = vsub.f32 %v8516_v26, %v2088_v16  ;;  %v8517_v16 = vld [vmem:[#allocation64_spill] sm:$0xff] }
 0x52c   : > { %v7674_v10 = vpop.eup %5748  ;;  %v2851_v61 = vadd.f32 %v7620_v12, %v2850_v40  ;;  %v2071_v3 = vsel %vm2070_vm10, %v7306_v8, %v2069_v50  ;;  %v2090_v34 = vmul.f32 %v7480_v41, %v7417_v53  ;;  %vm2091_vm12 = vcmp.eq.f32.partialorder %v7417_v53, inf }
 0x52d   : > { %8514 = vst [vmem:[#allocation36_spill] sm:$0xff] %v7669_v33  ;;  %v7679_v22 = vpop.eup %5750  ;;  %v7683_v57 = vmul.f32 %v8515_v32, %v7669_v33  ;;  %v2074_v59 = vsel %vm2072_vm11, %v2073_v42, %v2071_v3  ;;  %vm2093_vm13 = vcmp.eq.f32.partialorder %v7417_v53, 0.0  ;;  %v2150_v36 = vmul.f32 %v2134_v54, %v2134_v54 }
 0x52e   : > { %v7689_v19 = vpop.eup %5752  ;;  %v2852_v40 = vadd.f32 %v7633_v23, %v2851_v61  ;;  %v2132_v26 = vsub.f32 %v8517_v16, %v2074_v59  ;;  %v2092_v8 = vsel %vm2091_vm12, %v7417_v53, %v2090_v34  ;;  %v2094_v50 = vand.u32 2147483648, %v7417_v53 }
 0x52f   : > { %v7694_v55 = vpop.eup %5754  ;;  %v3117_v32 = vmax.f32 %v7683_v57, %v3114_v28  ;;  %v2076_v61 = vmul.f32 %v7467_v27, %v7412_v18  ;;  %vm2077_vm14 = vcmp.eq.f32.partialorder %v7412_v18, inf  ;;  %v2166_v42 = vmul.f32 0.6944444, %v2150_v36 }
 0x530   : > { %v2853_v41 = vadd.f32 %v7643_v63, %v2852_v40  ;;  %v2148_v3 = vmul.f32 %v2132_v26, %v2132_v26  ;;  %vm2079_vm15 = vcmp.eq.f32.partialorder %v7412_v18, 0.0  ;;  %v2080_v28 = vand.u32 2147483648, %v7412_v18 }
 0x531   : > { %v2095_v59 = vsel %vm2093_vm13, %v2094_v50, %v2092_v8  ;;  %v2078_v34 = vsel %vm2077_vm14, %v7412_v18, %v2076_v61  ;;  %v2111_v40 = vmul.f32 %v7561_v14, %v7496_v60  ;;  %v2182_v53 = vsub.f32 1.0, %v2166_v42 }
 0x532   : > { %v2854_v54 = vadd.f32 %v7650_v6, %v2853_v41  ;;  %v2164_v16 = vmul.f32 0.6944444, %v2148_v3  ;;  %v2135_v27 = vsub.f32 %v8518_v47, %v2095_v59  ;;  %v2081_v33 = vsel %vm2079_vm15, %v2080_v28, %v2078_v34 }
 0x533   : > { %v2133_v26 = vsub.f32 %v7272_v9, %v2081_v33  ;;  %vm2112_vm0 = vcmp.eq.f32.partialorder %v7496_v60, inf  ;;  %vm2114_vm1 = vcmp.eq.f32.partialorder %v7496_v60, 0.0  ;;  %v7715_v41 = vmax.f32 %v2182_v53, 0.0  ;;  %v8519_v9 = vld [vmem:[#allocation50_spill] sm:$0xff]  ;;  %v8520_v53 = vld [vmem:[#allocation52_spill] sm:$0xff] }
 0x534   : > { %v2855_v36 = vadd.f32 %v7660_v58, %v2854_v54  ;;  %v2180_v8 = vsub.f32 1.0, %v2164_v16  ;;  %v2151_v18 = vmul.f32 %v2135_v27, %v2135_v27  ;;  %v2113_v50 = vsel %vm2112_vm0, %v7496_v60, %v2111_v40 }
 0x535   : > { %v2149_v61 = vmul.f32 %v2133_v26, %v2133_v26  ;;  %v2115_v47 = vand.u32 2147483648, %v7496_v60  ;;  %v2097_v42 = vmul.f32 %v7538_v56, %v7429_v45  ;;  %v7724_v33 = vmul.f32 %v8519_v9, %v7715_v41 }
 0x536   : > { %v2856_v14 = vadd.f32 %v7666_v39, %v2855_v36  ;;  %v7726_v3 = vmax.f32 %v2180_v8, 0.0  ;;  %v2167_v28 = vmul.f32 0.6944444, %v2151_v18  ;;  %vm2098_vm3 = vcmp.eq.f32.partialorder %v7429_v45, inf }
 0x537   : > { %v2165_v59 = vmul.f32 0.6944444, %v2149_v61  ;;  %v2116_v34 = vsel %vm2114_vm1, %v2115_v47, %v2113_v50  ;;  %v2099_v40 = vsel %vm2098_vm3, %v7429_v45, %v2097_v42  ;;  %v3115_v60 = vmax.f32 %v7724_v33, %v3117_v32  ;;  %v8521_v42 = vld [vmem:[#allocation54_spill] sm:$0xff] }
 0x538   : > { %v2857_v54 = vadd.f32 %v7674_v10, %v2856_v14  ;;  %v7734_v56 = vmul.f32 %v8520_v53, %v7726_v3  ;;  %v2183_v16 = vsub.f32 1.0, %v2167_v28  ;;  %v2138_v27 = vsub.f32 %v7326_v21, %v2116_v34 }
 0x539   : > { %v2181_v26 = vsub.f32 1.0, %v2165_v59  ;;  %vm2100_vm4 = vcmp.eq.f32.partialorder %v7429_v45, 0.0  ;;  %v2101_v8 = vand.u32 2147483648, %v7429_v45  ;;  %v2118_v32 = vmul.f32 %v7563_v11, %v7504_v5  ;;  %v8522_v11 = vld [vmem:[#allocation56_spill] sm:$0xff] }
 0x53a   : > { %v2858_v36 = vadd.f32 %v7679_v22, %v2857_v54  ;;  %v3120_v18 = vmax.f32 %v7734_v56, %v3115_v60  ;;  %v7741_v50 = vmax.f32 %v2183_v16, 0.0  ;;  %v2154_v14 = vmul.f32 %v2138_v27, %v2138_v27 }
 0x53b   : > { %v7746_v47 = vmax.f32 %v2181_v26, 0.0  ;;  %v2102_v21 = vsel %vm2100_vm4, %v2101_v8, %v2099_v40  ;;  %vm2119_vm5 = vcmp.eq.f32.partialorder %v7504_v5, inf  ;;  %vm2121_vm6 = vcmp.eq.f32.partialorder %v7504_v5, 0.0 }
 0x53c   : > { %v2859_v61 = vadd.f32 %v7689_v19, %v2858_v36  ;;  %v7751_v9 = vmul.f32 %v8521_v42, %v7741_v50  ;;  %v2170_v45 = vmul.f32 0.6944444, %v2154_v14  ;;  %v2136_v28 = vsub.f32 %v7347_v29, %v2102_v21  ;;  %v8523_v21 = vld [vmem:[#allocation14_spill] sm:$0xff] }
 0x53d   : > { %v2120_v54 = vsel %vm2119_vm5, %v7504_v5, %v2118_v32  ;;  %v7758_v34 = vmul.f32 %v8522_v11, %v7746_v47  ;;  %v2122_v40 = vand.u32 2147483648, %v7504_v5  ;;  %v2104_v27 = vmul.f32 %v7550_v17, %v7486_v49 }
 0x53e   : > { %v2860_v59 = vadd.f32 %v7694_v55, %v2859_v61  ;;  %v3118_v60 = vmax.f32 %v7751_v9, %v3120_v18  ;;  %v2186_v53 = vsub.f32 1.0, %v2170_v45  ;;  %v2152_v16 = vmul.f32 %v2136_v28, %v2136_v28 }
 0x53f   : > { %v2123_v36 = vsel %vm2121_vm6, %v2122_v40, %v2120_v54  ;;  %vm2105_vm7 = vcmp.eq.f32.partialorder %v7486_v49, inf  ;;  %v2108_v18 = vand.u32 2147483648, %v7486_v49  ;;  %vm2107_vm8 = vcmp.eq.f32.partialorder %v7486_v49, 0.0 }
 0x540   : > { %v2861_v29 = vrot.slane %v2860_v59, 4  ;;  %v3121_v26 = vmax.f32 %v7758_v34, %v3118_v60  ;;  %v7767_v8 = vmax.f32 %v2186_v53, 0.0  ;;  %v2168_v14 = vmul.f32 0.6944444, %v2152_v16  ;;  %v8524_v53 = vld [vmem:[#allocation61_spill] sm:$0xff] }
 0x541   : > { %v2139_v32 = vsub.f32 %v7368_v62, %v2123_v36  ;;  %v2106_v5 = vsel %vm2105_vm7, %v7486_v49, %v2104_v27 }
 0x542   : > { %v2862_v61 = vadd.f32 %v2861_v29, %v2860_v59  ;;  %v7774_v42 = vmul.f32 %v8523_v21, %v7767_v8  ;;  %v2184_v17 = vsub.f32 1.0, %v2168_v14  ;;  %v2109_v54 = vsel %vm2107_vm8, %v2108_v18, %v2106_v5 }
 0x543   : > { %v2155_v45 = vmul.f32 %v2139_v32, %v2139_v32  ;;  %v2137_v59 = vsub.f32 %v7388_v24, %v2109_v54 }
 0x544   : > { %v2863_v28 = vrot.slane %v2862_v61, 2  ;;  %v3123_v11 = vmax.f32 %v7774_v42, %v3121_v26  ;;  %v7778_v40 = vmax.f32 %v2184_v17, 0.0  ;;  %v8525_v26 = vld [vmem:[#allocation62_spill] sm:$0xff]  ;;  %v8526_v17 = vld [vmem:[#allocation63_spill] sm:$0xff] }
 0x545   : > { %v2171_v62 = vmul.f32 0.6944444, %v2155_v45  ;;  %v2153_v29 = vmul.f32 %v2137_v59, %v2137_v59 }
 0x546   : > { %v2864_v60 = vadd.f32 %v2863_v28, %v2862_v61  ;;  %v7783_v16 = vmul.f32 %v8524_v53, %v7778_v40 }
 0x547   : > { %v2187_v27 = vsub.f32 1.0, %v2171_v62  ;;  %v2169_v32 = vmul.f32 0.6944444, %v2153_v29 }
 0x548   : > { %v2865_v36 = vrot.slane %v2864_v60, 1  ;;  %v3119_v14 = vmax.f32 %v7783_v16, %v3123_v11 }
 0x549   : > { %v7786_v49 = vmax.f32 %v2187_v27, 0.0  ;;  %v2185_v21 = vsub.f32 1.0, %v2169_v32 }
 0x54a   : > { %v2866_v5 = vadd.f32 %v2865_v36, %v2864_v60 }
 0x54b   : > { %v7790_v18 = vmul.f32 %v8525_v26, %v7786_v49  ;;  %v7793_v61 = vmax.f32 %v2185_v21, 0.0 }
 0x54c   : > { %5756 = vrcp.f32 %v2866_v5 }
 0x54d   : > { %v3122_v24 = vmax.f32 %v7790_v18, %v3119_v14  ;;  %v7797_v45 = vmul.f32 %v8526_v17, %v7793_v61 }
 0x54f   : > { %v3124_v28 = vmax.f32 %v3122_v24, %v7797_v45 }
 0x551   : > { %v3125_v54 = vrot.slane %v3124_v28, 4 }
 0x553   : > { %v3126_v11 = vmax.f32 %v3124_v28, %v3125_v54 }
 0x555   : > { %v3127_v59 = vrot.slane %v3126_v11, 2 }
 0x556   : > { %v5757_v62 = vpop.eup %5756 }
 0x557   : > { %v2868_v60 = vmul.f32 %v5757_v62, %v7587_v52  ;;  %v2869_v53 = vmul.f32 %v5757_v62, %v7591_v25  ;;  %v2870_v27 = vmul.f32 %v5757_v62, %v7600_v38  ;;  %v2871_v29 = vmul.f32 %v5757_v62, %v7606_v2 }
 0x558   : > { %v2872_v36 = vmul.f32 %v5757_v62, %v7610_v43  ;;  %v2873_v14 = vmul.f32 %v5757_v62, %v7616_v35  ;;  %v2874_v32 = vmul.f32 %v5757_v62, %v7620_v12  ;;  %v3128_v5 = vmax.f32 %v3126_v11, %v3127_v59 }
 0x559   : > { %v2884_v26 = vpack.c.bf16 %v2869_v53, %v2868_v60  ;;  %v2875_v21 = vmul.f32 %v5757_v62, %v7633_v23  ;;  %v2876_v24 = vmul.f32 %v5757_v62, %v7643_v63  ;;  %v2885_v17 = vpack.c.bf16 %v2871_v29, %v2870_v27  ;;  %v8527_v60 = vld [vmem:[#allocation19_spill] sm:$0xff] }
 0x55a   : > { %v2886_v52 = vpack.c.bf16 %v2873_v14, %v2872_v36  ;;  %v2877_v25 = vmul.f32 %v5757_v62, %v7650_v6  ;;  %v2878_v38 = vmul.f32 %v5757_v62, %v7660_v58  ;;  %v3129_v28 = vrot.slane %v3128_v5, 1 }
 0x55b   : > { %5392 = vmatprep.subr.bf16.mxu0 %v2884_v26  ;;  %v2887_v2 = vpack.c.bf16 %v2875_v21, %v2874_v32  ;;  %v2879_v43 = vmul.f32 %v5757_v62, %v7666_v39  ;;  %v2880_v35 = vmul.f32 %v5757_v62, %v7674_v10  ;;  %v2881_v54 = vmul.f32 %v5757_v62, %v7679_v22  ;;  %v8528_v10 = vld [vmem:[#allocation27_spill] sm:$0xff]  ;;  %v8529_v22 = vld [vmem:[#allocation34_spill] sm:$0xff] }
 0x55c   : > { %5393 = vmatpush3.bf16.msra.mxu0 %v2884_v26  ;;  %v2888_v12 = vpack.c.bf16 %v2877_v25, %v2876_v24  ;;  %v2882_v23 = vmul.f32 %v5757_v62, %v7689_v19  ;;  %v2883_v63 = vmul.f32 %v5757_v62, %v7694_v55  ;;  %v7816_v11 = vmax.f32 %v3128_v5, %v3129_v28 }
 0x55d   : > { %5394 = vmatprep.subr.bf16.mxu0 %v2885_v17  ;;  %v2889_v6 = vpack.c.bf16 %v2879_v43, %v2878_v38  ;;  %v2890_v58 = vpack.c.bf16 %v2881_v54, %v2880_v35 }
 0x55e   : > { %v2891_v59 = vpack.c.bf16 %v2883_v63, %v2882_v23  ;;  %v3131_v53 = vsub.f32 %v8527_v60, %v7816_v11  ;;  %v3132_v39 = vsub.f32 %v7558_v7, %v7816_v11  ;;  %v3133_v27 = vsub.f32 %v8528_v10, %v7816_v11 }
 0x55f   : > { %v3134_v19 = vsub.f32 %v8529_v22, %v7816_v11  ;;  %v3135_v55 = vsub.f32 %v7625_v1, %v7816_v11  ;;  %v3136_v62 = vsub.f32 %v7683_v57, %v7816_v11  ;;  %v3137_v29 = vsub.f32 %v7595_v37, %v7816_v11 }
 0x560   : > { %v3138_v36 = vsub.f32 %v7654_v46, %v7816_v11  ;;  %5395 = vmatpush3.bf16.msra.mxu0 %v2885_v17  ;;  %v3139_v7 = vsub.f32 %v7734_v56, %v7816_v11  ;;  %v3140_v14 = vsub.f32 %v7758_v34, %v7816_v11  ;;  %v3141_v32 = vsub.f32 %v7724_v33, %v7816_v11 }
 0x561   : > { %v3142_v1 = vsub.f32 %v7751_v9, %v7816_v11  ;;  %5396 = vmatprep.subr.bf16.mxu0 %v2886_v52  ;;  %v3143_v37 = vsub.f32 %v7783_v16, %v7816_v11  ;;  %v3144_v46 = vsub.f32 %v7797_v45, %v7816_v11  ;;  %v3145_v57 = vsub.f32 %v7774_v42, %v7816_v11 }
 0x562   : > { %v3146_v56 = vsub.f32 %v7790_v18, %v7816_v11  ;;  %v3147_v34 = vmul.f32 1.442695, %v3131_v53  ;;  %v3149_v5 = vmul.f32 1.442695, %v3132_v39  ;;  %v3151_v26 = vmul.f32 1.442695, %v3133_v27 }
 0x563   : > { %v3153_v33 = vmul.f32 1.442695, %v3134_v19  ;;  %v3155_v9 = vmul.f32 1.442695, %v3135_v55  ;;  %v3157_v16 = vmul.f32 1.442695, %v3136_v62  ;;  %v8530_v39 = vpack.c.bf16 %v7638_v51, %v7628_v0 }
 0x564   : > { %5397 = vmatpush3.bf16.msra.mxu0 %v2886_v52  ;;  %5758 = vpow2.f32 %v3147_v34  ;;  %v3159_v45 = vmul.f32 1.442695, %v3137_v29  ;;  %v3161_v42 = vmul.f32 1.442695, %v3138_v36  ;;  %v3163_v24 = vmul.f32 1.442695, %v3139_v7 }
 0x565   : > { %5398 = vmatprep.subr.bf16.mxu0 %v2887_v2  ;;  %5760 = vpow2.f32 %v3149_v5  ;;  %v3165_v25 = vmul.f32 1.442695, %v3140_v14  ;;  %v3171_v63 = vmul.f32 1.442695, %v3143_v37  ;;  %v3173_v60 = vmul.f32 1.442695, %v3144_v46 }
 0x566   : > { %5762 = vpow2.f32 %v3151_v26  ;;  %v3175_v10 = vmul.f32 1.442695, %v3145_v57  ;;  %v8531_v27 = vpack.c.bf16 %v7598_v4, %v7510_v13 }
 0x567   : > { %5764 = vpow2.f32 %v3153_v33 }
 0x568   : > { %5399 = vmatpush3.bf16.msra.mxu0 %v2887_v2  ;;  %5766 = vpow2.f32 %v3155_v9  ;;  %v3167_v2 = vmul.f32 1.442695, %v3141_v32 }
 0x569   : > { %5400 = vmatprep.subr.bf16.mxu0 %v2888_v12  ;;  %5768 = vpow2.f32 %v3157_v16 }
 0x56a   : > { %5770 = vpow2.f32 %v3159_v45 }
 0x56b   : > { %5772 = vpow2.f32 %v3161_v42 }
 0x56c   : > { %5401 = vmatpush3.bf16.msra.mxu0 %v2888_v12  ;;  %5774 = vpow2.f32 %v3163_v24  ;;  %v3169_v12 = vmul.f32 1.442695, %v3142_v1 }
 0x56d   : > { %5402 = vmatprep.subr.bf16.mxu0 %v2889_v6  ;;  %5776 = vpow2.f32 %v3165_v25 }
 0x56e   : > { %v7850_v18 = vpop.eup %5758  ;;  %5778 = vpow2.f32 %v3167_v2 }
 0x56f   : > { %v7852_v21 = vpop.eup %5760  ;;  %5780 = vpow2.f32 %v3169_v12 }
 0x570   : > { %5403 = vmatpush3.bf16.msra.mxu0 %v2889_v6  ;;  %v3179_v17 = vadd.f32 %v7852_v21, %v7850_v18  ;;  %v5763_v52 = vpop.eup %5762  ;;  %5782 = vpow2.f32 %v3171_v63 }
 0x571   : > { %5404 = vmatprep.subr.bf16.mxu0 %v2890_v58  ;;  %v5765_v28 = vpop.eup %5764  ;;  %5784 = vpow2.f32 %v3173_v60 }
 0x572   : > { %v3180_v38 = vadd.f32 %v5763_v52, %v3179_v17  ;;  %v5767_v35 = vpop.eup %5766  ;;  %5786 = vpow2.f32 %v3175_v10 }
 0x573   : > { %v5769_v23 = vpop.eup %5768 }
 0x574   : > { %5405 = vmatpush3.bf16.msra.mxu0 %v2890_v58  ;;  %v3181_v43 = vadd.f32 %v5765_v28, %v3180_v38  ;;  %v5771_v6 = vpop.eup %5770 }
 0x575   : > { %5406 = vmatprep.subr.bf16.mxu0 %v2891_v59  ;;  %v5773_v58 = vpop.eup %5772 }
 0x576   : > { %v3182_v54 = vadd.f32 %v5767_v35, %v3181_v43  ;;  %v5775_v19 = vpop.eup %5774 }
 0x577   : > { %v5777_v62 = vpop.eup %5776 }
 0x578   : > { %5407 = vmatpush3.bf16.msra.mxu0 %v2891_v59  ;;  %v3183_v11 = vadd.f32 %v5769_v23, %v3182_v54  ;;  %v3177_v59 = vmul.f32 1.442695, %v3146_v56  ;;  %v5779_v36 = vpop.eup %5778 }
 0x579   : > { %v5781_v0 = vpop.eup %5780 }
 0x57a   : > { %v3184_v53 = vadd.f32 %v5771_v6, %v3183_v11  ;;  %5788 = vpow2.f32 %v3177_v59  ;;  %v5783_v14 = vpop.eup %5782 }
 0x57b   : > { %5409 = vmatmul.mubr.bf16.vlgmr.msra.gmra.mrb[48].mxu0 %v8530_v39  ;;  %v5785_v1 = vpop.eup %5784 }
 0x57c   : > { %5448 = vmatprep.mubr.bf16.mxu0 %v8531_v27  ;;  %v3185_v22 = vadd.f32 %v5773_v58, %v3184_v53  ;;  %v5787_v46 = vpop.eup %5786 }
 0x57e   : > { %v3186_v55 = vadd.f32 %v5775_v19, %v3185_v22 }
 0x580   : > { %v3187_v29 = vadd.f32 %v5777_v62, %v3186_v55 }
 0x582   : > { %v3188_v7 = vadd.f32 %v5779_v36, %v3187_v29 }
 0x584   : > { %v3189_v51 = vadd.f32 %v5781_v0, %v3188_v7  ;;  %v5789_v4 = vpop.eup %5788 }
 0x586   : > { %v3190_v32 = vadd.f32 %v5783_v14, %v3189_v51 }
 0x588   : > { %v3191_v37 = vadd.f32 %v5785_v1, %v3190_v32 }
 0x58a   : > { %v3192_v13 = vadd.f32 %v5787_v46, %v3191_v37  ;;  %v3289_v37 = vpop.permute.xlu0 %3288 }
 0x58c   : > { %v3193_v57 = vadd.f32 %v5789_v4, %v3192_v13 }
 0x58e   : > { %v3194_v34 = vrot.slane %v3193_v57, 4 }
 0x590   : > { %v3195_v5 = vadd.f32 %v3194_v34, %v3193_v57  ;;  %v3294_v57 = vpop.permute.xlu1 %3293 }
 0x592   : > { %v3196_v56 = vrot.slane %v3195_v5, 2 }
 0x594   : > { %v3197_v26 = vadd.f32 %v3196_v56, %v3195_v5 }
 0x596   : > { %v3198_v33 = vrot.slane %v3197_v26, 1 }
 0x598   : > { %v3199_v9 = vadd.f32 %v3198_v33, %v3197_v26 }
 0x59a   : > { %5790 = vrcp.f32 %v3199_v9 }
 0x5a4   : > { %v5791_v16 = vpop.eup %5790 }
 0x5a5   : > { %v3201_v45 = vmul.f32 %v5791_v16, %v7850_v18  ;;  %v3202_v42 = vmul.f32 %v5791_v16, %v7852_v21  ;;  %v3203_v24 = vmul.f32 %v5791_v16, %v5763_v52  ;;  %v3204_v17 = vmul.f32 %v5791_v16, %v5765_v28 }
 0x5a6   : > { %v3205_v25 = vmul.f32 %v5791_v16, %v5767_v35  ;;  %v3206_v38 = vmul.f32 %v5791_v16, %v5769_v23  ;;  %v3207_v2 = vmul.f32 %v5791_v16, %v5771_v6  ;;  %v3208_v43 = vmul.f32 %v5791_v16, %v5773_v58 }
 0x5a7   : > { %v3217_v12 = vpack.c.bf16 %v3202_v42, %v3201_v45  ;;  %v3218_v54 = vpack.c.bf16 %v3204_v17, %v3203_v24  ;;  %v3209_v63 = vmul.f32 %v5791_v16, %v5775_v19  ;;  %v3210_v11 = vmul.f32 %v5791_v16, %v5777_v62  ;;  %v3299_v17 = vpop.permute.xlu0 %3298 }
 0x5a8   : > { %v3219_v60 = vpack.c.bf16 %v3206_v38, %v3205_v25  ;;  %v3220_v53 = vpack.c.bf16 %v3208_v43, %v3207_v2  ;;  %v3211_v39 = vmul.f32 %v5791_v16, %v5779_v36  ;;  %v3212_v10 = vmul.f32 %v5791_v16, %v5781_v0 }
 0x5a9   : > { %5432 = vmatprep.subr.bf16.mxu0 %v3217_v12  ;;  %v3221_v27 = vpack.c.bf16 %v3210_v11, %v3209_v63  ;;  %v3213_v22 = vmul.f32 %v5791_v16, %v5783_v14  ;;  %v3214_v18 = vmul.f32 %v5791_v16, %v5785_v1  ;;  %v3215_v59 = vmul.f32 %v5791_v16, %v5787_v46 }
 0x5aa   : > { %5433 = vmatpush3.bf16.msra.mxu0 %v3217_v12  ;;  %v3222_v21 = vpack.c.bf16 %v3212_v10, %v3211_v39  ;;  %v3216_v52 = vmul.f32 %v5791_v16, %v5789_v4  ;;  %v8532_v23 = vpack.c.bf16 %v7641_v15, %v7631_v30  ;;  %v8533_v6 = vmov 0   ;;  %v5608_v30 = vld [vmem:[%s8319_s3 + $0x40] sm:$0xff]   ;;  %v5609_v15 = vld [vmem:[%s8319_s3 + $0x48] sm:$0xff]   ;;  %v3304_v12 = vpop.permute.xlu1 %3303 }
 0x5ab   : > { %5434 = vmatprep.subr.bf16.mxu0 %v3218_v54  ;;  %v3223_v28 = vpack.c.bf16 %v3214_v18, %v3213_v22 }
 0x5ac   : > { %v3224_v35 = vpack.c.bf16 %v3216_v52, %v3215_v59  ;;  %v5611_v52 = vld [vmem:[%s8319_s3 + $0x58] sm:$0xff]  }
 0x5ae   : > { %5435 = vmatpush3.bf16.msra.mxu0 %v3218_v54 }
 0x5af   : > { %5436 = vmatprep.subr.bf16.mxu0 %v3219_v60 }
 0x5b2   : > { %5437 = vmatpush3.bf16.msra.mxu0 %v3219_v60 }
 0x5b3   : > { %5438 = vmatprep.subr.bf16.mxu0 %v3220_v53 }
 0x5b6   : > { %5439 = vmatpush3.bf16.msra.mxu0 %v3220_v53 }
 0x5b7   : > { %5440 = vmatprep.subr.bf16.mxu0 %v3221_v27 }
 0x5ba   : > { %5441 = vmatpush3.bf16.msra.mxu0 %v3221_v27 }
 0x5bb   : > { %5442 = vmatprep.subr.bf16.mxu0 %v3222_v21 }
 0x5be   : > { %5443 = vmatpush3.bf16.msra.mxu0 %v3222_v21  ;;  %v5610_v21 = vld [vmem:[%s8319_s3 + $0x50] sm:$0xff]  }
 0x5bf   : > { %5444 = vmatprep.subr.bf16.mxu0 %v3223_v28 }
 0x5c2   : > { %5445 = vmatpush3.bf16.msra.mxu0 %v3223_v28  ;;  %v3398_v28 = vpop.permute.xlu0 %3397 }
 0x5c3   : > { %5446 = vmatprep.subr.bf16.mxu0 %v3224_v35 }
 0x5c6   : > { %5447 = vmatpush3.bf16.msra.mxu0 %v3224_v35 }
 0x5c9   : > { %5449 = vmatmul.mubr.bf16.vlgmr.msra.gmra.mrb[52].mxu0 %v8532_v23 }
 0x5ca   : > { %3463 = vmatprep.mubr.bf16.mxu0 %v8533_v6 }
 0x64e   : > { %v5410_v58 = vpop.f32.mrb[48].mxu0 }
 0x64f   : > { %v2926_v19 = vpop.f32.mrb[49].mxu0 }
 0x650   : > { %v5411_v55 = vpop.f32.mrb[50].mxu0 }
 0x651   : > { %v3276_v62 = vpack.c.bf16 %v5411_v55, %v5410_v58  ;;  %v2929_v29 = vpop.f32.mrb[51].mxu0 }
 0x652   : > { %v3274_v36 = vpack.c.bf16 %v2929_v29, %v2926_v19  ;;  %v3403_v19 = vpop.permute.xlu1 %3402 }
 0x69c   : > { %v5450_v7 = vpop.f32.mrb[52].mxu0 }
 0x69d   : > { %v3259_v0 = vpop.f32.mrb[53].mxu0 }
 0x69e   : > { %v5451_v51 = vpop.f32.mrb[54].mxu0 }
 0x69f   : > { %v3277_v14 = vpack.c.bf16 %v5451_v51, %v5450_v7  ;;  %v3262_v32 = vpop.f32.mrb[55].mxu0 }
 0x6a0   : > { %v3275_v1 = vpack.c.bf16 %v3262_v32, %v3259_v0 }
 0x6a2   : > { %3322 = vmatprep.subr.bf16.mxu1 %v3275_v1 }
 0x6a3   : > { %3323 = vmatpush1.bf16.msra.mxu1 %v3274_v36 }
 0x6a4   : > { %3324 = vmatprep.subr.bf16.mxu1 %v3277_v14 }
 0x6a7   : > { %3325 = vmatpush1.bf16.msra.mxu1 %v3276_v62 }
 0x6aa   : > { %5102 = vmatmul.mubr.msk.bf16.vlgmr.msra.gmra.mrb[68].mxu1 %vm2299_vm2, %v5608_v30  ;;  %v3408_v30 = vpop.permute.xlu0 %3407 }
 0x6ab   : > { %3364 = vmatprep.mubr.bf16.mxu1 %v8533_v6 }
 0x6b2   : > { %5103 = vmatmul.mubr.msk.bf16.gmra.mrb[72].mxu1 %vm2299_vm2, %v5609_v15 }
 0x6b3   : > { %3572 = vmatprep.mubr.bf16.mxu1 %v8533_v6 }
 0x77d   : > { %v3356_v46 = vpop.f32.mrb[68].mxu1 }
 0x77e   : > { %v3357_v13 = vadd.f32 %v3356_v46, %v3289_v37  ;;  %v3358_v4 = vpop.f32.mrb[69].mxu1 }
 0x77f   : > { %v3359_v34 = vadd.f32 %v3358_v4, %v3289_v37  ;;  %v3360_v5 = vpop.f32.mrb[70].mxu1  ;;  %v3413_v4 = vpop.permute.xlu1 %3412 }
 0x780   : > { %v3361_v56 = vadd.f32 %v3360_v5, %v3294_v57  ;;  %v3362_v26 = vpop.f32.mrb[71].mxu1  ;;  %v3375_v9 = vmax.f32 %v3357_v13, 0.0 }
 0x781   : > { %v3363_v33 = vadd.f32 %v3362_v26, %v3294_v57  ;;  %v3376_v45 = vmax.f32 %v3359_v34, 0.0 }
 0x782   : > { %v3377_v16 = vmax.f32 %v3361_v56, 0.0 }
 0x783   : > { %v3378_v42 = vmax.f32 %v3363_v33, 0.0 }
 0x784   : > { %v3383_v24 = vpack.c.bf16 %v3377_v16, %v3375_v9 }
 0x785   : > { %v3384_v25 = vpack.c.bf16 %v3378_v42, %v3376_v45  ;;  %v3366_v38 = vpop.f32.mrb[72].mxu1 }
 0x786   : > { %v3367_v2 = vadd.f32 %v3366_v38, %v3299_v17  ;;  %v3368_v43 = vpop.f32.mrb[73].mxu1  ;;  %v3507_v38 = vpop.permute.xlu0 %3506 }
 0x787   : > { %v3369_v54 = vadd.f32 %v3368_v43, %v3299_v17  ;;  %v3370_v63 = vpop.f32.mrb[74].mxu1  ;;  %3431 = vmatprep.subr.bf16.mxu0 %v3384_v25  ;;  %v5612_v17 = vld [vmem:[%s8319_s3 + $0x60] sm:$0xff]   ;;  %v5613_v25 = vld [vmem:[%s8319_s3 + $0x68] sm:$0xff]  }
 0x788   : > { %v3371_v11 = vadd.f32 %v3370_v63, %v3304_v12  ;;  %v3372_v60 = vpop.f32.mrb[75].mxu1  ;;  %3432 = vmatpush1.bf16.msra.mxu0 %v3383_v24  ;;  %v3379_v39 = vmax.f32 %v3367_v2, 0.0 }
 0x789   : > { %v3373_v53 = vadd.f32 %v3372_v60, %v3304_v12  ;;  %v3380_v27 = vmax.f32 %v3369_v54, 0.0  ;;  %v3512_v54 = vpop.permute.xlu1 %3511 }
 0x78a   : > { %v3381_v10 = vmax.f32 %v3371_v11, 0.0 }
 0x78b   : > { %v3382_v22 = vmax.f32 %v3373_v53, 0.0 }
 0x78c   : > { %v3385_v18 = vpack.c.bf16 %v3381_v10, %v3379_v39  ;;  %v8534_v10 = vld [vmem:[#allocation7_spill] sm:$0xff] }
 0x78d   : > { %v3386_v59 = vpack.c.bf16 %v3382_v22, %v3380_v27  ;;  %v8535_v27 = vmax.f32 %v8534_v10, 0.0 }
 0x78f   : > { %3433 = vmatprep.subr.bf16.mxu0 %v3386_v59 }
 0x790   : > { %3434 = vmatpush1.bf16.msra.mxu0 %v3385_v18  ;;  %v8536_v18 = vld [vmem:[#allocation8_spill] sm:$0xff] }
 0x791   : > { %v8537_v59 = vmax.f32 %v8536_v18, 0.0 }
 0x793   : > { %5106 = vmatmul.mubr.msk.bf16.vlgmr.msra.gmra.mrb[56].mxu0 %vm2299_vm2, %v5610_v21 }
 0x794   : > { %3473 = vmatprep.mubr.bf16.mxu0 %v8533_v6 }
 0x79b   : > { %5107 = vmatmul.mubr.msk.bf16.gmra.mrb[60].mxu0 %vm2299_vm2, %v5611_v52  ;;  %v8538_v52 = vld [vmem:[#allocation6_spill] sm:$0xff] }
 0x79c   : > { %3681 = vmatprep.mubr.bf16.mxu0 %v8533_v6 }
 0x866   : > { %v3465_v35 = vpop.f32.mrb[56].mxu0 }
 0x867   : > { %v3466_v23 = vadd.f32 %v3465_v35, %v3398_v28  ;;  %v3467_v58 = vpop.f32.mrb[57].mxu0 }
 0x868   : > { %v3468_v55 = vadd.f32 %v3467_v58, %v3398_v28  ;;  %v3469_v62 = vpop.f32.mrb[58].mxu0  ;;  %v8539_v28 = vmax.f32 %v8538_v52, 0.0 }
 0x869   : > { %v3470_v29 = vadd.f32 %v3469_v62, %v3403_v19  ;;  %v3471_v36 = vpop.f32.mrb[59].mxu0  ;;  %v3484_v0 = vmax.f32 %v3466_v23, 0.0  ;;  %v8540_v23 = vld [vmem:[#allocation9_spill] sm:$0xff]  ;;  %v3517_v62 = vpop.permute.xlu0 %3516 }
 0x86a   : > { %v3472_v7 = vadd.f32 %v3471_v36, %v3403_v19  ;;  %v3485_v14 = vmax.f32 %v3468_v55, 0.0  ;;  %v8541_v58 = vmax.f32 %v8540_v23, 0.0 }
 0x86b   : > { %v3486_v51 = vmax.f32 %v3470_v29, 0.0 }
 0x86c   : > { %v3487_v32 = vmax.f32 %v3472_v7, 0.0 }
 0x86d   : > { %v3492_v1 = vpack.c.bf16 %v3486_v51, %v3484_v0  ;;  %v3522_v51 = vpop.permute.xlu1 %3521 }
 0x86e   : > { %v3493_v15 = vpack.c.bf16 %v3487_v32, %v3485_v14  ;;  %v3475_v37 = vpop.f32.mrb[60].mxu0 }
 0x86f   : > { %v3476_v46 = vadd.f32 %v3475_v37, %v3408_v30  ;;  %v3477_v13 = vpop.f32.mrb[61].mxu0  ;;  %v8542_v37 = vld [vmem:[#allocation11_spill] sm:$0xff] }
 0x870   : > { %v3478_v57 = vadd.f32 %v3477_v13, %v3408_v30  ;;  %v3479_v34 = vpop.f32.mrb[62].mxu0  ;;  %3540 = vmatprep.subr.bf16.mxu1 %v3493_v15 }
 0x871   : > { %v3480_v5 = vadd.f32 %v3479_v34, %v3413_v4  ;;  %v3481_v56 = vpop.f32.mrb[63].mxu0  ;;  %3541 = vmatpush1.bf16.msra.mxu1 %v3492_v1  ;;  %v3488_v33 = vmax.f32 %v3476_v46, 0.0  ;;  %v8543_v46 = vmax.f32 %v8542_v37, 0.0  ;;  %v5619_v37 = vld [vmem:[%s8319_s3 + $0x98] sm:$0xff]  }
 0x872   : > { %v3482_v26 = vadd.f32 %v3481_v56, %v3413_v4  ;;  %v3489_v16 = vmax.f32 %v3478_v57, 0.0  ;;  %v8544_v4 = vld [vmem:[#allocation12_spill] sm:$0xff] }
 0x873   : > { %v3490_v9 = vmax.f32 %v3480_v5, 0.0  ;;  %v8545_v57 = vmax.f32 %v8544_v4, 0.0  ;;  %v8546_v5 = vld [vmem:[#allocation10_spill] sm:$0xff] }
 0x874   : > { %v3491_v45 = vmax.f32 %v3482_v26, 0.0  ;;  %v8547_v56 = vmax.f32 %v8546_v5, 0.0 }
 0x875   : > { %v3494_v42 = vpack.c.bf16 %v3490_v9, %v3488_v33  ;;  %v8548_v33 = vld [vmem:[#allocation13_spill] sm:$0xff] }
 0x876   : > { %v3495_v24 = vpack.c.bf16 %v3491_v45, %v3489_v16  ;;  %v8549_v9 = vmax.f32 %v8548_v33, 0.0 }
 0x878   : > { %3542 = vmatprep.subr.bf16.mxu1 %v3495_v24  ;;  %v5614_v24 = vld [vmem:[%s8319_s3 + $0x70] sm:$0xff]  }
 0x879   : > { %3543 = vmatpush1.bf16.msra.mxu1 %v3494_v42 }
 0x87c   : > { %5110 = vmatmul.mubr.msk.bf16.vlgmr.msra.gmra.mrb[76].mxu1 %vm2299_vm2, %v5612_v17  ;;  %v5615_v17 = vld [vmem:[%s8319_s3 + $0x78] sm:$0xff]  }
 0x87d   : > { %3582 = vmatprep.mubr.bf16.mxu1 %v8533_v6 }
 0x884   : > { %5111 = vmatmul.mubr.msk.bf16.gmra.mrb[80].mxu1 %vm2299_vm2, %v5613_v25 }
 0x885   : > { %3878 = vmatprep.mubr.bf16.mxu1 %v8533_v6 }
 0x94f   : > { %v3574_v2 = vpop.f32.mrb[76].mxu1 }
 0x950   : > { %v3575_v43 = vadd.f32 %v3574_v2, %v3507_v38  ;;  %v3576_v12 = vpop.f32.mrb[77].mxu1 }
 0x951   : > { %v3577_v63 = vadd.f32 %v3576_v12, %v3507_v38  ;;  %v3578_v11 = vpop.f32.mrb[78].mxu1  ;;  %v3616_v38 = vpop.permute.xlu0 %3615 }
 0x952   : > { %v3579_v60 = vadd.f32 %v3578_v11, %v3512_v54  ;;  %v3580_v53 = vpop.f32.mrb[79].mxu1  ;;  %v3593_v22 = vadd.f32 %v3575_v43, %v8535_v27  ;;  %v3621_v43 = vpop.permute.xlu1 %3620 }
 0x953   : > { %v3581_v39 = vadd.f32 %v3580_v53, %v3512_v54  ;;  %v3594_v35 = vadd.f32 %v3577_v63, %v8539_v28 }
 0x954   : > { %v3595_v21 = vadd.f32 %v3579_v60, %v8537_v59 }
 0x955   : > { %v3596_v19 = vadd.f32 %v3581_v39, %v8541_v58 }
 0x956   : > { %v3601_v55 = vpack.c.bf16 %v3595_v21, %v3593_v22  ;;  %v3626_v21 = vpop.permute.xlu0 %3625 }
 0x957   : > { %v3584_v29 = vpop.f32.mrb[80].mxu1  ;;  %v3602_v36 = vpack.c.bf16 %v3596_v19, %v3594_v35  ;;  %v3631_v35 = vpop.permute.xlu1 %3630 }
 0x958   : > { %v3585_v7 = vadd.f32 %v3584_v29, %v3517_v62  ;;  %v3586_v0 = vpop.f32.mrb[81].mxu1 }
 0x959   : > { %v3587_v14 = vadd.f32 %v3586_v0, %v3517_v62  ;;  %v3588_v32 = vpop.f32.mrb[82].mxu1  ;;  %3649 = vmatprep.subr.bf16.mxu0 %v3602_v36 }
 0x95a   : > { %v3589_v1 = vadd.f32 %v3588_v32, %v3522_v51  ;;  %v3590_v30 = vpop.f32.mrb[83].mxu1  ;;  %3650 = vmatpush1.bf16.msra.mxu0 %v3601_v55  ;;  %v3597_v13 = vadd.f32 %v3585_v7, %v8543_v46  ;;  %v5620_v46 = vld [vmem:[%s8319_s3 + $0xa0] sm:$0xff]   ;;  %v3761_v4 = vpop.permute.xlu0 %3760 }
 0x95b   : > { %v3591_v15 = vadd.f32 %v3590_v30, %v3522_v51  ;;  %v3598_v26 = vadd.f32 %v3587_v14, %v8547_v56  ;;  %v5617_v30 = vld [vmem:[%s8319_s3 + $0x88] sm:$0xff]  }
 0x95c   : > { %v3599_v34 = vadd.f32 %v3589_v1, %v8545_v57  ;;  %v5616_v1 = vld [vmem:[%s8319_s3 + $0x80] sm:$0xff]   ;;  %v3766_v57 = vpop.permute.xlu1 %3765 }
 0x95d   : > { %v3600_v16 = vadd.f32 %v3591_v15, %v8549_v9  ;;  %v5618_v15 = vld [vmem:[%s8319_s3 + $0x90] sm:$0xff]  }
 0x95e   : > { %v3603_v45 = vpack.c.bf16 %v3599_v34, %v3597_v13  ;;  %v5621_v13 = vld [vmem:[%s8319_s3 + $0xa8] sm:$0xff]   ;;  %v3771_v34 = vpop.permute.xlu0 %3770 }
 0x95f   : > { %v3604_v42 = vpack.c.bf16 %v3600_v16, %v3598_v26 }
 0x960   : > { %v3776_v5 = vpop.permute.xlu1 %3775 }
 0x961   : > { %3651 = vmatprep.subr.bf16.mxu0 %v3604_v42 }
 0x962   : > { %3652 = vmatpush1.bf16.msra.mxu0 %v3603_v45  ;;  %v3741_v26 = vpop.permute.xlu0 %3740 }
 0x964   : > { %v3746_v9 = vpop.permute.xlu1 %3745 }
 0x965   : > { %5114 = vmatmul.mubr.msk.bf16.vlgmr.msra.gmra.mrb[64].mxu0 %vm2299_vm2, %v5614_v24 }
 0x966   : > { %3691 = vmatprep.mubr.bf16.mxu0 %v8533_v6 }
 0x96d   : > { %5115 = vmatmul.mubr.msk.bf16.gmra.mrb[68].mxu0 %vm2299_vm2, %v5615_v17 }
 0xa38   : > { %v3683_v25 = vpop.f32.mrb[64].mxu0 }
 0xa39   : > { %v3685_v2 = vpop.f32.mrb[65].mxu0  ;;  %v7925_v63 = vadd.f32 %v3683_v25, %v3616_v38 }
 0xa3a   : > { %v7923_v12 = vadd.f32 %v3685_v2, %v3616_v38  ;;  %v3687_v54 = vpop.f32.mrb[66].mxu0 }
 0xa3b   : > { %v7927_v11 = vadd.f32 %v3687_v54, %v3621_v43  ;;  %v3689_v60 = vpop.f32.mrb[67].mxu0  ;;  %v8387_v22 = vmax.f32 %v7925_v63, 0.0  ;;  %v3751_v54 = vpop.permute.xlu0 %3750 }
 0xa3c   : > { %v7929_v53 = vadd.f32 %v3689_v60, %v3621_v43  ;;  %v8386_v10 = vmax.f32 %v7923_v12, 0.0 }
 0xa3d   : > { %v8385_v39 = vmax.f32 %v7927_v11, 0.0 }
 0xa3e   : > { %v8384_v27 = vmax.f32 %v7929_v53, 0.0 }
 0xa3f   : > { %v3710_v52 = vpack.c.bf16 %v8385_v39, %v8387_v22 }
 0xa40   : > { %v3711_v18 = vpack.c.bf16 %v8384_v27, %v8386_v10  ;;  %v3693_v59 = vpop.f32.mrb[68].mxu0 }
 0xa41   : > { %v3695_v28 = vpop.f32.mrb[69].mxu0  ;;  %v7945_v19 = vadd.f32 %v3693_v59, %v3626_v21 }
 0xa42   : > { %v7943_v23 = vadd.f32 %v3695_v28, %v3626_v21  ;;  %v3697_v58 = vpop.f32.mrb[70].mxu0  ;;  %3846 = vmatprep.subr.bf16.mxu1 %v3711_v18  ;;  %v3756_v18 = vpop.permute.xlu1 %3755 }
 0xa43   : > { %v7947_v55 = vadd.f32 %v3697_v58, %v3631_v35  ;;  %v3699_v62 = vpop.f32.mrb[71].mxu0  ;;  %3847 = vmatpush1.bf16.msra.mxu1 %v3710_v52  ;;  %v8383_v51 = vmax.f32 %v7945_v19, 0.0 }
 0xa44   : > { %v7949_v29 = vadd.f32 %v3699_v62, %v3631_v35  ;;  %v8382_v7 = vmax.f32 %v7943_v23, 0.0 }
 0xa45   : > { %v8381_v36 = vmax.f32 %v7947_v55, 0.0 }
 0xa46   : > { %v8380_v0 = vmax.f32 %v7949_v29, 0.0 }
 0xa47   : > { %v3712_v32 = vpack.c.bf16 %v8381_v36, %v8383_v51 }
 0xa48   : > { %v3713_v14 = vpack.c.bf16 %v8380_v0, %v8382_v7 }
 0xa4a   : > { %3848 = vmatprep.subr.bf16.mxu1 %v3713_v14 }
 0xa4b   : > { %3849 = vmatpush1.bf16.msra.mxu1 %v3712_v32 }
 0xa4e   : > { %5122 = vmatmul.mubr.msk.bf16.vlgmr.msra.gmra.mrb[84].mxu1 %vm2299_vm2, %v5616_v1 }
 0xa4f   : > { %3888 = vmatprep.mubr.bf16.mxu1 %v8533_v6 }
 0xa56   : > { %5123 = vmatmul.mubr.msk.bf16.gmra.mrb[88].mxu1 %vm2299_vm2, %v5617_v30 }
 0xa57   : > { %3898 = vmatprep.mubr.bf16.mxu1 %v8533_v6 }
 0xa5e   : > { %5124 = vmatmul.mubr.msk.bf16.gmra.mrb[92].mxu1 %vm2299_vm2, %v5618_v15 }
 0xa5f   : > { %3908 = vmatprep.mubr.bf16.mxu1 %v8533_v6 }
 0xa66   : > { %5125 = vmatmul.mubr.msk.bf16.gmra.mrb[96].mxu1 %vm2299_vm2, %v5619_v37 }
 0xa67   : > { %3918 = vmatprep.mubr.bf16.mxu1 %v8533_v6 }
 0xa6e   : > { %5126 = vmatmul.mubr.msk.bf16.gmra.mrb[100].mxu1 %vm2299_vm2, %v5620_v46 }
 0xa6f   : > { %3928 = vmatprep.mubr.bf16.mxu1 %v8533_v6 }
 0xa76   : > { %5127 = vmatmul.mubr.msk.bf16.gmra.mrb[104].mxu1 %vm2299_vm2, %v5621_v13 }
 0xb21   : > { %v3880_v56 = vpop.f32.mrb[84].mxu1 }
 0xb22   : > { %v3882_v33 = vpop.f32.mrb[85].mxu1  ;;  %v3881_v45 = vadd.f32 %v3880_v56, %v3741_v26 }
 0xb23   : > { %v3884_v16 = vpop.f32.mrb[86].mxu1  ;;  %v3883_v17 = vadd.f32 %v3882_v33, %v3741_v26 }
 0xb24   : > { %v3885_v42 = vadd.f32 %v3884_v16, %v3746_v9  ;;  %v3886_v24 = vpop.f32.mrb[87].mxu1 }
 0xb25   : > { %v3887_v25 = vadd.f32 %v3886_v24, %v3746_v9  ;;  %v3781_v9 = vpop.permute.xlu1 %3780 }
 0xb26   : > { %v3939_v38 = vpack.c.bf16 %v3885_v42, %v3881_v45 }
 0xb27   : > { %v7992_v2 = vpack.c.bf16 %v3887_v25, %v3883_v17 }
 0xb28   : > { %5452 = vmatprep.subr.bf16.mxu0 %v3939_v38 }
 0xb29   : > { %v3890_v43 = vpop.f32.mrb[88].mxu1  ;;  %5453 = vmatpush3.bf16.msra.mxu0 %v3939_v38 }
 0xb2a   : > { %v3892_v60 = vpop.f32.mrb[89].mxu1  ;;  %v3891_v21 = vadd.f32 %v3890_v43, %v3751_v54 }
 0xb2b   : > { %v3894_v59 = vpop.f32.mrb[90].mxu1  ;;  %v3893_v35 = vadd.f32 %v3892_v60, %v3751_v54  ;;  %v3786_v60 = vpop.permute.xlu1 %3785 }
 0xb2c   : > { %v3895_v52 = vadd.f32 %v3894_v59, %v3756_v18  ;;  %v3896_v28 = vpop.f32.mrb[91].mxu1 }
 0xb2d   : > { %v3897_v58 = vadd.f32 %v3896_v28, %v3756_v18 }
 0xb2e   : > { %v3941_v62 = vpack.c.bf16 %v3895_v52, %v3891_v21 }
 0xb2f   : > { %v7994_v14 = vpack.c.bf16 %v3897_v58, %v3893_v35  ;;  %v3791_v35 = vpop.permute.xlu1 %3790 }
 0xb30   : > { %5454 = vmatprep.subr.bf16.mxu0 %v3941_v62 }
 0xb31   : > { %v3900_v32 = vpop.f32.mrb[92].mxu1  ;;  %5455 = vmatpush3.bf16.msra.mxu0 %v3941_v62 }
 0xb32   : > { %v3902_v1 = vpop.f32.mrb[93].mxu1  ;;  %v3901_v15 = vadd.f32 %v3900_v32, %v3761_v4 }
 0xb33   : > { %v3904_v30 = vpop.f32.mrb[94].mxu1  ;;  %v3903_v13 = vadd.f32 %v3902_v1, %v3761_v4 }
 0xb34   : > { %v3905_v37 = vadd.f32 %v3904_v30, %v3766_v57  ;;  %v3906_v46 = vpop.f32.mrb[95].mxu1 }
 0xb35   : > { %v3907_v56 = vadd.f32 %v3906_v46, %v3766_v57 }
 0xb36   : > { %v3943_v26 = vpack.c.bf16 %v3905_v37, %v3901_v15 }
 0xb37   : > { %v3944_v33 = vpack.c.bf16 %v3907_v56, %v3903_v13 }
 0xb38   : > { %3951 = vxpose.xlu0.c.b16.start [1/2] (short) %v3943_v26, 128 }
 0xb39   : > { %v3910_v16 = vpop.f32.mrb[96].mxu1  ;;  %4268 = vxpose.xlu1.c.b16.start [1/2] (short) %v3944_v33, 128 }
 0xb3a   : > { %v3912_v45 = vpop.f32.mrb[97].mxu1  ;;  %v3911_v24 = vadd.f32 %v3910_v16, %v3771_v34  ;;  %v4594_v16 = vld [vmem:[%s8320_s4 + $0x168] sm:$0xff] }
 0xb3b   : > { %v3914_v42 = vpop.f32.mrb[98].mxu1  ;;  %v3913_v38 = vadd.f32 %v3912_v45, %v3771_v34  ;;  %v4705_v45 = vld [vmem:[%s8320_s4 + $0x198] sm:$0xff] }
 0xb3c   : > { %v3915_v17 = vadd.f32 %v3914_v42, %v3776_v5  ;;  %v3916_v25 = vpop.f32.mrb[99].mxu1  ;;  %v4593_v42 = vld [vmem:[%s8320_s4 + $0x160] sm:$0xff] }
 0xb3d   : > { %v3917_v43 = vadd.f32 %v3916_v25, %v3776_v5  ;;  %v3796_v5 = vpop.permute.xlu1 %3795  ;;  %v4814_v25 = vld [vmem:[%s8320_s4 + $0x1b8] sm:$0xff] }
 0xb3e   : > { %v3945_v54 = vpack.c.bf16 %v3915_v17, %v3911_v24  ;;  %v4812_v24 = vld [vmem:[%s8320_s4 + $0x1a8] sm:$0xff]  ;;  %v4595_v17 = vld [vmem:[%s8320_s4 + $0x170] sm:$0xff] }
 0xb3f   : > { %v3946_v18 = vpack.c.bf16 %v3917_v43, %v3913_v38  ;;  %v4596_v38 = vld [vmem:[%s8320_s4 + $0x178] sm:$0xff]  ;;  %v4702_v43 = vld [vmem:[%s8320_s4 + $0x180] sm:$0xff] }
 0xb40   : > { %3952 = vxpose.xlu0.c.b16.end [2/2] (short) %v3945_v54, 128  ;;  %v4703_v54 = vld [vmem:[%s8320_s4 + $0x188] sm:$0xff] }
 0xb41   : > { %v3920_v59 = vpop.f32.mrb[100].mxu1  ;;  %4269 = vxpose.xlu1.c.b16.end [2/2] (short) %v3946_v18, 128  ;;  %v4811_v18 = vld [vmem:[%s8320_s4 + $0x1a0] sm:$0xff] }
 0xb42   : > { %v3922_v4 = vpop.f32.mrb[101].mxu1  ;;  %v3921_v21 = vadd.f32 %v3920_v59, %v3781_v9  ;;  %v4813_v59 = vld [vmem:[%s8320_s4 + $0x1b0] sm:$0xff] }
 0xb43   : > { %v3924_v57 = vpop.f32.mrb[102].mxu1  ;;  %v3923_v58 = vadd.f32 %v3922_v4, %v3781_v9 }
 0xb44   : > { %v3925_v52 = vadd.f32 %v3924_v57, %v3786_v60  ;;  %v3926_v28 = vpop.f32.mrb[103].mxu1 }
 0xb45   : > { %v3927_v62 = vadd.f32 %v3926_v28, %v3786_v60  ;;  %v4704_v60 = vld [vmem:[%s8320_s4 + $0x190] sm:$0xff] }
 0xb46   : > { %v3947_v32 = vpack.c.bf16 %v3925_v52, %v3921_v21 }
 0xb47   : > { %v3948_v1 = vpack.c.bf16 %v3927_v62, %v3923_v58 }
 0xb49   : > { %v3930_v30 = vpop.f32.mrb[104].mxu1  ;;  %5528 = vmatprep.mubr.bf16.mxu1 %v3948_v1 }
 0xb4a   : > { %v3932_v34 = vpop.f32.mrb[105].mxu1  ;;  %v7996_v37 = vadd.f32 %v3930_v30, %v3791_v35 }
 0xb4b   : > { %v3934_v15 = vpop.f32.mrb[106].mxu1  ;;  %v8000_v56 = vadd.f32 %v3932_v34, %v3791_v35 }
 0xb4c   : > { %v7998_v46 = vadd.f32 %v3934_v15, %v3796_v5  ;;  %v3936_v13 = vpop.f32.mrb[107].mxu1 }
 0xb4d   : > { %v8002_v26 = vadd.f32 %v3936_v13, %v3796_v5  ;;  %v8550_v13 = vld [vmem:[#allocation42_spill] sm:$0xff] }
 0xb5d   : > { %4604 = vperm.xlu1 %5599, %v4594_v16  }
 0xb61   : > { %4723 = vperm.xlu1 %5599, %v4705_v45   ;;  %4599 = vperm.xlu0 %5598, %v4593_v42   ;;  %v8551_v45 = vld [vmem:[#allocation53_spill] sm:$0xff] }
 0xb65   : > { %4822 = vperm.xlu1 %5599, %v4812_v24   ;;  %4609 = vperm.xlu0 %5598, %v4595_v17   ;;  %v8552_v17 = vld [vmem:[#allocation35_spill] sm:$0xff] }
 0xb69   : > { %4832 = vperm.xlu1 %5599, %v4814_v25   ;;  %4614 = vperm.xlu0 %5598, %v4596_v38   ;;  %v8553_v38 = vld [vmem:[#allocation51_spill] sm:$0xff] }
 0xb6d   : > { %4708 = vperm.xlu0 %5598, %v4702_v43  }
 0xb71   : > { %4713 = vperm.xlu0 %5598, %v4703_v54  }
 0xb75   : > { %4718 = vperm.xlu0 %5598, %v4704_v60   ;;  %v8554_v60 = vld [vmem:[#allocation47_spill] sm:$0xff] }
 0xb79   : > { %4817 = vperm.xlu0 %5598, %v4811_v18  }
 0xb7d   : > { %4827 = vperm.xlu0 %5598, %v4813_v59   ;;  %v8555_v59 = vld [vmem:[#allocation57_spill] sm:$0xff] }
 0xba2   : > { %v3959_v4 = vpop.trf.xlu0 }
 0xba3   : > { %5456 = vmatprep.mubr.msk.bf16.mxu0 %vm2299_vm2, %v3959_v4 }
 0xba6   : > { %v3960_v57 = vpop.trf.xlu0 }
 0xba7   : > { %5457 = vmatmul.mubr.msk.bf16.vlgmr.msra.gmra.mrb[72].mxu0 %vm2299_vm2, %v3960_v57 }
 0xbaa   : > { %v3961_v21 = vpop.trf.xlu0 }
 0xbab   : > { %5460 = vmatprep.mubr.msk.bf16.mxu0 %vm2299_vm2, %v3961_v21  ;;  %v8556_v21 = vld [vmem:[#allocation37_spill] sm:$0xff] }
 0xbae   : > { %v3962_v52 = vpop.trf.xlu0 }
 0xbaf   : > { %5461 = vmatmul.mubr.msk.bf16.gmra.mrb[76].mxu0 %vm2299_vm2, %v3962_v52 }
 0xbb2   : > { %v3963_v28 = vpop.trf.xlu0 }
 0xbb3   : > { %5464 = vmatprep.mubr.msk.bf16.mxu0 %vm2299_vm2, %v3963_v28 }
 0xbb6   : > { %v3964_v35 = vpop.trf.xlu0 }
 0xbb7   : > { %5465 = vmatmul.mubr.msk.bf16.gmra.mrb[80].mxu0 %vm2299_vm2, %v3964_v35  ;;  %v8557_v35 = vld [vmem:[#allocation59_spill] sm:$0xff] }
 0xbba   : > { %v3965_v58 = vpop.trf.xlu0 }
 0xbbb   : > { %5468 = vmatprep.mubr.msk.bf16.mxu0 %vm2299_vm2, %v3965_v58 }
 0xbbe   : > { %v3966_v62 = vpop.trf.xlu0 }
 0xbbf   : > { %5469 = vmatmul.mubr.msk.bf16.gmra.mrb[84].mxu0 %vm2299_vm2, %v3966_v62 }
 0xbc0   : > { %5488 = vmatprep.mubr.bf16.mxu0 %v3947_v32 }
 0xc7a   : > { %v5458_v1 = vpop.f32.mrb[72].mxu0 }
 0xc7b   : > { %v4025_v30 = vpop.f32.mrb[73].mxu0  ;;  %v8053_v16 = vmul.f32 %v5458_v1, %v8550_v13 }
 0xc7c   : > { %v5459_v34 = vpop.f32.mrb[74].mxu0  ;;  %v4088_v25 = vmul.f32 %v4025_v30, %v8552_v17 }
 0xc7d   : > { %v4028_v5 = vpop.f32.mrb[75].mxu0  ;;  %v8063_v32 = vmul.f32 %v5459_v34, %v8554_v60  ;;  %v8558_v34 = vld [vmem:[#allocation66_spill] sm:$0xff] }
 0xc7e   : > { %v4089_v52 = vmul.f32 %v4028_v5, %v8556_v21  ;;  %v8560_v5 = vld [vmem:[#allocation69_spill] sm:$0xff] }
 0xc82   : > { %v5462_v15 = vpop.f32.mrb[76].mxu0 }
 0xc83   : > { %v8056_v42 = vmul.f32 %v5462_v15, %v8551_v45  ;;  %v4041_v24 = vpop.f32.mrb[77].mxu0  ;;  %v8559_v45 = vld [vmem:[#allocation68_spill] sm:$0xff] }
 0xc84   : > { %v8060_v43 = vmul.f32 %v4041_v24, %v8553_v38  ;;  %v5463_v54 = vpop.f32.mrb[78].mxu0 }
 0xc85   : > { %v4106_v18 = vmax.f32 %v8053_v16, %v8056_v42  ;;  %v8068_v4 = vmul.f32 %v5463_v54, %v8555_v59  ;;  %v4044_v57 = vpop.f32.mrb[79].mxu0 }
 0xc86   : > { %v4104_v28 = vmax.f32 %v4088_v25, %v8060_v43  ;;  %v4093_v58 = vmul.f32 %v4044_v57, %v8557_v35  ;;  %v8561_v57 = vld [vmem:[#allocation70_spill] sm:$0xff] }
 0xc87   : > { %v4107_v62 = vmax.f32 %v8063_v32, %v8068_v4 }
 0xc88   : > { %v4105_v1 = vmax.f32 %v4089_v52, %v4093_v58 }
 0xc8a   : > { %v5466_v30 = vpop.f32.mrb[80].mxu0 }
 0xc8b   : > { %v8076_v15 = vmul.f32 %v5466_v30, %v8558_v34  ;;  %v4057_v13 = vpop.f32.mrb[81].mxu0  ;;  %v8562_v34 = vld [vmem:[#allocation71_spill] sm:$0xff] }
 0xc8c   : > { %v8079_v24 = vmul.f32 %v4057_v13, %v8559_v45  ;;  %v5467_v17 = vpop.f32.mrb[82].mxu0  ;;  %v8563_v45 = vld [vmem:[#allocation72_spill] sm:$0xff] }
 0xc8d   : > { %v4110_v38 = vmax.f32 %v4106_v18, %v8076_v15  ;;  %v8083_v54 = vmul.f32 %v5467_v17, %v8560_v5  ;;  %v4060_v60 = vpop.f32.mrb[83].mxu0  ;;  %v8564_v5 = vld [vmem:[#allocation25_spill] sm:$0xff] }
 0xc8e   : > { %v4108_v59 = vmax.f32 %v4104_v28, %v8079_v24  ;;  %v4097_v21 = vmul.f32 %v4060_v60, %v8561_v57  ;;  %v8565_v57 = vld [vmem:[#allocation18_spill] sm:$0xff] }
 0xc8f   : > { %v4111_v35 = vmax.f32 %v4107_v62, %v8083_v54 }
 0xc90   : > { %v4109_v0 = vmax.f32 %v4105_v1, %v4097_v21 }
 0xc92   : > { %v5470_v30 = vpop.f32.mrb[84].mxu0 }
 0xc93   : > { %v8089_v36 = vmul.f32 %v5470_v30, %v8562_v34  ;;  %v4073_v13 = vpop.f32.mrb[85].mxu0 }
 0xc94   : > { %v8092_v7 = vmul.f32 %v4073_v13, %v8563_v45  ;;  %v5471_v18 = vpop.f32.mrb[86].mxu0 }
 0xc95   : > { %v4114_v17 = vmax.f32 %v4110_v38, %v8089_v36  ;;  %v8096_v51 = vmul.f32 %v5471_v18, %v8564_v5  ;;  %v4076_v28 = vpop.f32.mrb[87].mxu0 }
 0xc96   : > { %v4112_v60 = vmax.f32 %v4108_v59, %v8092_v7  ;;  %v8100_v62 = vmul.f32 %v4076_v28, %v8565_v57 }
 0xc97   : > { %v4115_v1 = vmax.f32 %v4111_v35, %v8096_v51 }
 0xc98   : > { %v4113_v30 = vmax.f32 %v4109_v0, %v8100_v62 }
 0xc99   : > { %v4117_v34 = vmax.f32 %v4114_v17, %v4115_v1 }
 0xc9a   : > { %v4116_v27 = vmax.f32 %v4112_v60, %v4113_v30 }
 0xc9c   : > { %v4118_v13 = vmax.f32 %v4116_v27, %v4117_v34 }
 0xc9e   : > { %v4119_v45 = vrot.slane %v4118_v13, 4 }
 0xca0   : > { %v4120_v39 = vmax.f32 %v4118_v13, %v4119_v45 }
 0xca2   : > { %v4121_v10 = vrot.slane %v4120_v39, 2 }
 0xca4   : > { %v4122_v38 = vmax.f32 %v4120_v39, %v4121_v10 }
 0xca6   : > { %v4123_v22 = vrot.slane %v4122_v38, 1 }
 0xca8   : > { %v4124_v18 = vmax.f32 %v4122_v38, %v4123_v22 }
 0xcaa   : > { %v4125_v5 = vsub.f32 %v4088_v25, %v4124_v18  ;;  %v4126_v9 = vsub.f32 %v4089_v52, %v4124_v18  ;;  %v4127_v59 = vsub.f32 %v8053_v16, %v4124_v18  ;;  %v4128_v28 = vsub.f32 %v8063_v32, %v4124_v18 }
 0xcab   : > { %v4129_v57 = vsub.f32 %v8060_v43, %v4124_v18  ;;  %v4130_v35 = vsub.f32 %v4093_v58, %v4124_v18  ;;  %v4131_v0 = vsub.f32 %v8056_v42, %v4124_v18  ;;  %v4132_v17 = vsub.f32 %v8068_v4, %v4124_v18 }
 0xcac   : > { %v4133_v27 = vsub.f32 %v8079_v24, %v4124_v18  ;;  %v4134_v60 = vsub.f32 %v4097_v21, %v4124_v18  ;;  %v4135_v39 = vsub.f32 %v8076_v15, %v4124_v18  ;;  %v4136_v10 = vsub.f32 %v8083_v54, %v4124_v18 }
 0xcad   : > { %v4137_v22 = vsub.f32 %v8092_v7, %v4124_v18  ;;  %v4138_v16 = vsub.f32 %v8100_v62, %v4124_v18  ;;  %v4139_v25 = vsub.f32 %v8089_v36, %v4124_v18  ;;  %v4140_v43 = vsub.f32 %v8096_v51, %v4124_v18 }
 0xcae   : > { %v4141_v32 = vmul.f32 1.442695, %v4125_v5  ;;  %v4143_v52 = vmul.f32 1.442695, %v4126_v9  ;;  %v4145_v42 = vmul.f32 1.442695, %v4127_v59 }
 0xcaf   : > { %v4147_v4 = vmul.f32 1.442695, %v4128_v28  ;;  %v4149_v58 = vmul.f32 1.442695, %v4129_v57  ;;  %v4151_v15 = vmul.f32 1.442695, %v4130_v35 }
 0xcb0   : > { %5792 = vpow2.f32 %v4141_v32  ;;  %v4153_v24 = vmul.f32 1.442695, %v4131_v0  ;;  %v4155_v7 = vmul.f32 1.442695, %v4132_v17  ;;  %v4157_v36 = vmul.f32 1.442695, %v4133_v27 }
 0xcb1   : > { %5794 = vpow2.f32 %v4143_v52  ;;  %v4159_v9 = vmul.f32 1.442695, %v4134_v60  ;;  %v4161_v34 = vmul.f32 1.442695, %v4135_v39  ;;  %v4163_v38 = vmul.f32 1.442695, %v4136_v10 }
 0xcb2   : > { %5796 = vpow2.f32 %v4145_v42  ;;  %v4165_v59 = vmul.f32 1.442695, %v4137_v22  ;;  %v4167_v35 = vmul.f32 1.442695, %v4138_v16  ;;  %v4169_v27 = vmul.f32 1.442695, %v4139_v25 }
 0xcb3   : > { %5798 = vpow2.f32 %v4147_v4  ;;  %v4171_v39 = vmul.f32 1.442695, %v4140_v43 }
 0xcb4   : > { %5800 = vpow2.f32 %v4149_v58 }
 0xcb5   : > { %5802 = vpow2.f32 %v4151_v15 }
 0xcb6   : > { %5804 = vpow2.f32 %v4153_v24 }
 0xcb7   : > { %5806 = vpow2.f32 %v4155_v7 }
 0xcb8   : > { %5808 = vpow2.f32 %v4157_v36 }
 0xcb9   : > { %5810 = vpow2.f32 %v4159_v9 }
 0xcba   : > { %v5793_v54 = vpop.eup %5792  ;;  %5812 = vpow2.f32 %v4161_v34 }
 0xcbb   : > { %v5795_v21 = vpop.eup %5794  ;;  %5814 = vpow2.f32 %v4163_v38 }
 0xcbc   : > { %v4173_v62 = vadd.f32 %v5795_v21, %v5793_v54  ;;  %v5797_v51 = vpop.eup %5796  ;;  %5816 = vpow2.f32 %v4165_v59 }
 0xcbd   : > { %v5799_v30 = vpop.eup %5798  ;;  %5818 = vpow2.f32 %v4167_v35 }
 0xcbe   : > { %v4174_v1 = vadd.f32 %v5797_v51, %v4173_v62  ;;  %v5801_v45 = vpop.eup %5800  ;;  %5820 = vpow2.f32 %v4169_v27 }
 0xcbf   : > { %v5803_v5 = vpop.eup %5802  ;;  %5822 = vpow2.f32 %v4171_v39 }
 0xcc0   : > { %v4175_v13 = vadd.f32 %v5799_v30, %v4174_v1  ;;  %v5805_v57 = vpop.eup %5804 }
 0xcc1   : > { %v5807_v17 = vpop.eup %5806 }
 0xcc2   : > { %v4176_v18 = vadd.f32 %v5801_v45, %v4175_v13  ;;  %v5809_v32 = vpop.eup %5808 }
 0xcc3   : > { %v5811_v42 = vpop.eup %5810 }
 0xcc4   : > { %v4177_v28 = vadd.f32 %v5803_v5, %v4176_v18  ;;  %v5813_v4 = vpop.eup %5812 }
 0xcc5   : > { %v5815_v22 = vpop.eup %5814 }
 0xcc6   : > { %v4178_v0 = vadd.f32 %v5805_v57, %v4177_v28  ;;  %v5817_v24 = vpop.eup %5816 }
 0xcc7   : > { %v5819_v16 = vpop.eup %5818 }
 0xcc8   : > { %v4179_v60 = vadd.f32 %v5807_v17, %v4178_v0  ;;  %v5821_v62 = vpop.eup %5820 }
 0xcc9   : > { %v5823_v25 = vpop.eup %5822 }
 0xcca   : > { %v4180_v52 = vadd.f32 %v5809_v32, %v4179_v60 }
 0xccc   : > { %v4181_v10 = vadd.f32 %v5811_v42, %v4180_v52 }
 0xcce   : > { %v4182_v58 = vadd.f32 %v5813_v4, %v4181_v10 }
 0xcd0   : > { %v4183_v15 = vadd.f32 %v5815_v22, %v4182_v58 }
 0xcd2   : > { %v4184_v7 = vadd.f32 %v5817_v24, %v4183_v15 }
 0xcd4   : > { %v4185_v36 = vadd.f32 %v5819_v16, %v4184_v7 }
 0xcd6   : > { %v4186_v9 = vadd.f32 %v5821_v62, %v4185_v36 }
 0xcd8   : > { %v4187_v1 = vadd.f32 %v5823_v25, %v4186_v9 }
 0xcda   : > { %v4188_v34 = vrot.slane %v4187_v1, 4 }
 0xcdc   : > { %v4189_v13 = vadd.f32 %v4188_v34, %v4187_v1 }
 0xcde   : > { %v4190_v43 = vrot.slane %v4189_v13, 2 }
 0xce0   : > { %v4191_v38 = vadd.f32 %v4190_v43, %v4189_v13 }
 0xce2   : > { %v4192_v18 = vrot.slane %v4191_v38, 1 }
 0xce4   : > { %v4193_v59 = vadd.f32 %v4192_v18, %v4191_v38 }
 0xce6   : > { %5824 = vrcp.f32 %v4193_v59 }
 0xcf0   : > { %v5825_v28 = vpop.eup %5824 }
 0xcf1   : > { %v4195_v35 = vmul.f32 %v5825_v28, %v5793_v54  ;;  %v4196_v0 = vmul.f32 %v5825_v28, %v5795_v21  ;;  %v4197_v27 = vmul.f32 %v5825_v28, %v5797_v51  ;;  %v4198_v60 = vmul.f32 %v5825_v28, %v5799_v30 }
 0xcf2   : > { %v4199_v39 = vmul.f32 %v5825_v28, %v5801_v45  ;;  %v4200_v52 = vmul.f32 %v5825_v28, %v5803_v5  ;;  %v4201_v10 = vmul.f32 %v5825_v28, %v5805_v57  ;;  %v4202_v58 = vmul.f32 %v5825_v28, %v5807_v17  ;;  %v4276_v5 = vpop.trf.xlu1 }
 0xcf3   : > { %v4211_v15 = vpack.c.bf16 %v4196_v0, %v4195_v35  ;;  %v4212_v7 = vpack.c.bf16 %v4198_v60, %v4197_v27  ;;  %v4203_v36 = vmul.f32 %v5825_v28, %v5809_v32  ;;  %v4204_v9 = vmul.f32 %v5825_v28, %v5811_v42  ;;  %v8567_v27 = vld [vmem:[#allocation17_spill] sm:$0xff] }
 0xcf4   : > { %v4213_v33 = vpack.c.bf16 %v4200_v52, %v4199_v39  ;;  %v4214_v1 = vpack.c.bf16 %v4202_v58, %v4201_v10  ;;  %v4205_v34 = vmul.f32 %v5825_v28, %v5813_v4  ;;  %v4206_v13 = vmul.f32 %v5825_v28, %v5815_v22  ;;  %v8568_v10 = vld [vmem:[#allocation20_spill] sm:$0xff] }
 0xcf5   : > { %5472 = vmatprep.subr.bf16.mxu0 %v4211_v15  ;;  %v4215_v43 = vpack.c.bf16 %v4204_v9, %v4203_v36  ;;  %v4207_v38 = vmul.f32 %v5825_v28, %v5817_v24  ;;  %v4208_v18 = vmul.f32 %v5825_v28, %v5819_v16  ;;  %v4209_v54 = vmul.f32 %v5825_v28, %v5821_v62  ;;  %v8569_v36 = vld [vmem:[#allocation28_spill] sm:$0xff] }
 0xcf6   : > { %5473 = vmatpush3.bf16.msra.mxu0 %v4211_v15  ;;  %v4216_v21 = vpack.c.bf16 %v4206_v13, %v4205_v34  ;;  %v4210_v51 = vmul.f32 %v5825_v28, %v5823_v25  ;;  %v4277_v57 = vpop.trf.xlu1  ;;  %v8566_v32 = vpack.c.bf16 %v7998_v46, %v7996_v37 }
 0xcf7   : > { %5474 = vmatprep.subr.bf16.mxu0 %v4212_v7  ;;  %v4217_v30 = vpack.c.bf16 %v4208_v18, %v4207_v38  ;;  %v8570_v38 = vld [vmem:[#allocation36_spill] sm:$0xff] }
 0xcf8   : > { %v4218_v45 = vpack.c.bf16 %v4210_v51, %v4209_v54 }
 0xcfa   : > { %5475 = vmatpush3.bf16.msra.mxu0 %v4212_v7  ;;  %v4278_v17 = vpop.trf.xlu1 }
 0xcfb   : > { %5476 = vmatprep.subr.bf16.mxu0 %v4213_v33 }
 0xcfe   : > { %5477 = vmatpush3.bf16.msra.mxu0 %v4213_v33  ;;  %v4279_v33 = vpop.trf.xlu1 }
 0xcff   : > { %5478 = vmatprep.subr.bf16.mxu0 %v4214_v1 }
 0xd02   : > { %5479 = vmatpush3.bf16.msra.mxu0 %v4214_v1  ;;  %v4280_v42 = vpop.trf.xlu1 }
 0xd03   : > { %5480 = vmatprep.subr.bf16.mxu0 %v4215_v43 }
 0xd06   : > { %5481 = vmatpush3.bf16.msra.mxu0 %v4215_v43  ;;  %v4281_v37 = vpop.trf.xlu1 }
 0xd07   : > { %5482 = vmatprep.subr.bf16.mxu0 %v4216_v21 }
 0xd0a   : > { %5483 = vmatpush3.bf16.msra.mxu0 %v4216_v21  ;;  %v4282_v46 = vpop.trf.xlu1 }
 0xd0b   : > { %5484 = vmatprep.subr.bf16.mxu0 %v4217_v30 }
 0xd0e   : > { %5485 = vmatpush3.bf16.msra.mxu0 %v4217_v30 }
 0xd0f   : > { %5486 = vmatprep.subr.bf16.mxu0 %v4218_v45 }
 0xd12   : > { %5487 = vmatpush3.bf16.msra.mxu0 %v4218_v45 }
 0xd13   : > { %5492 = vmatprep.subr.bf16.mxu0 %v7992_v2 }
 0xd15   : > { %5489 = vmatmul.mubr.bf16.vlgmr.msra.gmra.mrb[88].mxu0 %v8566_v32 }
 0xd16   : > { %5493 = vmatpush3.bf16.msra.mxu0 %v7992_v2  ;;  %5496 = vmatprep.mubr.msk.bf16.mxu0 %vm2299_vm2, %v4276_v5  ;;  %v4283_v2 = vpop.trf.xlu1 }
 0xd17   : > { %5494 = vmatprep.subr.bf16.mxu0 %v7994_v14 }
 0xd1a   : > { %5495 = vmatpush3.bf16.msra.mxu0 %v7994_v14 }
 0xd1d   : > { %5497 = vmatmul.mubr.msk.bf16.vlgmr.msra.gmra.mrb[92].mxu0 %vm2299_vm2, %v4277_v57 }
 0xd1e   : > { %5500 = vmatprep.mubr.msk.bf16.mxu0 %vm2299_vm2, %v4278_v17 }
 0xd25   : > { %5501 = vmatmul.mubr.msk.bf16.gmra.mrb[96].mxu0 %vm2299_vm2, %v4279_v33 }
 0xd26   : > { %5504 = vmatprep.mubr.msk.bf16.mxu0 %vm2299_vm2, %v4280_v42 }
 0xd2d   : > { %5505 = vmatmul.mubr.msk.bf16.gmra.mrb[100].mxu0 %vm2299_vm2, %v4281_v37 }
 0xd2e   : > { %5508 = vmatprep.mubr.msk.bf16.mxu0 %vm2299_vm2, %v4282_v46 }
 0xd35   : > { %5509 = vmatmul.mubr.msk.bf16.gmra.mrb[104].mxu0 %vm2299_vm2, %v4283_v2 }
 0xd36   : > { %4883 = vmatprep.mubr.bf16.mxu0 %v8533_v6 }
 0xde8   : > { %v8132_v14 = vpop.f32.mrb[88].mxu0 }
 0xde9   : > { %v8134_v4 = vpop.f32.mrb[89].mxu0 }
 0xdea   : > { %v8136_v22 = vpop.f32.mrb[90].mxu0 }
 0xdeb   : > { %v4587_v24 = vpack.c.bf16 %v8136_v22, %v8132_v14  ;;  %v8140_v16 = vpop.f32.mrb[91].mxu0 }
 0xdec   : > { %v4585_v62 = vpack.c.bf16 %v8140_v16, %v8134_v4 }
 0xdf0   : > { %v5498_v25 = vpop.f32.mrb[92].mxu0 }
 0xdf1   : > { %v4342_v59 = vpop.f32.mrb[93].mxu0  ;;  %v8145_v60 = vmul.f32 %v5498_v25, %v8567_v27 }
 0xdf2   : > { %v5499_v28 = vpop.f32.mrb[94].mxu0  ;;  %v4405_v58 = vmul.f32 %v4342_v59, %v8568_v10 }
 0xdf3   : > { %v4345_v35 = vpop.f32.mrb[95].mxu0  ;;  %v8155_v9 = vmul.f32 %v5499_v28, %v8569_v36 }
 0xdf8   : > { %v5502_v0 = vpop.f32.mrb[96].mxu0 }
 0xdf9   : > { %v8148_v39 = vmul.f32 %v5502_v0, %v7583_v44  ;;  %v4358_v52 = vpop.f32.mrb[97].mxu0  ;;  %v4406_v44 = vmul.f32 %v4345_v35, %v7529_v48 }
 0xdfa   : > { %v8152_v15 = vmul.f32 %v4358_v52, %v7613_v31  ;;  %v5503_v7 = vpop.f32.mrb[98].mxu0 }
 0xdfb   : > { %v4423_v1 = vmax.f32 %v8145_v60, %v8148_v39  ;;  %v8160_v34 = vmul.f32 %v5503_v7, %v7635_v20  ;;  %v4361_v13 = vpop.f32.mrb[99].mxu0 }
 0xdfc   : > { %v4421_v43 = vmax.f32 %v4405_v58, %v8152_v15  ;;  %v4410_v18 = vmul.f32 %v4361_v13, %v8570_v38 }
 0xdfd   : > { %v4424_v31 = vmax.f32 %v8155_v9, %v8160_v34 }
 0xdfe   : > { %v4422_v54 = vmax.f32 %v4406_v44, %v4410_v18 }
 0xe00   : > { %v5506_v21 = vpop.f32.mrb[100].mxu0 }
 0xe01   : > { %v8168_v51 = vmul.f32 %v5506_v21, %v7715_v41  ;;  %v4374_v30 = vpop.f32.mrb[101].mxu0 }
 0xe02   : > { %v8171_v45 = vmul.f32 %v4374_v30, %v7726_v3  ;;  %v5507_v20 = vpop.f32.mrb[102].mxu0 }
 0xe03   : > { %v4427_v5 = vmax.f32 %v4423_v1, %v8168_v51  ;;  %v8175_v48 = vmul.f32 %v5507_v20, %v7741_v50  ;;  %v4377_v57 = vpop.f32.mrb[103].mxu0 }
 0xe04   : > { %v4425_v17 = vmax.f32 %v4421_v43, %v8171_v45  ;;  %v4414_v32 = vmul.f32 %v4377_v57, %v7746_v47 }
 0xe05   : > { %v4428_v33 = vmax.f32 %v4424_v31, %v8175_v48 }
 0xe06   : > { %v4426_v42 = vmax.f32 %v4422_v54, %v4414_v32 }
 0xe08   : > { %v5510_v41 = vpop.f32.mrb[104].mxu0 }
 0xe09   : > { %v8181_v37 = vmul.f32 %v5510_v41, %v7767_v8  ;;  %v4390_v3 = vpop.f32.mrb[105].mxu0 }
 0xe0a   : > { %v8184_v46 = vmul.f32 %v4390_v3, %v7778_v40  ;;  %v5511_v2 = vpop.f32.mrb[106].mxu0 }
 0xe0b   : > { %v4431_v50 = vmax.f32 %v4427_v5, %v8181_v37  ;;  %v8188_v25 = vmul.f32 %v5511_v2, %v7786_v49  ;;  %v4393_v59 = vpop.f32.mrb[107].mxu0 }
 0xe0c   : > { %v4429_v47 = vmax.f32 %v4425_v17, %v8184_v46  ;;  %v8192_v28 = vmul.f32 %v4393_v59, %v7793_v61 }
 0xe0d   : > { %v4432_v35 = vmax.f32 %v4428_v33, %v8188_v25 }
 0xe0e   : > { %v4430_v8 = vmax.f32 %v4426_v42, %v8192_v28 }
 0xe0f   : > { %v4434_v0 = vmax.f32 %v4431_v50, %v4432_v35 }
 0xe10   : > { %v4433_v27 = vmax.f32 %v4429_v47, %v4430_v8 }
 0xe12   : > { %v4435_v40 = vmax.f32 %v4433_v27, %v4434_v0 }
 0xe14   : > { %v4436_v52 = vrot.slane %v4435_v40, 4 }
 0xe16   : > { %v4437_v10 = vmax.f32 %v4435_v40, %v4436_v52 }
 0xe18   : > { %v4438_v7 = vrot.slane %v4437_v10, 2 }
 0xe1a   : > { %v4439_v36 = vmax.f32 %v4437_v10, %v4438_v7 }
 0xe1c   : > { %v4440_v1 = vrot.slane %v4439_v36, 1 }
 0xe1e   : > { %v4441_v49 = vmax.f32 %v4439_v36, %v4440_v1 }
 0xe20   : > { %v4442_v13 = vsub.f32 %v4405_v58, %v4441_v49  ;;  %v4443_v43 = vsub.f32 %v4406_v44, %v4441_v49  ;;  %v4444_v38 = vsub.f32 %v8145_v60, %v4441_v49  ;;  %v4445_v61 = vsub.f32 %v8155_v9, %v4441_v49 }
 0xe21   : > { %v4446_v31 = vsub.f32 %v8152_v15, %v4441_v49  ;;  %v4447_v54 = vsub.f32 %v4410_v18, %v4441_v49  ;;  %v4448_v21 = vsub.f32 %v8148_v39, %v4441_v49  ;;  %v4449_v30 = vsub.f32 %v8160_v34, %v4441_v49 }
 0xe22   : > { %v4450_v20 = vsub.f32 %v8171_v45, %v4441_v49  ;;  %v4451_v5 = vsub.f32 %v4414_v32, %v4441_v49  ;;  %v4452_v57 = vsub.f32 %v8168_v51, %v4441_v49  ;;  %v4453_v17 = vsub.f32 %v8175_v48, %v4441_v49 }
 0xe23   : > { %v4454_v58 = vsub.f32 %v8184_v46, %v4441_v49  ;;  %v4455_v60 = vsub.f32 %v8192_v28, %v4441_v49  ;;  %v4456_v9 = vsub.f32 %v8181_v37, %v4441_v49  ;;  %v4457_v15 = vsub.f32 %v8188_v25, %v4441_v49 }
 0xe24   : > { %v4458_v44 = vmul.f32 1.442695, %v4442_v13  ;;  %v4460_v18 = vmul.f32 1.442695, %v4443_v43  ;;  %v4462_v39 = vmul.f32 1.442695, %v4444_v38 }
 0xe25   : > { %v4464_v34 = vmul.f32 1.442695, %v4445_v61  ;;  %v4466_v45 = vmul.f32 1.442695, %v4446_v31  ;;  %v4468_v51 = vmul.f32 1.442695, %v4447_v54 }
 0xe26   : > { %5826 = vpow2.f32 %v4458_v44  ;;  %v4470_v48 = vmul.f32 1.442695, %v4448_v21  ;;  %v4472_v32 = vmul.f32 1.442695, %v4449_v30  ;;  %v4474_v41 = vmul.f32 1.442695, %v4450_v20 }
 0xe27   : > { %5828 = vpow2.f32 %v4460_v18  ;;  %v4476_v46 = vmul.f32 1.442695, %v4451_v5  ;;  %v4478_v25 = vmul.f32 1.442695, %v4452_v57  ;;  %v4480_v28 = vmul.f32 1.442695, %v4453_v17 }
 0xe28   : > { %5830 = vpow2.f32 %v4462_v39  ;;  %v4482_v0 = vmul.f32 1.442695, %v4454_v58  ;;  %v4484_v52 = vmul.f32 1.442695, %v4455_v60  ;;  %v4486_v36 = vmul.f32 1.442695, %v4456_v9 }
 0xe29   : > { %5832 = vpow2.f32 %v4464_v34  ;;  %v4488_v13 = vmul.f32 1.442695, %v4457_v15 }
 0xe2a   : > { %5834 = vpow2.f32 %v4466_v45 }
 0xe2b   : > { %5836 = vpow2.f32 %v4468_v51 }
 0xe2c   : > { %5838 = vpow2.f32 %v4470_v48 }
 0xe2d   : > { %5840 = vpow2.f32 %v4472_v32 }
 0xe2e   : > { %5842 = vpow2.f32 %v4474_v41 }
 0xe2f   : > { %5844 = vpow2.f32 %v4476_v46 }
 0xe30   : > { %v5827_v33 = vpop.eup %5826  ;;  %5846 = vpow2.f32 %v4478_v25 }
 0xe31   : > { %v5829_v42 = vpop.eup %5828  ;;  %5848 = vpow2.f32 %v4480_v28 }
 0xe32   : > { %v4490_v37 = vadd.f32 %v5829_v42, %v5827_v33  ;;  %v5831_v3 = vpop.eup %5830  ;;  %5850 = vpow2.f32 %v4482_v0 }
 0xe33   : > { %v5833_v50 = vpop.eup %5832  ;;  %5852 = vpow2.f32 %v4484_v52 }
 0xe34   : > { %v4491_v2 = vadd.f32 %v5831_v3, %v4490_v37  ;;  %v5835_v47 = vpop.eup %5834  ;;  %5854 = vpow2.f32 %v4486_v36 }
 0xe35   : > { %v5837_v8 = vpop.eup %5836  ;;  %5856 = vpow2.f32 %v4488_v13 }
 0xe36   : > { %v4492_v59 = vadd.f32 %v5833_v50, %v4491_v2  ;;  %v5839_v40 = vpop.eup %5838 }
 0xe37   : > { %v5841_v7 = vpop.eup %5840 }
 0xe38   : > { %v4493_v35 = vadd.f32 %v5835_v47, %v4492_v59  ;;  %v5843_v49 = vpop.eup %5842 }
 0xe39   : > { %v5845_v38 = vpop.eup %5844 }
 0xe3a   : > { %v4494_v27 = vadd.f32 %v5837_v8, %v4493_v35  ;;  %v5847_v31 = vpop.eup %5846 }
 0xe3b   : > { %v5849_v21 = vpop.eup %5848 }
 0xe3c   : > { %v4495_v10 = vadd.f32 %v5839_v40, %v4494_v27  ;;  %v5851_v20 = vpop.eup %5850 }
 0xe3d   : > { %v5853_v57 = vpop.eup %5852 }
 0xe3e   : > { %v4496_v1 = vadd.f32 %v5841_v7, %v4495_v10  ;;  %v5855_v58 = vpop.eup %5854 }
 0xe3f   : > { %v5857_v9 = vpop.eup %5856 }
 0xe40   : > { %v4497_v43 = vadd.f32 %v5843_v49, %v4496_v1 }
 0xe42   : > { %v4498_v61 = vadd.f32 %v5845_v38, %v4497_v43 }
 0xe44   : > { %v4499_v54 = vadd.f32 %v5847_v31, %v4498_v61 }
 0xe46   : > { %v4500_v30 = vadd.f32 %v5849_v21, %v4499_v54 }
 0xe48   : > { %v4501_v5 = vadd.f32 %v5851_v20, %v4500_v30  ;;  %v5622_v30 = vld [vmem:[%s8319_s3 + $0xb0] sm:$0xff]  }
 0xe4a   : > { %v4502_v17 = vadd.f32 %v5853_v57, %v4501_v5 }
 0xe4c   : > { %v4503_v60 = vadd.f32 %v5855_v58, %v4502_v17 }
 0xe4e   : > { %v4504_v44 = vadd.f32 %v5857_v9, %v4503_v60 }
 0xe50   : > { %v4505_v18 = vrot.slane %v4504_v44, 4 }
 0xe52   : > { %v4506_v39 = vadd.f32 %v4505_v18, %v4504_v44 }
 0xe54   : > { %v4507_v15 = vrot.slane %v4506_v39, 2 }
 0xe56   : > { %v4508_v34 = vadd.f32 %v4507_v15, %v4506_v39 }
 0xe58   : > { %v4509_v45 = vrot.slane %v4508_v34, 1 }
 0xe5a   : > { %v4510_v51 = vadd.f32 %v4509_v45, %v4508_v34 }
 0xe5c   : > { %5858 = vrcp.f32 %v4510_v51 }
 0xe66   : > { %v5859_v48 = vpop.eup %5858 }
 0xe67   : > { %v4512_v32 = vmul.f32 %v5859_v48, %v5827_v33  ;;  %v4513_v41 = vmul.f32 %v5859_v48, %v5829_v42  ;;  %v4514_v37 = vmul.f32 %v5859_v48, %v5831_v3  ;;  %v4515_v46 = vmul.f32 %v5859_v48, %v5833_v50 }
 0xe68   : > { %v4516_v2 = vmul.f32 %v5859_v48, %v5835_v47  ;;  %v4517_v25 = vmul.f32 %v5859_v48, %v5837_v8  ;;  %v4518_v59 = vmul.f32 %v5859_v48, %v5839_v40  ;;  %v4519_v28 = vmul.f32 %v5859_v48, %v5841_v7 }
 0xe69   : > { %v4528_v35 = vpack.c.bf16 %v4513_v41, %v4512_v32  ;;  %v4529_v0 = vpack.c.bf16 %v4515_v46, %v4514_v37  ;;  %v4520_v27 = vmul.f32 %v5859_v48, %v5843_v49  ;;  %v4521_v52 = vmul.f32 %v5859_v48, %v5845_v38 }
 0xe6a   : > { %v4530_v10 = vpack.c.bf16 %v4517_v25, %v4516_v2  ;;  %v4531_v36 = vpack.c.bf16 %v4519_v28, %v4518_v59  ;;  %v4522_v1 = vmul.f32 %v5859_v48, %v5847_v31  ;;  %v4523_v13 = vmul.f32 %v5859_v48, %v5849_v21 }
 0xe6b   : > { %5512 = vmatprep.subr.bf16.mxu1 %v4528_v35  ;;  %v4532_v43 = vpack.c.bf16 %v4521_v52, %v4520_v27  ;;  %v4524_v61 = vmul.f32 %v5859_v48, %v5851_v20  ;;  %v4525_v54 = vmul.f32 %v5859_v48, %v5853_v57  ;;  %v4526_v33 = vmul.f32 %v5859_v48, %v5855_v58  ;;  %v4605_v20 = vpop.permute.xlu1 %4604  ;;  %v5624_v27 = vld [vmem:[%s8319_s3 + $0xc0] sm:$0xff]   ;;  %v5625_v52 = vld [vmem:[%s8319_s3 + $0xc8] sm:$0xff]  }
 0xe6c   : > { %5513 = vmatpush3.bf16.msra.mxu1 %v4528_v35  ;;  %v4533_v42 = vpack.c.bf16 %v4523_v13, %v4522_v1  ;;  %v4527_v3 = vmul.f32 %v5859_v48, %v5857_v9  ;;  %v8571_v8 = vpack.c.bf16 %v8002_v26, %v8000_v56  ;;  %v5623_v56 = vld [vmem:[%s8319_s3 + $0xb8] sm:$0xff]   ;;  %v4600_v26 = vpop.permute.xlu0 %4599 }
 0xe6d   : > { %5514 = vmatprep.subr.bf16.mxu1 %v4529_v0  ;;  %v4534_v50 = vpack.c.bf16 %v4525_v54, %v4524_v61 }
 0xe6e   : > { %v4535_v47 = vpack.c.bf16 %v4527_v3, %v4526_v33 }
 0xe70   : > { %5515 = vmatpush3.bf16.msra.mxu1 %v4529_v0  ;;  %v4610_v57 = vpop.permute.xlu0 %4609 }
 0xe71   : > { %5516 = vmatprep.subr.bf16.mxu1 %v4530_v10 }
 0xe74   : > { %5517 = vmatpush3.bf16.msra.mxu1 %v4530_v10  ;;  %v4615_v51 = vpop.permute.xlu0 %4614 }
 0xe75   : > { %5518 = vmatprep.subr.bf16.mxu1 %v4531_v36 }
 0xe78   : > { %5519 = vmatpush3.bf16.msra.mxu1 %v4531_v36  ;;  %v4709_v10 = vpop.permute.xlu0 %4708 }
 0xe79   : > { %5520 = vmatprep.subr.bf16.mxu1 %v4532_v43 }
 0xe7c   : > { %5521 = vmatpush3.bf16.msra.mxu1 %v4532_v43  ;;  %v4714_v43 = vpop.permute.xlu0 %4713 }
 0xe7d   : > { %5522 = vmatprep.subr.bf16.mxu1 %v4533_v42 }
 0xe80   : > { %5523 = vmatpush3.bf16.msra.mxu1 %v4533_v42 }
 0xe81   : > { %5524 = vmatprep.subr.bf16.mxu1 %v4534_v50 }
 0xe84   : > { %5525 = vmatpush3.bf16.msra.mxu1 %v4534_v50 }
 0xe85   : > { %5526 = vmatprep.subr.bf16.mxu1 %v4535_v47 }
 0xe88   : > { %5527 = vmatpush3.bf16.msra.mxu1 %v4535_v47 }
 0xe8b   : > { %5529 = vmatmul.mubr.bf16.vlgmr.msra.gmra.mrb[108].mxu1 %v8571_v8 }
 0xe8c   : > { %4665 = vmatprep.mubr.bf16.mxu1 %v8533_v6 }
 0xf5e   : > { %v5530_v40 = vpop.f32.mrb[108].mxu1 }
 0xf5f   : > { %v4570_v7 = vpop.f32.mrb[109].mxu1 }
 0xf60   : > { %v5531_v49 = vpop.f32.mrb[110].mxu1 }
 0xf61   : > { %v4588_v38 = vpack.c.bf16 %v5531_v49, %v5530_v40  ;;  %v4573_v31 = vpop.f32.mrb[111].mxu1  ;;  %v4719_v49 = vpop.permute.xlu0 %4718 }
 0xf62   : > { %v4586_v21 = vpack.c.bf16 %v4573_v31, %v4570_v7 }
 0xf64   : > { %4633 = vmatprep.subr.bf16.mxu1 %v4586_v21 }
 0xf65   : > { %4634 = vmatpush1.bf16.msra.mxu1 %v4585_v62 }
 0xf66   : > { %4635 = vmatprep.subr.bf16.mxu1 %v4588_v38 }
 0xf69   : > { %4636 = vmatpush1.bf16.msra.mxu1 %v4587_v24 }
 0xf6c   : > { %5146 = vmatmul.mubr.msk.bf16.vlgmr.msra.gmra.mrb[112].mxu1 %vm2299_vm2, %v5622_v30 }
 0xf6d   : > { %4675 = vmatprep.mubr.bf16.mxu1 %v8533_v6 }
 0xf74   : > { %5147 = vmatmul.mubr.msk.bf16.gmra.mrb[116].mxu1 %vm2299_vm2, %v5623_v56  ;;  %v4724_v56 = vpop.permute.xlu1 %4723 }
 0xf75   : > { %4774 = vmatprep.mubr.bf16.mxu1 %v8533_v6 }
0x103f   : > { %v4667_v4 = vpop.f32.mrb[112].mxu1 }
0x1040   : > { %v4668_v16 = vadd.f32 %v4667_v4, %v4600_v26  ;;  %v4669_v62 = vpop.f32.mrb[113].mxu1 }
0x1041   : > { %v4670_v5 = vadd.f32 %v4669_v62, %v4600_v26  ;;  %v4671_v14 = vpop.f32.mrb[114].mxu1 }
0x1042   : > { %v4672_v22 = vadd.f32 %v4671_v14, %v4605_v20  ;;  %v4673_v24 = vpop.f32.mrb[115].mxu1  ;;  %v4686_v58 = vmax.f32 %v4668_v16, 0.0 }
0x1043   : > { %v4674_v17 = vadd.f32 %v4673_v24, %v4605_v20  ;;  %v4687_v9 = vmax.f32 %v4670_v5, 0.0 }
0x1044   : > { %v4688_v60 = vmax.f32 %v4672_v22, 0.0 }
0x1045   : > { %v4689_v44 = vmax.f32 %v4674_v17, 0.0 }
0x1046   : > { %v4694_v18 = vpack.c.bf16 %v4688_v60, %v4686_v58  ;;  %v5626_v58 = vld [vmem:[%s8319_s3 + $0xd0] sm:$0xff]   ;;  %v5627_v60 = vld [vmem:[%s8319_s3 + $0xd8] sm:$0xff]  }
0x1047   : > { %v4695_v39 = vpack.c.bf16 %v4689_v44, %v4687_v9  ;;  %v4677_v15 = vpop.f32.mrb[116].mxu1  ;;  %v4818_v9 = vpop.permute.xlu0 %4817 }
0x1048   : > { %v4678_v34 = vadd.f32 %v4677_v15, %v4610_v57  ;;  %v4679_v45 = vpop.f32.mrb[117].mxu1  ;;  %v4823_v15 = vpop.permute.xlu1 %4822 }
0x1049   : > { %v4680_v48 = vadd.f32 %v4679_v45, %v4610_v57  ;;  %v4681_v32 = vpop.f32.mrb[118].mxu1  ;;  %4742 = vmatprep.subr.bf16.mxu1 %v4695_v39 }
0x104a   : > { %v4682_v41 = vadd.f32 %v4681_v32, %v4615_v51  ;;  %v4683_v37 = vpop.f32.mrb[119].mxu1  ;;  %4743 = vmatpush1.bf16.msra.mxu1 %v4694_v18  ;;  %v4690_v2 = vmax.f32 %v4678_v34, 0.0 }
0x104b   : > { %v4684_v46 = vadd.f32 %v4683_v37, %v4615_v51  ;;  %v4691_v59 = vmax.f32 %v4680_v48, 0.0  ;;  %v8572_v51 = vmax.f32 %v7925_v63, 0.0 }
0x104c   : > { %v4692_v25 = vmax.f32 %v4682_v41, 0.0  ;;  %v8573_v41 = vmax.f32 %v7923_v12, 0.0 }
0x104d   : > { %v4693_v28 = vmax.f32 %v4684_v46, 0.0 }
0x104e   : > { %v4696_v35 = vpack.c.bf16 %v4692_v25, %v4690_v2  ;;  %v8574_v2 = vmax.f32 %v7927_v11, 0.0 }
0x104f   : > { %v4697_v0 = vpack.c.bf16 %v4693_v28, %v4691_v59  ;;  %v8575_v59 = vmax.f32 %v7929_v53, 0.0  ;;  %v8577_v53 = vmax.f32 %v7943_v23, 0.0 }
0x1051   : > { %4744 = vmatprep.subr.bf16.mxu1 %v4697_v0 }
0x1052   : > { %4745 = vmatpush1.bf16.msra.mxu1 %v4696_v35  ;;  %v4828_v35 = vpop.permute.xlu0 %4827 }
0x1055   : > { %5150 = vmatmul.mubr.msk.bf16.vlgmr.msra.gmra.mrb[120].mxu1 %vm2299_vm2, %v5624_v27 }
0x1056   : > { %4784 = vmatprep.mubr.bf16.mxu1 %v8533_v6 }
0x105d   : > { %5151 = vmatmul.mubr.msk.bf16.gmra.mrb[124].mxu1 %vm2299_vm2, %v5625_v52  ;;  %v4833_v52 = vpop.permute.xlu1 %4832 }
0x1128   : > { %v4776_v36 = vpop.f32.mrb[120].mxu1 }
0x1129   : > { %v4777_v1 = vadd.f32 %v4776_v36, %v4709_v10  ;;  %v4778_v13 = vpop.f32.mrb[121].mxu1  ;;  %v8576_v36 = vmax.f32 %v7945_v19, 0.0  ;;  %v8579_v19 = vmax.f32 %v7949_v29, 0.0 }
0x112a   : > { %v4779_v61 = vadd.f32 %v4778_v13, %v4709_v10  ;;  %v4780_v54 = vpop.f32.mrb[122].mxu1 }
0x112b   : > { %v4781_v33 = vadd.f32 %v4780_v54, %v4714_v43  ;;  %v4782_v42 = vpop.f32.mrb[123].mxu1  ;;  %v4795_v50 = vmax.f32 %v4777_v1, 0.0  ;;  %v8578_v54 = vmax.f32 %v7947_v55, 0.0 }
0x112c   : > { %v4783_v3 = vadd.f32 %v4782_v42, %v4714_v43  ;;  %v4796_v8 = vmax.f32 %v4779_v61, 0.0 }
0x112d   : > { %v4797_v47 = vmax.f32 %v4781_v33, 0.0 }
0x112e   : > { %v4798_v40 = vmax.f32 %v4783_v3, 0.0 }
0x112f   : > { %v4803_v7 = vpack.c.bf16 %v4797_v47, %v4795_v50 }
0x1130   : > { %v4804_v38 = vpack.c.bf16 %v4798_v40, %v4796_v8  ;;  %v4786_v31 = vpop.f32.mrb[124].mxu1 }
0x1131   : > { %v4787_v21 = vadd.f32 %v4786_v31, %v4719_v49  ;;  %v4788_v30 = vpop.f32.mrb[125].mxu1 }
0x1132   : > { %v4789_v26 = vadd.f32 %v4788_v30, %v4719_v49  ;;  %v4790_v4 = vpop.f32.mrb[126].mxu1  ;;  %4851 = vmatprep.subr.bf16.mxu0 %v4804_v38 }
0x1133   : > { %v4791_v16 = vadd.f32 %v4790_v4, %v4724_v56  ;;  %v4792_v62 = vpop.f32.mrb[127].mxu1  ;;  %4852 = vmatpush1.bf16.msra.mxu0 %v4803_v7  ;;  %v4799_v5 = vmax.f32 %v4787_v21, 0.0 }
0x1134   : > { %v4793_v20 = vadd.f32 %v4792_v62, %v4724_v56  ;;  %v4800_v22 = vmax.f32 %v4789_v26, 0.0 }
0x1135   : > { %v4801_v14 = vmax.f32 %v4791_v16, 0.0 }
0x1136   : > { %v4802_v24 = vmax.f32 %v4793_v20, 0.0 }
0x1137   : > { %v4805_v57 = vpack.c.bf16 %v4801_v14, %v4799_v5 }
0x1138   : > { %v4806_v17 = vpack.c.bf16 %v4802_v24, %v4800_v22 }
0x113a   : > { %4853 = vmatprep.subr.bf16.mxu0 %v4806_v17 }
0x113b   : > { %4854 = vmatpush1.bf16.msra.mxu0 %v4805_v57 }
0x113e   : > { %5154 = vmatmul.mubr.msk.bf16.vlgmr.msra.gmra.mrb[108].mxu0 %vm2299_vm2, %v5626_v58 }
0x113f   : > { %4893 = vmatprep.mubr.bf16.mxu0 %v8533_v6 }
0x1146   : > { %5155 = vmatmul.mubr.msk.bf16.gmra.mrb[112].mxu0 %vm2299_vm2, %v5627_v60 }
0x1211   : > { %v4885_v44 = vpop.f32.mrb[108].mxu0 }
0x1212   : > { %v4886_v18 = vadd.f32 %v4885_v44, %v4818_v9  ;;  %v4887_v39 = vpop.f32.mrb[109].mxu0 }
0x1213   : > { %v4888_v34 = vadd.f32 %v4887_v39, %v4818_v9  ;;  %v4889_v45 = vpop.f32.mrb[110].mxu0 }
0x1214   : > { %v4904_v48 = vadd.f32 %v4886_v18, %v8572_v51  ;;  %v4890_v6 = vadd.f32 %v4889_v45, %v4823_v15  ;;  %v4891_v32 = vpop.f32.mrb[111].mxu0 }
0x1215   : > { %v4905_v37 = vadd.f32 %v4888_v34, %v8573_v41  ;;  %v4892_v46 = vadd.f32 %v4891_v32, %v4823_v15 }
0x1216   : > { %4912 = vst [vmem:[%s230_s23] sm:$0xff] %v4904_v48  ;;  %v4906_v25 = vadd.f32 %v4890_v6, %v8574_v2 }
0x1217   : > { %4913 = vst [vmem:[%s230_s23 + $0x8] sm:$0xff] %v4905_v37  ;;  %v4907_v28 = vadd.f32 %v4892_v46, %v8575_v59 }
0x1218   : > { %4914 = vst [vmem:[%s230_s23 + $0x10] sm:$0xff] %v4906_v25 }
0x1219   : > { %4915 = vst [vmem:[%s230_s23 + $0x18] sm:$0xff] %v4907_v28  ;;  %v4895_v63 = vpop.f32.mrb[112].mxu0 }
0x121a   : > { %v4896_v0 = vadd.f32 %v4895_v63, %v4828_v35  ;;  %v4897_v27 = vpop.f32.mrb[113].mxu0 }
0x121b   : > { %v4898_v12 = vadd.f32 %v4897_v27, %v4828_v35  ;;  %v4899_v10 = vpop.f32.mrb[114].mxu0 }
0x121c   : > { %v4908_v11 = vadd.f32 %v4896_v0, %v8576_v36  ;;  %v4900_v1 = vadd.f32 %v4899_v10, %v4833_v52  ;;  %v4901_v13 = vpop.f32.mrb[115].mxu0 }
0x121d   : > { %v4909_v43 = vadd.f32 %v4898_v12, %v8577_v53  ;;  %v4902_v61 = vadd.f32 %v4901_v13, %v4833_v52 }
0x121e   : > { %4916 = vst [vmem:[%s230_s23 + $0x20] sm:$0xff] %v4908_v11  ;;  %v4910_v33 = vadd.f32 %v4900_v1, %v8578_v54 }
0x121f   : > { %4917 = vst [vmem:[%s230_s23 + $0x28] sm:$0xff] %v4909_v43  ;;  %v4911_v23 = vadd.f32 %v4902_v61, %v8579_v19 }
0x1220   : > { %4918 = vst [vmem:[%s230_s23 + $0x30] sm:$0xff] %v4910_v33 }
0x1221   : > { %4919 = vst [vmem:[%s230_s23 + $0x38] sm:$0xff] %v4911_v23 }
0x1222   : > { %5875 = shalt.err (!%p5872_p3)
}
0x1223   : > { %s5876_s12 = scalar_lea.hbm %s8267_s7, 1024  ;;  %s5880_s15 = scalar_lea.hbm %s8321_s5, 2048 }
0x1224   : > { %p5877_p4 = scmp.ne.s32.totalorder %s8267_s7, %s5876_s12  ;;  %p5881_p9 = scmp.lt.u32.totalorder %s8267_s7, %s8321_s5 }
0x1225   : > { %p5882_p10 = scmp.lt.u32.totalorder %s5880_s15, %s5876_s12  ;;  %p5884_p12 = scmp.lt.u32.totalorder %s5876_s12, %s8267_s7 }
0x1226   : > { %p5878_p7 = pnand %p5877_p4, %p6004_p5 }
0x1227   : > { %p5883_p11 = por %p5882_p10, %p5881_p9 }
0x1228   : > { %p5879_p8 = pneg %p5878_p7 }
0x1229   : > { %p5885_p13 = por %p5884_p12, %p5883_p11 }
0x122b   : > { %p5886_p0 = pnand %p5885_p13, %p5879_p8 }
0x122d   : > { %5889 = shalt.err (!%p5886_p0)
}
0x122e   : > { %s5934_s23 = smov 256   ;;  %s5935_s25 = smov 16  }
0x122f   : > { %5534 = dma.vmem_to_hbm [thread:$0]  (%p6004_p5), %s8269_s26, 1024, %s8267_s7, %s8275_s22, %s5934_s23, %s5934_s23, %s5935_s25  }
0x1230 PF: > { %p5540_p1 = scmp.ge.s32.totalorder %s5924_s21, 2  ;;  %s4949_s30 = sand.u32 1, %s5912_s18  }
0x1231   : > { %s4950_s6 = scalar_lea.sflag [#allocation4], %s4949_s30 }
0x1232   : > { %p5537_p2 = pnand %p5540_p1, %p6008_p6 }
0x1234   : > { %5907 = dma.done.wait (!%p5537_p2), %s4950_s6, 1024  }
0x1235   : > { %5909 = vsyncadd (!%p5537_p2), %s4950_s6, 4294966272  ;;  %p15_p3 = scmp.ge.s32.totalorder %s5991_s24, 4   ;;  %s8580_s18 = smov %s5916_s19 }
0x1236   : > { %s8581_s19 = smov %s5920_s20  ;;  %s8582_s20 = smov %s6002_s27 }
0x1237   : > { %s8583_s21 = smov %s5991_s24  ;;  %17 = sbr.rel (!%p15_p3) target bundleno = 3 (0x3), region = 80 }
0x123e   :  { %4955 = vsyncpa [#allocation4], 1 }
0x123f   :  { %4957 = vsyncpa [#allocation4 + $0x1], 1 }

</bundles_post_ra>
